<compile_context>
chip_gen: v7x
topology: tpu7x:2x2x1
jax: 0.10.0
libtpu: 0.0.40
codegen_flags: <defaults>
</compile_context>

<pallas_src>
import functools

import jax
import jax.numpy as jnp
from jax import lax
from jax.experimental import pallas as pl
from jax.experimental.pallas import tpu as pltpu


def _round_up(x, m):
    return (x + m - 1) // m * m


def _bottleneck_kernel(x_ref, w1_ref, s1_ref, b1_ref,
                       w2_ref, s2_ref, b2_ref,
                       w3_ref, s3_ref, b3_ref,
                       o_ref, pad_ref, *, ch_rows):
    # x_ref:   (1, H, W, Cin)   o_ref: (1, H, W, Cout)
    # pad_ref: (H+2, round_up(W+2, 8), Cp) bf16  -- zero halo + conv1 output.
    _, H, W, Cin = x_ref.shape
    Cp = w1_ref.shape[1]
    Cout = w3_ref.shape[1]
    Hp2, Wp2r, _ = pad_ref.shape
    n_chunks = H // ch_rows
    M = ch_rows * W
    f32 = jnp.float32
    bf16 = jnp.bfloat16

    # Hoist BN scale/bias loads out of the row-chunk loops.
    s1 = s1_ref[...]
    b1 = b1_ref[...]
    s2 = s2_ref[...]
    b2 = b2_ref[...]
    s3 = s3_ref[...]
    b3 = b3_ref[...]

    # Zero only the 1-pixel halo of the padded scratch; the interior is fully
    # overwritten every grid step below before being read.
    zrow = jnp.zeros((1, Wp2r, Cp), bf16)
    zcol = jnp.zeros((Hp2, 1, Cp), bf16)
    pad_ref[0:1, :, :] = zrow
    pad_ref[H + 1:H + 2, :, :] = zrow
    pad_ref[:, 0:1, :] = zcol
    pad_ref[:, W + 1:W + 2, :] = zcol

    # ---- stage 1: conv1 (1x1) + bn1 + relu, row-chunked, into pad interior.
    def stage1(i, carry):
        h0 = pl.multiple_of(i * ch_rows, ch_rows)
        xm = x_ref[0, pl.ds(h0, ch_rows), :, :].reshape(M, Cin)
        y = jnp.dot(xm.astype(bf16), w1_ref[...], preferred_element_type=f32)
        y = jnp.maximum(y * s1 + b1, 0.0)
        pad_ref[pl.ds(h0 + 1, ch_rows), 1:W + 1, :] = (
            y.astype(bf16).reshape(ch_rows, W, Cp))
        return carry

    lax.fori_loop(0, n_chunks, stage1, 0, unroll=n_chunks <= 8)

    # ---- stage 2: conv2 (3x3) as ONE im2col matmul per chunk (K = 9*Cp),
    # then bn2 + relu, conv3 (1x1), bn3, residual add, relu, store.
    def stage2(i, carry):
        h0 = pl.multiple_of(i * ch_rows, ch_rows)
        cols = []
        for dy in range(3):
            for dx in range(3):
                patch = pad_ref[pl.ds(h0 + dy, ch_rows), dx:dx + W, :]
                cols.append(patch.reshape(M, Cp))
        lhs = jnp.concatenate(cols, axis=1)                     # (M, 9*Cp) bf16
        acc = jnp.dot(lhs, w2_ref[...], preferred_element_type=f32)
        acc = jnp.maximum(acc * s2 + b2, 0.0)
        z = jnp.dot(acc.astype(bf16), w3_ref[...], preferred_element_type=f32)
        z = z * s3 + b3
        xm = x_ref[0, pl.ds(h0, ch_rows), :, :].reshape(M, Cin)
        z = jnp.maximum(z + xm, 0.0)                            # Cin == Cout
        o_ref[0, pl.ds(h0, ch_rows), :, :] = (
            z.reshape(ch_rows, W, Cout).astype(o_ref.dtype))
        return carry

    lax.fori_loop(0, n_chunks, stage2, 0, unroll=n_chunks <= 8)


def _pick_chunk_rows(H, W, target_flat=128):
    ch = max(1, min(H, target_flat // max(W, 1)))
    while H % ch:
        ch -= 1
    return ch


def prepare_kernel_params(params):
    """Pad/cast logical params into the lane-dense bf16 layout the kernel uses."""
    (w1, s1, b1, w2, s2, b2, w3, s3, b3) = params
    _, Cw = w1.shape
    Cout = w3.shape[1]
    Cp = _round_up(Cw, 128)
    pw = Cp - Cw

    def vec(v, c):
        return jnp.pad(v.astype(jnp.float32), (0, c - v.shape[0])).reshape(1, c)

    w1k = jnp.pad(w1, ((0, 0), (0, pw))).astype(jnp.bfloat16)            # (Cin, Cp)
    w2k = jnp.pad(w2, ((0, 0), (0, 0), (0, pw), (0, pw)))
    w2k = w2k.reshape(9 * Cp, Cp).astype(jnp.bfloat16)                   # (9*Cp, Cp)
    w3k = jnp.pad(w3, ((0, pw), (0, 0))).astype(jnp.bfloat16)            # (Cp, Cout)
    return (w1k, vec(s1, Cp), vec(b1, Cp),
            w2k, vec(s2, Cp), vec(b2, Cp),
            w3k, vec(s3, Cout), vec(b3, Cout))


@jax.jit
def bottleneck_pallas_nhwc(x_nhwc, kparams):
    """x_nhwc: (N, H, W, Cin) f32. Returns (N, H, W, Cout) f32 (Cout == Cin)."""
    (w1k, s1k, b1k, w2k, s2k, b2k, w3k, s3k, b3k) = kparams
    N, H, W, Cin = x_nhwc.shape
    Cp = w1k.shape[1]
    Cout = w3k.shape[1]
    assert Cin == w1k.shape[0]
    assert Cout == Cin, "identity shortcut requires inplanes == planes * 4"

    ch_rows = _pick_chunk_rows(H, W)
    Wp2r = _round_up(W + 2, 8)

    def full(a):
        nd = a.ndim
        return pl.BlockSpec(a.shape, lambda n, _r=nd: (0,) * _r)

    flops = 2 * N * H * W * (Cin * Cp + 9 * Cp * Cp + Cp * Cout)
    bytes_accessed = (x_nhwc.size * 4 + N * H * W * Cout * 4
                      + sum(int(p.size) * p.dtype.itemsize for p in kparams))

    kernel = functools.partial(_bottleneck_kernel, ch_rows=ch_rows)
    return pl.pallas_call(
        kernel,
        out_shape=jax.ShapeDtypeStruct((N, H, W, Cout), jnp.float32),
        grid_spec=pltpu.PrefetchScalarGridSpec(
            num_scalar_prefetch=0,
            grid=(N,),
            in_specs=[
                pl.BlockSpec((1, H, W, Cin), lambda n: (n, 0, 0, 0)),
                full(w1k), full(s1k), full(b1k),
                full(w2k), full(s2k), full(b2k),
                full(w3k), full(s3k), full(b3k),
            ],
            out_specs=pl.BlockSpec((1, H, W, Cout), lambda n: (n, 0, 0, 0)),
            scratch_shapes=[pltpu.VMEM((H + 2, Wp2r, Cp), jnp.bfloat16)],
        ),
        compiler_params=pltpu.CompilerParams(
            dimension_semantics=("parallel",)),
        cost_estimate=pl.CostEstimate(
            flops=int(flops), transcendentals=0,
            bytes_accessed=int(bytes_accessed)),
    )(x_nhwc, w1k, s1k, b1k, w2k, s2k, b2k, w3k, s3k, b3k)


def bottleneck_pallas(x_nchw, kparams):
    """PyTorch-layout wrapper: (N, Cin, H, W) -> (N, Cout, H, W).
    Prefer bottleneck_pallas_nhwc to avoid the two boundary transposes."""
    x = jnp.transpose(x_nchw, (0, 2, 3, 1))
    out = bottleneck_pallas_nhwc(x, kparams)
    return jnp.transpose(out, (0, 3, 1, 2))


# ---------------------------------------------------------------------------
# Parameter construction (deterministic, synthetic) and pure-JAX reference
# ---------------------------------------------------------------------------
def make_params(key, inplanes, planes, base_width=64, groups=1):
    expansion = 4
    width = int(planes * (base_width / 64.0)) * groups
    cout = planes * expansion
    eps = 1e-5
    ks = jax.random.split(key, 12)

    def bn_fold(kg, kb, km, kv, c):
        gamma = jax.random.uniform(kg, (c,), jnp.float32, 0.5, 1.5)
        beta = 0.1 * jax.random.normal(kb, (c,), jnp.float32)
        rmean = 0.1 * jax.random.normal(km, (c,), jnp.float32)
        rvar = jax.random.uniform(kv, (c,), jnp.float32, 0.5, 1.5)
        scale = gamma * lax.rsqrt(rvar + eps)
        bias = beta - rmean * scale
        return scale, bias

    # PyTorch conv weight layouts (O, I, kh, kw), converted to matmul / HWIO.
    w1_t = 0.1 * jax.random.normal(ks[0], (width, inplanes, 1, 1), jnp.float32)
    w2_t = 0.1 * jax.random.normal(ks[1], (width, width, 3, 3), jnp.float32)
    w3_t = 0.1 * jax.random.normal(ks[2], (cout, width, 1, 1), jnp.float32)

    w1 = jnp.transpose(w1_t[:, :, 0, 0], (1, 0))          # (Cin, width)
    w2 = jnp.transpose(w2_t, (2, 3, 1, 0))                # (3, 3, width, width)
    w3 = jnp.transpose(w3_t[:, :, 0, 0], (1, 0))          # (width, Cout)

    s1, b1 = bn_fold(ks[3], ks[4], ks[5], ks[6], width)
    s2, b2 = bn_fold(ks[7], ks[8], ks[9], ks[10], width)
    s3, b3 = bn_fold(ks[11], ks[3], ks[7], ks[0], cout)
    return (w1, s1, b1, w2, s2, b2, w3, s3, b3)


def bottleneck_reference_nhwc(x, params):
    """Pure-JAX reference mirroring the kernel's bf16 quantisation points."""
    (w1, s1, b1, w2, s2, b2, w3, s3, b3) = params
    dn = ("NHWC", "HWIO", "NHWC")

    def conv(inp, w, pad):
        return lax.conv_general_dilated(
            inp.astype(jnp.bfloat16), w.astype(jnp.bfloat16), (1, 1), pad,
            dimension_numbers=dn, preferred_element_type=jnp.float32)

    y = conv(x, w1.reshape(1, 1, *w1.shape), "VALID") * s1 + b1
    y = jnp.maximum(y, 0.0)
    y = conv(y, w2, ((1, 1), (1, 1))) * s2 + b2
    y = jnp.maximum(y, 0.0)
    y = conv(y, w3.reshape(1, 1, *w3.shape), "VALID") * s3 + b3
    return jnp.maximum(y + x, 0.0)


if __name__ == "__main__":
    key = jax.random.PRNGKey(0)
    k_x, k_p = jax.random.split(key)

    # Small shapes: planes=4 -> width=4, inplanes = planes * expansion = 16.
    planes = 4
    inplanes = planes * 4
    N, H, W = 2, 16, 16

    params = make_params(k_p, inplanes, planes)
    kparams = prepare_kernel_params(params)

    # Primary NHWC path (no boundary transposes).
    x_nhwc = jax.random.normal(k_x, (N, H, W, inplanes), jnp.float32)
    out = jax.block_until_ready(bottleneck_pallas_nhwc(x_nhwc, kparams))
    ref = jax.block_until_ready(bottleneck_reference_nhwc(x_nhwc, params))
    assert out.shape == (N, H, W, planes * 4)
    max_err = float(jnp.max(jnp.abs(out - ref)))
    assert jnp.allclose(out, ref, atol=2e-3, rtol=2e-3), max_err

    # NCHW (PyTorch-layout) compatibility wrapper.
    x_nchw = jnp.transpose(x_nhwc, (0, 3, 1, 2))
    out_nchw = jax.block_until_ready(bottleneck_pallas(x_nchw, kparams))
    assert jnp.allclose(out_nchw, jnp.transpose(ref, (0, 3, 1, 2)),
                        atol=2e-3, rtol=2e-3)

    print("KERNEL_OK")
</pallas_src>

<mosaic_0001>
module attributes {stable_mosaic.version = 11 : i64} {
  func.func @_bottleneck_kernel(%arg0: i32, %arg1: memref<1x16x16x16xf32, #tpu.memory_space<vmem>>, %arg2: memref<16x128xbf16, #tpu.memory_space<vmem>>, %arg3: memref<1x128xf32, #tpu.memory_space<vmem>>, %arg4: memref<1x128xf32, #tpu.memory_space<vmem>>, %arg5: memref<1152x128xbf16, #tpu.memory_space<vmem>>, %arg6: memref<1x128xf32, #tpu.memory_space<vmem>>, %arg7: memref<1x128xf32, #tpu.memory_space<vmem>>, %arg8: memref<128x16xbf16, #tpu.memory_space<vmem>>, %arg9: memref<1x16xf32, #tpu.memory_space<vmem>>, %arg10: memref<1x16xf32, #tpu.memory_space<vmem>>, %arg11: memref<1x16x16x16xf32, #tpu.memory_space<vmem>>, %arg12: memref<18x24x128xbf16, #tpu.memory_space<vmem>>) attributes {dimension_semantics = [#tpu.dimension_semantics<parallel>], iteration_bounds = array<i64: 2>, scalar_prefetch = 0 : i64, scratch_operands = 1 : i64, tpu.core_type = #tpu.core_type<tc>, window_params = [{transform_indices = @transform_0, window_bounds = array<i64: 1, 16, 16, 16>}, {pipeline_mode = #tpu.pipeline_mode<synchronous>, transform_indices = @transform_1, window_bounds = array<i64: 16, 128>}, {pipeline_mode = #tpu.pipeline_mode<synchronous>, transform_indices = @transform_2, window_bounds = array<i64: 1, 128>}, {pipeline_mode = #tpu.pipeline_mode<synchronous>, transform_indices = @transform_3, window_bounds = array<i64: 1, 128>}, {pipeline_mode = #tpu.pipeline_mode<synchronous>, transform_indices = @transform_4, window_bounds = array<i64: 1152, 128>}, {pipeline_mode = #tpu.pipeline_mode<synchronous>, transform_indices = @transform_5, window_bounds = array<i64: 1, 128>}, {pipeline_mode = #tpu.pipeline_mode<synchronous>, transform_indices = @transform_6, window_bounds = array<i64: 1, 128>}, {pipeline_mode = #tpu.pipeline_mode<synchronous>, transform_indices = @transform_7, window_bounds = array<i64: 128, 16>}, {pipeline_mode = #tpu.pipeline_mode<synchronous>, transform_indices = @transform_8, window_bounds = array<i64: 1, 16>}, {pipeline_mode = #tpu.pipeline_mode<synchronous>, transform_indices = @transform_9, window_bounds = array<i64: 1, 16>}, {transform_indices = @transform_10, window_bounds = array<i64: 1, 16, 16, 16>}]} {
    %c0 = arith.constant 0 : index
    %c0_0 = arith.constant 0 : index
    %0 = vector.load %arg3[%c0, %c0_0] : memref<1x128xf32, #tpu.memory_space<vmem>>, vector<1x128xf32>
    %c0_1 = arith.constant 0 : index
    %c0_2 = arith.constant 0 : index
    %1 = vector.load %arg4[%c0_1, %c0_2] : memref<1x128xf32, #tpu.memory_space<vmem>>, vector<1x128xf32>
    %c0_3 = arith.constant 0 : index
    %c0_4 = arith.constant 0 : index
    %2 = vector.load %arg6[%c0_3, %c0_4] : memref<1x128xf32, #tpu.memory_space<vmem>>, vector<1x128xf32>
    %c0_5 = arith.constant 0 : index
    %c0_6 = arith.constant 0 : index
    %3 = vector.load %arg7[%c0_5, %c0_6] : memref<1x128xf32, #tpu.memory_space<vmem>>, vector<1x128xf32>
    %c0_7 = arith.constant 0 : index
    %c0_8 = arith.constant 0 : index
    %4 = vector.load %arg9[%c0_7, %c0_8] : memref<1x16xf32, #tpu.memory_space<vmem>>, vector<1x16xf32>
    %c0_9 = arith.constant 0 : index
    %c0_10 = arith.constant 0 : index
    %5 = vector.load %arg10[%c0_9, %c0_10] : memref<1x16xf32, #tpu.memory_space<vmem>>, vector<1x16xf32>
    %cst = arith.constant 0.000000e+00 : bf16
    %6 = vector.broadcast %cst : bf16 to vector<1x24x128xbf16>
    %cst_11 = arith.constant 0.000000e+00 : bf16
    %7 = vector.broadcast %cst_11 : bf16 to vector<18x1x128xbf16>
    %c0_12 = arith.constant 0 : index
    %c0_13 = arith.constant 0 : index
    %c0_14 = arith.constant 0 : index
    %8 = vector.load %arg12[%c0_12, %c0_13, %c0_14] : memref<18x24x128xbf16, #tpu.memory_space<vmem>>, vector<1x24x128xbf16>
    tpu.vector_store %arg12[%c0_12, %c0_13, %c0_14], %6 {strides = array<i32>} : memref<18x24x128xbf16, #tpu.memory_space<vmem>>, vector<1x24x128xbf16>,
    %c17 = arith.constant 17 : index
    %c0_15 = arith.constant 0 : index
    %c0_16 = arith.constant 0 : index
    %9 = vector.load %arg12[%c17, %c0_15, %c0_16] : memref<18x24x128xbf16, #tpu.memory_space<vmem>>, vector<1x24x128xbf16>
    tpu.vector_store %arg12[%c17, %c0_15, %c0_16], %6 {strides = array<i32>} : memref<18x24x128xbf16, #tpu.memory_space<vmem>>, vector<1x24x128xbf16>,
    %c0_17 = arith.constant 0 : index
    %c0_18 = arith.constant 0 : index
    %c0_19 = arith.constant 0 : index
    %10 = vector.load %arg12[%c0_17, %c0_18, %c0_19] : memref<18x24x128xbf16, #tpu.memory_space<vmem>>, vector<18x1x128xbf16>
    tpu.vector_store %arg12[%c0_17, %c0_18, %c0_19], %7 {strides = array<i32>} : memref<18x24x128xbf16, #tpu.memory_space<vmem>>, vector<18x1x128xbf16>,
    %c0_20 = arith.constant 0 : index
    %c17_21 = arith.constant 17 : index
    %c0_22 = arith.constant 0 : index
    %11 = vector.load %arg12[%c0_20, %c17_21, %c0_22] : memref<18x24x128xbf16, #tpu.memory_space<vmem>>, vector<18x1x128xbf16>
    tpu.vector_store %arg12[%c0_20, %c17_21, %c0_22], %7 {strides = array<i32>} : memref<18x24x128xbf16, #tpu.memory_space<vmem>>, vector<18x1x128xbf16>,
    %c0_i32 = arith.constant 0 : i32
    %c8_i32 = arith.constant 8 : i32
    %12 = arith.muli %c0_i32, %c8_i32 : i32
    %13 = tpu.assume_multiple %12, 8 : i32
    %c0_23 = arith.constant 0 : index
    %14 = arith.index_cast %13 : i32 to index
    %c0_24 = arith.constant 0 : index
    %c0_25 = arith.constant 0 : index
    %15 = vector.load %arg1[%c0_23, %14, %c0_24, %c0_25] : memref<1x16x16x16xf32, #tpu.memory_space<vmem>>, vector<1x8x16x16xf32>
    %16 = vector.shape_cast %15 : vector<1x8x16x16xf32> to vector<8x16x16xf32>
    %17 = vector.shape_cast %16 : vector<8x16x16xf32> to vector<128x16xf32>
    %18 = arith.truncf %17 : vector<128x16xf32> to vector<128x16xbf16>
    %c0_26 = arith.constant 0 : index
    %c0_27 = arith.constant 0 : index
    %19 = vector.load %arg2[%c0_26, %c0_27] : memref<16x128xbf16, #tpu.memory_space<vmem>>, vector<16x128xbf16>
    %cst_28 = arith.constant dense<0.000000e+00> : vector<128x128xf32>
    %20 = tpu.matmul %18, %19, %cst_28 {dimension_numbers = #tpu.dot_dimension_numbers<[1], [0], [0], [1], [0, 0, 1, 1], [], []>} : vector<128x16xbf16>, vector<16x128xbf16>, vector<128x128xf32> -> vector<128x128xf32>
    %21 = vector.broadcast %0 : vector<1x128xf32> to vector<128x128xf32>
    %22 = arith.mulf %20, %21 : vector<128x128xf32>
    %23 = vector.broadcast %1 : vector<1x128xf32> to vector<128x128xf32>
    %24 = arith.addf %22, %23 : vector<128x128xf32>
    %cst_29 = arith.constant 0.000000e+00 : f32
    %25 = vector.broadcast %cst_29 : f32 to vector<128x128xf32>
    %26 = arith.maximumf %24, %25 : vector<128x128xf32>
    %27 = arith.truncf %26 : vector<128x128xf32> to vector<128x128xbf16>
    %28 = vector.shape_cast %27 : vector<128x128xbf16> to vector<8x16x128xbf16>
    %c1_i32 = arith.constant 1 : i32
    %29 = arith.addi %13, %c1_i32 : i32
    %30 = arith.index_cast %29 : i32 to index
    %c1 = arith.constant 1 : index
    %c0_30 = arith.constant 0 : index
    %31 = vector.load %arg12[%30, %c1, %c0_30] : memref<18x24x128xbf16, #tpu.memory_space<vmem>>, vector<8x16x128xbf16>
    tpu.vector_store %arg12[%30, %c1, %c0_30], %28 {strides = array<i32>} : memref<18x24x128xbf16, #tpu.memory_space<vmem>>, vector<8x16x128xbf16>,
    %c1_i32_31 = arith.constant 1 : i32
    %c8_i32_32 = arith.constant 8 : i32
    %32 = arith.muli %c1_i32_31, %c8_i32_32 : i32
    %33 = tpu.assume_multiple %32, 8 : i32
    %c0_33 = arith.constant 0 : index
    %34 = arith.index_cast %33 : i32 to index
    %c0_34 = arith.constant 0 : index
    %c0_35 = arith.constant 0 : index
    %35 = vector.load %arg1[%c0_33, %34, %c0_34, %c0_35] : memref<1x16x16x16xf32, #tpu.memory_space<vmem>>, vector<1x8x16x16xf32>
    %36 = vector.shape_cast %35 : vector<1x8x16x16xf32> to vector<8x16x16xf32>
    %37 = vector.shape_cast %36 : vector<8x16x16xf32> to vector<128x16xf32>
    %38 = arith.truncf %37 : vector<128x16xf32> to vector<128x16xbf16>
    %c0_36 = arith.constant 0 : index
    %c0_37 = arith.constant 0 : index
    %39 = vector.load %arg2[%c0_36, %c0_37] : memref<16x128xbf16, #tpu.memory_space<vmem>>, vector<16x128xbf16>
    %cst_38 = arith.constant dense<0.000000e+00> : vector<128x128xf32>
    %40 = tpu.matmul %38, %39, %cst_38 {dimension_numbers = #tpu.dot_dimension_numbers<[1], [0], [0], [1], [0, 0, 1, 1], [], []>} : vector<128x16xbf16>, vector<16x128xbf16>, vector<128x128xf32> -> vector<128x128xf32>
    %41 = vector.broadcast %0 : vector<1x128xf32> to vector<128x128xf32>
    %42 = arith.mulf %40, %41 : vector<128x128xf32>
    %43 = vector.broadcast %1 : vector<1x128xf32> to vector<128x128xf32>
    %44 = arith.addf %42, %43 : vector<128x128xf32>
    %cst_39 = arith.constant 0.000000e+00 : f32
    %45 = vector.broadcast %cst_39 : f32 to vector<128x128xf32>
    %46 = arith.maximumf %44, %45 : vector<128x128xf32>
    %47 = arith.truncf %46 : vector<128x128xf32> to vector<128x128xbf16>
    %48 = vector.shape_cast %47 : vector<128x128xbf16> to vector<8x16x128xbf16>
    %c1_i32_40 = arith.constant 1 : i32
    %49 = arith.addi %33, %c1_i32_40 : i32
    %50 = arith.index_cast %49 : i32 to index
    %c1_41 = arith.constant 1 : index
    %c0_42 = arith.constant 0 : index
    %51 = vector.load %arg12[%50, %c1_41, %c0_42] : memref<18x24x128xbf16, #tpu.memory_space<vmem>>, vector<8x16x128xbf16>
    tpu.vector_store %arg12[%50, %c1_41, %c0_42], %48 {strides = array<i32>} : memref<18x24x128xbf16, #tpu.memory_space<vmem>>, vector<8x16x128xbf16>,
    %c2_i32 = arith.constant 2 : i32
    %c0_i32_43 = arith.constant 0 : i32
    %c8_i32_44 = arith.constant 8 : i32
    %52 = arith.muli %c0_i32_43, %c8_i32_44 : i32
    %53 = tpu.assume_multiple %52, 8 : i32
    %c0_i32_45 = arith.constant 0 : i32
    %54 = arith.addi %53, %c0_i32_45 : i32
    %55 = arith.index_cast %54 : i32 to index
    %c0_46 = arith.constant 0 : index
    %c0_47 = arith.constant 0 : index
    %56 = vector.load %arg12[%55, %c0_46, %c0_47] : memref<18x24x128xbf16, #tpu.memory_space<vmem>>, vector<8x16x128xbf16>
    %57 = vector.shape_cast %56 : vector<8x16x128xbf16> to vector<128x128xbf16>
    %c0_i32_48 = arith.constant 0 : i32
    %58 = arith.addi %53, %c0_i32_48 : i32
    %59 = arith.index_cast %58 : i32 to index
    %c1_49 = arith.constant 1 : index
    %c0_50 = arith.constant 0 : index
    %60 = vector.load %arg12[%59, %c1_49, %c0_50] : memref<18x24x128xbf16, #tpu.memory_space<vmem>>, vector<8x16x128xbf16>
    %61 = vector.shape_cast %60 : vector<8x16x128xbf16> to vector<128x128xbf16>
    %c0_i32_51 = arith.constant 0 : i32
    %62 = arith.addi %53, %c0_i32_51 : i32
    %63 = arith.index_cast %62 : i32 to index
    %c2 = arith.constant 2 : index
    %c0_52 = arith.constant 0 : index
    %64 = vector.load %arg12[%63, %c2, %c0_52] : memref<18x24x128xbf16, #tpu.memory_space<vmem>>, vector<8x16x128xbf16>
    %65 = vector.shape_cast %64 : vector<8x16x128xbf16> to vector<128x128xbf16>
    %c1_i32_53 = arith.constant 1 : i32
    %66 = arith.addi %53, %c1_i32_53 : i32
    %67 = arith.index_cast %66 : i32 to index
    %c0_54 = arith.constant 0 : index
    %c0_55 = arith.constant 0 : index
    %68 = vector.load %arg12[%67, %c0_54, %c0_55] : memref<18x24x128xbf16, #tpu.memory_space<vmem>>, vector<8x16x128xbf16>
    %69 = vector.shape_cast %68 : vector<8x16x128xbf16> to vector<128x128xbf16>
    %c1_i32_56 = arith.constant 1 : i32
    %70 = arith.addi %53, %c1_i32_56 : i32
    %71 = arith.index_cast %70 : i32 to index
    %c1_57 = arith.constant 1 : index
    %c0_58 = arith.constant 0 : index
    %72 = vector.load %arg12[%71, %c1_57, %c0_58] : memref<18x24x128xbf16, #tpu.memory_space<vmem>>, vector<8x16x128xbf16>
    %73 = vector.shape_cast %72 : vector<8x16x128xbf16> to vector<128x128xbf16>
    %c1_i32_59 = arith.constant 1 : i32
    %74 = arith.addi %53, %c1_i32_59 : i32
    %75 = arith.index_cast %74 : i32 to index
    %c2_60 = arith.constant 2 : index
    %c0_61 = arith.constant 0 : index
    %76 = vector.load %arg12[%75, %c2_60, %c0_61] : memref<18x24x128xbf16, #tpu.memory_space<vmem>>, vector<8x16x128xbf16>
    %77 = vector.shape_cast %76 : vector<8x16x128xbf16> to vector<128x128xbf16>
    %c2_i32_62 = arith.constant 2 : i32
    %78 = arith.addi %53, %c2_i32_62 : i32
    %79 = arith.index_cast %78 : i32 to index
    %c0_63 = arith.constant 0 : index
    %c0_64 = arith.constant 0 : index
    %80 = vector.load %arg12[%79, %c0_63, %c0_64] : memref<18x24x128xbf16, #tpu.memory_space<vmem>>, vector<8x16x128xbf16>
    %81 = vector.shape_cast %80 : vector<8x16x128xbf16> to vector<128x128xbf16>
    %c2_i32_65 = arith.constant 2 : i32
    %82 = arith.addi %53, %c2_i32_65 : i32
    %83 = arith.index_cast %82 : i32 to index
    %c1_66 = arith.constant 1 : index
    %c0_67 = arith.constant 0 : index
    %84 = vector.load %arg12[%83, %c1_66, %c0_67] : memref<18x24x128xbf16, #tpu.memory_space<vmem>>, vector<8x16x128xbf16>
    %85 = vector.shape_cast %84 : vector<8x16x128xbf16> to vector<128x128xbf16>
    %c2_i32_68 = arith.constant 2 : i32
    %86 = arith.addi %53, %c2_i32_68 : i32
    %87 = arith.index_cast %86 : i32 to index
    %c2_69 = arith.constant 2 : index
    %c0_70 = arith.constant 0 : index
    %88 = vector.load %arg12[%87, %c2_69, %c0_70] : memref<18x24x128xbf16, #tpu.memory_space<vmem>>, vector<8x16x128xbf16>
    %89 = vector.shape_cast %88 : vector<8x16x128xbf16> to vector<128x128xbf16>
    %90 = tpu.concatenate %57, %61, %65, %69, %73, %77, %81, %85, %89 in 1 : vector<128x128xbf16>, vector<128x128xbf16>, vector<128x128xbf16>, vector<128x128xbf16>, vector<128x128xbf16>, vector<128x128xbf16>, vector<128x128xbf16>, vector<128x128xbf16>, vector<128x128xbf16> -> vector<128x1152xbf16>
    %c0_71 = arith.constant 0 : index
    %c0_72 = arith.constant 0 : index
    %91 = vector.load %arg5[%c0_71, %c0_72] : memref<1152x128xbf16, #tpu.memory_space<vmem>>, vector<1152x128xbf16>
    %cst_73 = arith.constant dense<0.000000e+00> : vector<128x128xf32>
    %92 = tpu.matmul %90, %91, %cst_73 {dimension_numbers = #tpu.dot_dimension_numbers<[1], [0], [0], [1], [0, 0, 1, 1], [], []>} : vector<128x1152xbf16>, vector<1152x128xbf16>, vector<128x128xf32> -> vector<128x128xf32>
    %93 = vector.broadcast %2 : vector<1x128xf32> to vector<128x128xf32>
    %94 = arith.mulf %92, %93 : vector<128x128xf32>
    %95 = vector.broadcast %3 : vector<1x128xf32> to vector<128x128xf32>
    %96 = arith.addf %94, %95 : vector<128x128xf32>
    %cst_74 = arith.constant 0.000000e+00 : f32
    %97 = vector.broadcast %cst_74 : f32 to vector<128x128xf32>
    %98 = arith.maximumf %96, %97 : vector<128x128xf32>
    %99 = arith.truncf %98 : vector<128x128xf32> to vector<128x128xbf16>
    %c0_75 = arith.constant 0 : index
    %c0_76 = arith.constant 0 : index
    %100 = vector.load %arg8[%c0_75, %c0_76] : memref<128x16xbf16, #tpu.memory_space<vmem>>, vector<128x16xbf16>
    %cst_77 = arith.constant dense<0.000000e+00> : vector<128x16xf32>
    %101 = tpu.matmul %99, %100, %cst_77 {dimension_numbers = #tpu.dot_dimension_numbers<[1], [0], [0], [1], [0, 0, 1, 1], [], []>} : vector<128x128xbf16>, vector<128x16xbf16>, vector<128x16xf32> -> vector<128x16xf32>
    %102 = vector.broadcast %4 : vector<1x16xf32> to vector<128x16xf32>
    %103 = arith.mulf %101, %102 : vector<128x16xf32>
    %104 = vector.broadcast %5 : vector<1x16xf32> to vector<128x16xf32>
    %105 = arith.addf %103, %104 : vector<128x16xf32>
    %c0_78 = arith.constant 0 : index
    %106 = arith.index_cast %53 : i32 to index
    %c0_79 = arith.constant 0 : index
    %c0_80 = arith.constant 0 : index
    %107 = vector.load %arg1[%c0_78, %106, %c0_79, %c0_80] : memref<1x16x16x16xf32, #tpu.memory_space<vmem>>, vector<1x8x16x16xf32>
    %108 = vector.shape_cast %107 : vector<1x8x16x16xf32> to vector<8x16x16xf32>
    %109 = vector.shape_cast %108 : vector<8x16x16xf32> to vector<128x16xf32>
    %110 = arith.addf %105, %109 : vector<128x16xf32>
    %cst_81 = arith.constant 0.000000e+00 : f32
    %111 = vector.broadcast %cst_81 : f32 to vector<128x16xf32>
    %112 = arith.maximumf %110, %111 : vector<128x16xf32>
    %113 = vector.shape_cast %112 : vector<128x16xf32> to vector<8x16x16xf32>
    %c0_82 = arith.constant 0 : index
    %114 = arith.index_cast %53 : i32 to index
    %c0_83 = arith.constant 0 : index
    %c0_84 = arith.constant 0 : index
    %115 = vector.load %arg11[%c0_82, %114, %c0_83, %c0_84] : memref<1x16x16x16xf32, #tpu.memory_space<vmem>>, vector<1x8x16x16xf32>
    %116 = vector.shape_cast %115 : vector<1x8x16x16xf32> to vector<8x16x16xf32>
    %117 = vector.shape_cast %113 : vector<8x16x16xf32> to vector<1x8x16x16xf32>
    tpu.vector_store %arg11[%c0_82, %114, %c0_83, %c0_84], %117 {strides = array<i32>} : memref<1x16x16x16xf32, #tpu.memory_space<vmem>>, vector<1x8x16x16xf32>,
    %c1_i32_85 = arith.constant 1 : i32
    %c8_i32_86 = arith.constant 8 : i32
    %118 = arith.muli %c1_i32_85, %c8_i32_86 : i32
    %119 = tpu.assume_multiple %118, 8 : i32
    %c0_i32_87 = arith.constant 0 : i32
    %120 = arith.addi %119, %c0_i32_87 : i32
    %121 = arith.index_cast %120 : i32 to index
    %c0_88 = arith.constant 0 : index
    %c0_89 = arith.constant 0 : index
    %122 = vector.load %arg12[%121, %c0_88, %c0_89] : memref<18x24x128xbf16, #tpu.memory_space<vmem>>, vector<8x16x128xbf16>
    %123 = vector.shape_cast %122 : vector<8x16x128xbf16> to vector<128x128xbf16>
    %c0_i32_90 = arith.constant 0 : i32
    %124 = arith.addi %119, %c0_i32_90 : i32
    %125 = arith.index_cast %124 : i32 to index
    %c1_91 = arith.constant 1 : index
    %c0_92 = arith.constant 0 : index
    %126 = vector.load %arg12[%125, %c1_91, %c0_92] : memref<18x24x128xbf16, #tpu.memory_space<vmem>>, vector<8x16x128xbf16>
    %127 = vector.shape_cast %126 : vector<8x16x128xbf16> to vector<128x128xbf16>
    %c0_i32_93 = arith.constant 0 : i32
    %128 = arith.addi %119, %c0_i32_93 : i32
    %129 = arith.index_cast %128 : i32 to index
    %c2_94 = arith.constant 2 : index
    %c0_95 = arith.constant 0 : index
    %130 = vector.load %arg12[%129, %c2_94, %c0_95] : memref<18x24x128xbf16, #tpu.memory_space<vmem>>, vector<8x16x128xbf16>
    %131 = vector.shape_cast %130 : vector<8x16x128xbf16> to vector<128x128xbf16>
    %c1_i32_96 = arith.constant 1 : i32
    %132 = arith.addi %119, %c1_i32_96 : i32
    %133 = arith.index_cast %132 : i32 to index
    %c0_97 = arith.constant 0 : index
    %c0_98 = arith.constant 0 : index
    %134 = vector.load %arg12[%133, %c0_97, %c0_98] : memref<18x24x128xbf16, #tpu.memory_space<vmem>>, vector<8x16x128xbf16>
    %135 = vector.shape_cast %134 : vector<8x16x128xbf16> to vector<128x128xbf16>
    %c1_i32_99 = arith.constant 1 : i32
    %136 = arith.addi %119, %c1_i32_99 : i32
    %137 = arith.index_cast %136 : i32 to index
    %c1_100 = arith.constant 1 : index
    %c0_101 = arith.constant 0 : index
    %138 = vector.load %arg12[%137, %c1_100, %c0_101] : memref<18x24x128xbf16, #tpu.memory_space<vmem>>, vector<8x16x128xbf16>
    %139 = vector.shape_cast %138 : vector<8x16x128xbf16> to vector<128x128xbf16>
    %c1_i32_102 = arith.constant 1 : i32
    %140 = arith.addi %119, %c1_i32_102 : i32
    %141 = arith.index_cast %140 : i32 to index
    %c2_103 = arith.constant 2 : index
    %c0_104 = arith.constant 0 : index
    %142 = vector.load %arg12[%141, %c2_103, %c0_104] : memref<18x24x128xbf16, #tpu.memory_space<vmem>>, vector<8x16x128xbf16>
    %143 = vector.shape_cast %142 : vector<8x16x128xbf16> to vector<128x128xbf16>
    %c2_i32_105 = arith.constant 2 : i32
    %144 = arith.addi %119, %c2_i32_105 : i32
    %145 = arith.index_cast %144 : i32 to index
    %c0_106 = arith.constant 0 : index
    %c0_107 = arith.constant 0 : index
    %146 = vector.load %arg12[%145, %c0_106, %c0_107] : memref<18x24x128xbf16, #tpu.memory_space<vmem>>, vector<8x16x128xbf16>
    %147 = vector.shape_cast %146 : vector<8x16x128xbf16> to vector<128x128xbf16>
    %c2_i32_108 = arith.constant 2 : i32
    %148 = arith.addi %119, %c2_i32_108 : i32
    %149 = arith.index_cast %148 : i32 to index
    %c1_109 = arith.constant 1 : index
    %c0_110 = arith.constant 0 : index
    %150 = vector.load %arg12[%149, %c1_109, %c0_110] : memref<18x24x128xbf16, #tpu.memory_space<vmem>>, vector<8x16x128xbf16>
    %151 = vector.shape_cast %150 : vector<8x16x128xbf16> to vector<128x128xbf16>
    %c2_i32_111 = arith.constant 2 : i32
    %152 = arith.addi %119, %c2_i32_111 : i32
    %153 = arith.index_cast %152 : i32 to index
    %c2_112 = arith.constant 2 : index
    %c0_113 = arith.constant 0 : index
    %154 = vector.load %arg12[%153, %c2_112, %c0_113] : memref<18x24x128xbf16, #tpu.memory_space<vmem>>, vector<8x16x128xbf16>
    %155 = vector.shape_cast %154 : vector<8x16x128xbf16> to vector<128x128xbf16>
    %156 = tpu.concatenate %123, %127, %131, %135, %139, %143, %147, %151, %155 in 1 : vector<128x128xbf16>, vector<128x128xbf16>, vector<128x128xbf16>, vector<128x128xbf16>, vector<128x128xbf16>, vector<128x128xbf16>, vector<128x128xbf16>, vector<128x128xbf16>, vector<128x128xbf16> -> vector<128x1152xbf16>
    %c0_114 = arith.constant 0 : index
    %c0_115 = arith.constant 0 : index
    %157 = vector.load %arg5[%c0_114, %c0_115] : memref<1152x128xbf16, #tpu.memory_space<vmem>>, vector<1152x128xbf16>
    %cst_116 = arith.constant dense<0.000000e+00> : vector<128x128xf32>
    %158 = tpu.matmul %156, %157, %cst_116 {dimension_numbers = #tpu.dot_dimension_numbers<[1], [0], [0], [1], [0, 0, 1, 1], [], []>} : vector<128x1152xbf16>, vector<1152x128xbf16>, vector<128x128xf32> -> vector<128x128xf32>
    %159 = vector.broadcast %2 : vector<1x128xf32> to vector<128x128xf32>
    %160 = arith.mulf %158, %159 : vector<128x128xf32>
    %161 = vector.broadcast %3 : vector<1x128xf32> to vector<128x128xf32>
    %162 = arith.addf %160, %161 : vector<128x128xf32>
    %cst_117 = arith.constant 0.000000e+00 : f32
    %163 = vector.broadcast %cst_117 : f32 to vector<128x128xf32>
    %164 = arith.maximumf %162, %163 : vector<128x128xf32>
    %165 = arith.truncf %164 : vector<128x128xf32> to vector<128x128xbf16>
    %c0_118 = arith.constant 0 : index
    %c0_119 = arith.constant 0 : index
    %166 = vector.load %arg8[%c0_118, %c0_119] : memref<128x16xbf16, #tpu.memory_space<vmem>>, vector<128x16xbf16>
    %cst_120 = arith.constant dense<0.000000e+00> : vector<128x16xf32>
    %167 = tpu.matmul %165, %166, %cst_120 {dimension_numbers = #tpu.dot_dimension_numbers<[1], [0], [0], [1], [0, 0, 1, 1], [], []>} : vector<128x128xbf16>, vector<128x16xbf16>, vector<128x16xf32> -> vector<128x16xf32>
    %168 = vector.broadcast %4 : vector<1x16xf32> to vector<128x16xf32>
    %169 = arith.mulf %167, %168 : vector<128x16xf32>
    %170 = vector.broadcast %5 : vector<1x16xf32> to vector<128x16xf32>
    %171 = arith.addf %169, %170 : vector<128x16xf32>
    %c0_121 = arith.constant 0 : index
    %172 = arith.index_cast %119 : i32 to index
    %c0_122 = arith.constant 0 : index
    %c0_123 = arith.constant 0 : index
    %173 = vector.load %arg1[%c0_121, %172, %c0_122, %c0_123] : memref<1x16x16x16xf32, #tpu.memory_space<vmem>>, vector<1x8x16x16xf32>
    %174 = vector.shape_cast %173 : vector<1x8x16x16xf32> to vector<8x16x16xf32>
    %175 = vector.shape_cast %174 : vector<8x16x16xf32> to vector<128x16xf32>
    %176 = arith.addf %171, %175 : vector<128x16xf32>
    %cst_124 = arith.constant 0.000000e+00 : f32
    %177 = vector.broadcast %cst_124 : f32 to vector<128x16xf32>
    %178 = arith.maximumf %176, %177 : vector<128x16xf32>
    %179 = vector.shape_cast %178 : vector<128x16xf32> to vector<8x16x16xf32>
    %c0_125 = arith.constant 0 : index
    %180 = arith.index_cast %119 : i32 to index
    %c0_126 = arith.constant 0 : index
    %c0_127 = arith.constant 0 : index
    %181 = vector.load %arg11[%c0_125, %180, %c0_126, %c0_127] : memref<1x16x16x16xf32, #tpu.memory_space<vmem>>, vector<1x8x16x16xf32>
    %182 = vector.shape_cast %181 : vector<1x8x16x16xf32> to vector<8x16x16xf32>
    %183 = vector.shape_cast %179 : vector<8x16x16xf32> to vector<1x8x16x16xf32>
    tpu.vector_store %arg11[%c0_125, %180, %c0_126, %c0_127], %183 {strides = array<i32>} : memref<1x16x16x16xf32, #tpu.memory_space<vmem>>, vector<1x8x16x16xf32>,
    %c2_i32_128 = arith.constant 2 : i32
    return
  }
  func.func @transform_0(%arg0: i32) -> (i32, i32, i32, i32) {
    %c0_i32 = arith.constant 0 : i32
    %c0_i32_0 = arith.constant 0 : i32
    %c0_i32_1 = arith.constant 0 : i32
    %c0_i32_2 = arith.constant 0 : i32
    return %arg0, %c0_i32, %c0_i32_0, %c0_i32_1 : i32, i32, i32, i32
  }
  func.func @transform_1(%arg0: i32) -> (i32, i32) {
    %c0_i32 = arith.constant 0 : i32
    %c0_i32_0 = arith.constant 0 : i32
    %c0_i32_1 = arith.constant 0 : i32
    return %c0_i32, %c0_i32_0 : i32, i32
  }
  func.func @transform_2(%arg0: i32) -> (i32, i32) {
    %c0_i32 = arith.constant 0 : i32
    %c0_i32_0 = arith.constant 0 : i32
    %c0_i32_1 = arith.constant 0 : i32
    return %c0_i32, %c0_i32_0 : i32, i32
  }
  func.func @transform_3(%arg0: i32) -> (i32, i32) {
    %c0_i32 = arith.constant 0 : i32
    %c0_i32_0 = arith.constant 0 : i32
    %c0_i32_1 = arith.constant 0 : i32
    return %c0_i32, %c0_i32_0 : i32, i32
  }
  func.func @transform_4(%arg0: i32) -> (i32, i32) {
    %c0_i32 = arith.constant 0 : i32
    %c0_i32_0 = arith.constant 0 : i32
    %c0_i32_1 = arith.constant 0 : i32
    return %c0_i32, %c0_i32_0 : i32, i32
  }
  func.func @transform_5(%arg0: i32) -> (i32, i32) {
    %c0_i32 = arith.constant 0 : i32
    %c0_i32_0 = arith.constant 0 : i32
    %c0_i32_1 = arith.constant 0 : i32
    return %c0_i32, %c0_i32_0 : i32, i32
  }
  func.func @transform_6(%arg0: i32) -> (i32, i32) {
    %c0_i32 = arith.constant 0 : i32
    %c0_i32_0 = arith.constant 0 : i32
    %c0_i32_1 = arith.constant 0 : i32
    return %c0_i32, %c0_i32_0 : i32, i32
  }
  func.func @transform_7(%arg0: i32) -> (i32, i32) {
    %c0_i32 = arith.constant 0 : i32
    %c0_i32_0 = arith.constant 0 : i32
    %c0_i32_1 = arith.constant 0 : i32
    return %c0_i32, %c0_i32_0 : i32, i32
  }
  func.func @transform_8(%arg0: i32) -> (i32, i32) {
    %c0_i32 = arith.constant 0 : i32
    %c0_i32_0 = arith.constant 0 : i32
    %c0_i32_1 = arith.constant 0 : i32
    return %c0_i32, %c0_i32_0 : i32, i32
  }
  func.func @transform_9(%arg0: i32) -> (i32, i32) {
    %c0_i32 = arith.constant 0 : i32
    %c0_i32_0 = arith.constant 0 : i32
    %c0_i32_1 = arith.constant 0 : i32
    return %c0_i32, %c0_i32_0 : i32, i32
  }
  func.func @transform_10(%arg0: i32) -> (i32, i32, i32, i32) {
    %c0_i32 = arith.constant 0 : i32
    %c0_i32_0 = arith.constant 0 : i32
    %c0_i32_1 = arith.constant 0 : i32
    %c0_i32_2 = arith.constant 0 : i32
    return %arg0, %c0_i32, %c0_i32_0, %c0_i32_1 : i32, i32, i32, i32
  }
}

</mosaic_0001>

<bundles_post_ra>
// kernel: bottleneck_pallas_nhwc.1
= control target key start
LH: loop header
LB: loop body
LE: loop exit
PB: predicated region body
PF: predicated region fallthrough
CT: control target
= control target key end

     0   :  { %15 = vsyncpa [#allocation4], 0  ;;  %s10971_s0 = inlined_call_operand.hbm [shape: f32[2,16,16,16], index: 0, kind: input, shape index: {}]   ;;  %s10972_s1 = inlined_call_operand.vmem [shape: bf16[16,128], index: 1, kind: input, shape index: {}]   ;;  %s10973_s2 = inlined_call_operand.vmem [shape: f32[1,128], index: 2, kind: input, shape index: {}]   ;;  %s10974_s3 = inlined_call_operand.vmem [shape: f32[1,128], index: 3, kind: input, shape index: {}]   ;;  %s10975_s4 = inlined_call_operand.hbm [shape: bf16[1152,128], index: 4, kind: input, shape index: {}]   ;;  %s10976_s5 = inlined_call_operand.vmem [shape: f32[1,128], index: 5, kind: input, shape index: {}]   ;;  %s10977_s6 = inlined_call_operand.vmem [shape: f32[1,128], index: 6, kind: input, shape index: {}]   ;;  %s10978_s7 = inlined_call_operand.vmem [shape: bf16[128,16], index: 7, kind: input, shape index: {}]   ;;  %s10979_s8 = inlined_call_operand.vmem [shape: f32[1,16], index: 8, kind: input, shape index: {}]   ;;  %s10980_s9 = inlined_call_operand.vmem [shape: f32[1,16], index: 9, kind: input, shape index: {}]   ;;  %s10981_s10 = inlined_call_operand.hbm [shape: f32[2,16,16,16], index: 10, kind: output, shape index: {}]  }
   0x1   :  { %17 = vsyncpa [#allocation4 + $0x1], 0 }
   0x2   :  { %18 = vsyncpa [#allocation7], 0 }
   0x3   :  { %19 = vsyncpa [#allocation5], 0 }
   0x4   :  { %21 = vsyncpa [#allocation5 + $0x1], 0  ;;  %s8599_s13 = smov 0   ;;  %s8601_s14 = smov 0  }
   0x5   :  { %s8603_s15 = smov 0   ;;  %s8605_s16 = smov 0  }
   0x6 LB: > { %10992 = sst [smem:[#allocation12_spill]] %s8520_s13  ;;  %s8620_s17 = sadd.s32 4294967295, %s8532_s16   ;;  %s8532_s16 = sphi %s8605_s16, %s11065_s16   ;;  %s8528_s15 = sphi %s8603_s15, %s11068_s15   ;;  %s8524_s14 = sphi %s8601_s14, %s11067_s14   ;;  %s8520_s13 = sphi %s8599_s13, %s11066_s13  }
   0x7   : > { %s6825_s18 = sadd.s32 4294967294, %s8532_s16   ;;  %p47_p0 = scmp.ne.s32.totalorder %s8524_s14, %s8520_s13 }
   0x8   : > { %p10984_p1 = scmp.eq.s32.totalorder %s8620_s17, 0  ;;  %p266_p3 = scmp.eq.s32.totalorder %s6825_s18, 1 }
   0x9   : > { %p6826_p5 = scmp.ge.s32.totalorder %s8532_s16, 1  ;;  %p273_p7 = scmp.lt.s32.totalorder %s8532_s16, 3 }
   0xa   : > { %p8629_p4 = por %p10984_p1, %p47_p0  ;;  %p8634_p6 = por %p266_p3, %p47_p0 }
   0xb   : > { %p8639_p8 = pnand %p6826_p5, %p273_p7  ;;  %s8534_s22 = smov [#allocation6]  }
   0xc   : > { %s10993_s19 = scalar_select %p8629_p4, 1, 0 }
   0xd   : > { %s10994_s20 = scalar_select %p8634_p6, 1, 0 }
   0xe   : > { %s10996_s21 = scalar_select %p8639_p8, 1, 0 }
   0xf   : > { %10995 = sst [smem:[#allocation13_spill]] %s10994_s20  ;;  %s294_s23 = sshll.u32 %s8534_s22, 4  ;;  %s8643_s23 = int_to_ptr.vmem [resolvable:$true] %s294_s23 }
  0x10   : > { %p8097_p9 = pneg %p8639_p8  ;;  %s8655_s25 = sadd.s32 1, %s8532_s16  }
  0x11   : > { %10998 = sst [smem:[#allocation14_spill]] %s8655_s25  ;;  %s34_s26 = sadd.s32 1, %s8528_s15 }
  0x12   : > { %p8650_p11 = pnand %p8097_p9, %p10984_p1  ;;  %s31_s27 = ssub.s32 %s8532_s16, %s8655_s25 }
  0x13   : > { %s8404_s30 = scalar_lea.hbm %s10975_s4, 9216 }
  0x14   : > { %p8405_p12 = scmp.ne.s32.totalorder %s10975_s4, %s8404_s30  ;;  %p8406_p13 = pneg %p8650_p11 }
  0x15   : > { %p8411_p5 = scmp.lt.u32.totalorder %s8404_s30, %s10975_s4 }
  0x16   : > { %p8407_p0 = pnand %p8406_p13, %p8405_p12 }
  0x18   : > { %p8408_p3 = pneg %p8407_p0 }
  0x1a   : > { %p8413_p7 = pnand %p8411_p5, %p8408_p3 }
  0x1c   : > { %8416 = shalt.err (!%p8413_p7)
}
  0x1d   : > { %s8417_s25 = scalar_lea.vmem %s8643_s23, 9216  ;;  %p8425_p2 = scmp.lt.s32.totalorder %s8643_s23, %s8643_s23 }
  0x1e   : > { %p8418_p9 = scmp.ne.s32.totalorder %s8643_s23, %s8417_s25  ;;  %p8426_p6 = scmp.lt.s32.totalorder %s8417_s25, %s8417_s25 }
  0x20   : > { %p8420_p10 = pnand %p8418_p9, %p8406_p13  ;;  %p8427_p4 = por %p8426_p6, %p8425_p2 }
  0x22   : > { %p8421_p1 = pneg %p8420_p10 }
  0x24   : > { %p8428_p8 = pnand %p8427_p4, %p8421_p1 }
  0x26   : > { %8431 = shalt.err (!%p8428_p8)
}
  0x27   : > { %s8535_s28 = smov 64   ;;  %s8536_s29 = smov 4  }
  0x28   : > { %8100 = dma.hbm_to_vmem [thread:$0]  (!%p8650_p11), %s10975_s4, 9216, %s8643_s23, [#allocation7], %s8535_s28, %s8535_s28, %s8536_s29  }
  0x29   : > { %p32_p2 = scmp.eq.s32.totalorder %s31_s27, 0  ;;  %p41_p1 = scmp.ne.s32.totalorder %s8528_s15, %s8524_s14 }
  0x2a   : > { %p42_p4 = scmp.eq.s32.totalorder %s8532_s16, 0  ;;  %p8110_p6 = scmp.lt.s32.totalorder %s8532_s16, 2 }
  0x2b   : > { %s8686_s25 = scalar_select %p32_p2, %s8528_s15, %s34_s26  }
  0x2c   : > { %p43_p8 = por %p42_p4, %p41_p1  ;;  %p10999_p10 = scmp.eq.s32.totalorder %s8620_s17, 1 }
  0x2d   : > { %s323_s18 = sand.u32 1, %s8528_s15   ;;  %s7297_s22 = sshll.u32 %s8532_s16, 12 }
  0x2e   : > { %p8690_p12 = por %p10999_p10, %p41_p1  ;;  %s6829_s20 = sshll.u32 %s323_s18, 8 }
  0x2f   : > { %s8699_s30 = scalar_lea.hbm %s10971_s0, %s7297_s22  ;;  %s327_s23 = scalar_lea.vmem [#allocation3], %s6829_s20 }
  0x30   : > { %s334_s26 = sshll.u32 %s327_s23, 4  ;;  %p8701_p11 = pnand %p8110_p6, %p43_p8  ;;  %s8705_s26 = int_to_ptr.vmem [resolvable:$true] %s334_s26 }
  0x31   : > { %s8707_s28 = scalar_lea.sflag [#allocation4], %s323_s18  ;;  %s8432_s29 = scalar_lea.hbm %s8699_s30, 4096 }
  0x32   : > { %p8433_p13 = scmp.ne.s32.totalorder %s8699_s30, %s8432_s29  ;;  %p8434_p0 = pneg %p8701_p11 }
  0x33   : > { %s8437_s11 = scalar_lea.hbm %s10971_s0, 8192  ;;  %p8438_p7 = scmp.lt.u32.totalorder %s8699_s30, %s10971_s0 }
  0x34   : > { %p8435_p3 = pnand %p8434_p0, %p8433_p13  ;;  %p8439_p9 = scmp.lt.u32.totalorder %s8437_s11, %s8432_s29 }
  0x35   : > { %p8441_p1 = scmp.lt.u32.totalorder %s8432_s29, %s8699_s30 }
  0x36   : > { %p8436_p5 = pneg %p8435_p3  ;;  %p8440_p2 = por %p8439_p9, %p8438_p7 }
  0x38   : > { %p8442_p4 = por %p8441_p1, %p8440_p2 }
  0x3a   : > { %p8443_p6 = pnand %p8442_p4, %p8436_p5 }
  0x3c   : > { %8446 = shalt.err (!%p8443_p6)
}
  0x3d   : > { %s8447_s18 = scalar_lea.vmem %s8705_s26, 4096  ;;  %s8537_s23 = smov [#allocation3]  }
  0x3e   : > { %p8448_p8 = scmp.ne.s32.totalorder %s8705_s26, %s8447_s18  ;;  %s8452_s13 = sshll.u32 %s8537_s23, 4  ;;  %s8453_s13 = int_to_ptr.vmem [resolvable:$false] %s8452_s13 }
  0x3f   : > { %s8454_s20 = scalar_lea.vmem %s8453_s13, 8192  ;;  %p8455_p3 = scmp.lt.s32.totalorder %s8705_s26, %s8453_s13 }
  0x40   : > { %p8450_p10 = pnand %p8448_p8, %p8434_p0  ;;  %p8456_p7 = scmp.lt.s32.totalorder %s8454_s20, %s8447_s18 }
  0x42   : > { %p8451_p13 = pneg %p8450_p10  ;;  %p8457_p9 = por %p8456_p7, %p8455_p3 }
  0x44   : > { %p8458_p2 = pnand %p8457_p9, %p8451_p13 }
  0x46   : > { %8461 = shalt.err (!%p8458_p2)
}
  0x47   : > { %s8538_s29 = smov 128   ;;  %s8539_s11 = smov 8  }
  0x48   : > { %8104 = dma.hbm_to_vmem [thread:$0]  (!%p8701_p11), %s8699_s30, 4096, %s8705_s26, %s8707_s28, %s8538_s29, %s8538_s29, %s8539_s11  }
  0x49   : > { %p11002_p0 = scmp.ne.s32.totalorder %s10996_s21, 0 }
  0x4b   : > { %346 = sbr.rel (%p11002_p0) target bundleno = 1352 (0x548), region = 60 }
  0x52   : > { %s8738_s22 = sand.u32 1, %s8524_s14   ;;  %p11003_p5 = scmp.ne.s32.totalorder %s10993_s19, 0 }
  0x53   : > { %s6833_s24 = sshll.u32 %s8738_s22, 8  ;;  %s349_s18 = scalar_lea.sflag [#allocation4], %s8738_s22 }
  0x54   : > { %s8744_s23 = scalar_lea.vmem [#allocation3], %s6833_s24 }
  0x55   : > { %8507 = dma.done.wait (%p11003_p5), %s349_s18, 4096  }
  0x56   : > { %8509 = vsyncadd (%p11003_p5), %s349_s18, 4294963200  ;;  %p11004_p11 = scmp.eq.s32.totalorder %s8620_s17, 0 }
  0x58   : > { %8511 = dma.done.wait (%p11004_p11), [#allocation7], 9216   ;;  %p11005_p1 = pmov %p11004_p11 }
  0x59   : > { %v8153_v0 = vld [vmem:[%s10972_s1] sm:$0xff]   ;;  %v522_v1 = vld [vmem:[%s8744_s23] sm:$0xff]  ;;  %vm554_vm0 = vcmask 130048   ;;  %v524_v3 = vld [vmem:[%s8744_s23 + $0x10] sm:$0xff]  ;;  %vm407_vm1 = vcmask 1040384   ;;  %v11006_v26 = vmov 0 }
  0x5a   : > { %8513 = vsyncadd (%p11005_p1), [#allocation7], 4294958080  ;;  %v523_v2 = vld [vmem:[%s8744_s23 + $0x8] sm:$0xff]  ;;  %7925 = vmatprep.subr.bf16.mxu0 %v8153_v0  ;;  %v525_v5 = vld [vmem:[%s8744_s23 + $0x18] sm:$0xff]  ;;  %vm408_vm2 = vsmask.f32 256 }
  0x5b   : > { %v538_v4 = vpack.c.bf16 %v523_v2, %v522_v1  ;;  %v526_v6 = vld [vmem:[%s8744_s23 + $0x20] sm:$0xff]  ;;  %v527_v7 = vld [vmem:[%s8744_s23 + $0x28] sm:$0xff]  ;;  %7926 = vmatpush3.bf16.msra.mxu0 %v8153_v0  ;;  %v539_v8 = vpack.c.bf16 %v525_v5, %v524_v3  ;;  %v528_v10 = vld [vmem:[%s8744_s23 + $0x30] sm:$0xff]  ;;  %vm464_vm4 = vsmask.f32 7938  ;;  %v11009_v57 = vmov 0 }
  0x5c   : > { %v540_v9 = vpack.c.bf16 %v527_v7, %v526_v6  ;;  %v529_v11 = vld [vmem:[%s8744_s23 + $0x38] sm:$0xff]  ;;  %v530_v12 = vld [vmem:[%s8744_s23 + $0x40] sm:$0xff]  ;;  %v531_v13 = vld [vmem:[%s8744_s23 + $0x48] sm:$0xff]  ;;  %v8540_v7 = vmov 0   ;;  %vm1506_vm6 = vsmask.f32 3328 }
  0x5d   : > { %7927 = vmatprep.mubr.msk.bf16.mxu0 %vm554_vm0, %v538_v4  ;;  %v8154_v14 = vld [vmem:[%s10972_s1] sm:$0xff]   ;;  %v6863_v15 = vld [vmem:[%s8744_s23 + $0x80] sm:$0xff]  ;;  %v6865_v18 = vld [vmem:[%s8744_s23 + $0x90] sm:$0xff]  ;;  %v541_v23 = vpack.c.bf16 %v529_v11, %v528_v10  ;;  %v542_v25 = vpack.c.bf16 %v531_v13, %v530_v12  ;;  %400 = vst [vmem:[#allocation2] sm:$0xf] %v8540_v7  ;;  %vm1733_vm9 = vcmask 1042432  }
  0x5e   : > { %7928 = vmatmul.mubr.msk.bf16.vlgmr.msra.gmra.mrb[0].mxu0 %vm554_vm0, %v539_v8  ;;  %v6864_v16 = vld [vmem:[%s8744_s23 + $0x88] sm:$0xff]  ;;  %v6866_v19 = vld [vmem:[%s8744_s23 + $0x98] sm:$0xff]  ;;  %v6867_v20 = vld [vmem:[%s8744_s23 + $0xa0] sm:$0xff]  ;;  %7943 = vmatprep.subr.bf16.mxu1 %v8154_v14  ;;  %401 = vst [vmem:[#allocation2 + $0x4] sm:$0xf] %v8540_v7  ;;  %vm1734_vm10 = vcmask 1046532  }
  0x5f   : > { %7931 = vmatprep.mubr.msk.bf16.mxu0 %vm554_vm0, %v540_v9  ;;  %v1026_v17 = vpack.c.bf16 %v6864_v16, %v6863_v15  ;;  %v1027_v21 = vpack.c.bf16 %v6866_v19, %v6865_v18  ;;  %v6868_v22 = vld [vmem:[%s8744_s23 + $0xa8] sm:$0xff]  ;;  %7944 = vmatpush3.bf16.msra.mxu1 %v8154_v14  ;;  %vm8782_vm3 = vmand %vm407_vm1, %vm408_vm2  ;;  %v6869_v27 = vld [vmem:[%s8744_s23 + $0xb0] sm:$0xff]  ;;  %402 = vst [vmem:[#allocation2 + $0x8] sm:$0xf] %v8540_v7  ;;  %vm1507_vm7 = vsmask.f32 7440 }
  0x60   : > { %v1028_v24 = vpack.c.bf16 %v6868_v22, %v6867_v20  ;;  %v11007_v26 = vsel %vm8782_vm3, 4294967295, %v11006_v26  ;;  %v6870_v28 = vld [vmem:[%s8744_s23 + $0xb8] sm:$0xff]  ;;  %v8155_v29 = vld [vmem:[#allocation6 + $0x40] sm:$0xff]   ;;  %v532_v30 = vld [vmem:[%s8744_s23 + $0x50] sm:$0xff]  ;;  %404 = vst [vmem:[#allocation2 + $0xcc] sm:$0xf] %v8540_v7 }
  0x61   : > { %7945 = vmatprep.mubr.msk.bf16.mxu1 %vm554_vm0, %v1026_v17  ;;  %11008 = vst [vmem:[#allocation15_spill] sm:$0xff] %v11007_v26  ;;  %v533_v31 = vld [vmem:[%s8744_s23 + $0x58] sm:$0xff]  ;;  %v6871_v32 = vld [vmem:[%s8744_s23 + $0xc0] sm:$0xff]  ;;  %v6872_v33 = vld [vmem:[%s8744_s23 + $0xc8] sm:$0xff]  ;;  %7349 = vmatprep.subr.bf16.mxu0 %v8155_v29  ;;  %v1029_v39 = vpack.c.bf16 %v6870_v28, %v6869_v27  ;;  %vm950_vm12 = vcmask 1043456   ;;  %s10624_s30 = scalar_lea.vmem [#allocation8], %s6833_s24 }
  0x62   : > { %7946 = vmatmul.mubr.msk.bf16.vlgmr.msra.gmra.mrb[0].mxu1 %vm554_vm0, %v1027_v21  ;;  %v534_v34 = vld [vmem:[%s8744_s23 + $0x60] sm:$0xff]  ;;  %v535_v37 = vld [vmem:[%s8744_s23 + $0x68] sm:$0xff]  ;;  %v543_v41 = vpack.c.bf16 %v533_v31, %v532_v30  ;;  %v1030_v42 = vpack.c.bf16 %v6872_v33, %v6871_v32  ;;  %v6873_v45 = vld [vmem:[%s8744_s23 + $0xd0] sm:$0xff]  ;;  %405 = vst [vmem:[#allocation2 + $0xd0] sm:$0xf] %v8540_v7  ;;  %s7330_s28 = sshll.u32 %s8620_s17, 12 }
  0x63   : > { %7949 = vmatprep.mubr.msk.bf16.mxu1 %vm554_vm0, %v1028_v24  ;;  %v8156_v35 = vld [vmem:[#allocation6] sm:$0xff]   ;;  %v544_v44 = vpack.c.bf16 %v535_v37, %v534_v34  ;;  %v6874_v46 = vld [vmem:[%s8744_s23 + $0xd8] sm:$0xff]  ;;  %v536_v47 = vld [vmem:[%s8744_s23 + $0x70] sm:$0xff]  ;;  %406 = vst [vmem:[#allocation2 + $0xd4] sm:$0xf] %v8540_v7  ;;  %s6735_s13 = sshll.u32 %s10624_s30, 4  ;;  %s10919_s11 = scalar_lea.hbm %s10981_s10, %s7330_s28  ;;  %s10921_s13 = int_to_ptr.vmem [resolvable:$true] %s6735_s13 }
  0x64   : > { %v8157_v36 = vld [vmem:[#allocation6 + $0xc0] sm:$0xff]   ;;  %7350 = vmatpush3.bf16.msra.mxu0 %v8156_v35  ;;  %v537_v48 = vld [vmem:[%s8744_s23 + $0x78] sm:$0xff]  ;;  %v6876_v50 = vld [vmem:[%s8744_s23 + $0xe8] sm:$0xff]  ;;  %v1031_v51 = vpack.c.bf16 %v6874_v46, %v6873_v45  ;;  %vm785_vm13 = vsmask.f32 4368  ;;  %s6722_s17 = scalar_lea.sflag [#allocation5], %s8738_s22 }
  0x65   : > { %v8158_v38 = vld [vmem:[#allocation6 + $0x80] sm:$0xff]   ;;  %7413 = vmatprep.subr.bf16.mxu1 %v8157_v36  ;;  %v545_v52 = vpack.c.bf16 %v537_v48, %v536_v47  ;;  %v6877_v54 = vld [vmem:[%s8744_s23 + $0xf0] sm:$0xff]  ;;  %v6878_v55 = vld [vmem:[%s8744_s23 + $0xf8] sm:$0xff]  ;;  %s8541_s18 = smov [#allocation8]  }
  0x66   : > { %7932 = vmatmul.mubr.msk.bf16.gmra.mrb[4].mxu0 %vm554_vm0, %v541_v23  ;;  %v416_v40 = vld [vmem:[#allocation2 + $0x18] sm:$0x1]  ;;  %7414 = vmatpush3.bf16.msra.mxu1 %v8158_v38  ;;  %v1033_v56 = vpack.c.bf16 %v6878_v55, %v6877_v54  ;;  %vm8818_vm5 = vmand %vm407_vm1, %vm464_vm4  ;;  %v8159_v58 = vld [vmem:[#allocation6 + $0x48] sm:$0xff]   ;;  %s8466_s21 = sshll.u32 %s8541_s18, 4  ;;  %s8467_s21 = int_to_ptr.vmem [resolvable:$false] %s8466_s21 }
  0x67   : > { %7935 = vmatprep.mubr.msk.bf16.mxu0 %vm554_vm0, %v542_v25  ;;  %v417_v43 = vsel %vm8782_vm3, 0, %v416_v40  ;;  %v6875_v49 = vld [vmem:[%s8744_s23 + $0xe0] sm:$0xff]  ;;  %v11010_v57 = vsel %vm8818_vm5, 4294967295, %v11009_v57  ;;  %v8160_v59 = vld [vmem:[#allocation6 + $0x8] sm:$0xff]   ;;  %7351 = vmatprep.subr.bf16.mxu0 %v8159_v58  ;;  %v8163_v62 = vld [vmem:[#allocation6 + $0x50] sm:$0xff]   ;;  %s8468_s24 = scalar_lea.vmem %s8467_s21, 8192  ;;  %p8469_p10 = scmp.lt.s32.totalorder %s10921_s13, %s8467_s21 }
  0x68   : > { %418 = vst [vmem:[#allocation2 + $0x18] sm:$0x1] %v417_v43  ;;  %v1032_v53 = vpack.c.bf16 %v6876_v50, %v6875_v49  ;;  %11011 = vst [vmem:[#allocation16_spill] sm:$0xff] %v11010_v57  ;;  %v8161_v60 = vld [vmem:[#allocation6 + $0xc8] sm:$0xff]   ;;  %7352 = vmatpush3.bf16.msra.mxu0 %v8160_v59  ;;  %v8164_v63 = vld [vmem:[#allocation6 + $0x10] sm:$0xff]  }
  0x69   : > { %v8162_v61 = vld [vmem:[#allocation6 + $0x88] sm:$0xff]   ;;  %7415 = vmatprep.subr.bf16.mxu1 %v8161_v60  ;;  %7353 = vmatprep.subr.bf16.mxu0 %v8163_v62  ;;  %v8165_v0 = vld [vmem:[#allocation6 + $0xd0] sm:$0xff]   ;;  %v8167_v3 = vld [vmem:[#allocation6 + $0x58] sm:$0xff]  }
  0x6a   : > { %7950 = vmatmul.mubr.msk.bf16.gmra.mrb[4].mxu1 %vm554_vm0, %v1029_v39  ;;  %v8166_v1 = vld [vmem:[#allocation6 + $0x90] sm:$0xff]   ;;  %v472_v5 = vld [vmem:[#allocation2 + $0x20] sm:$0x1]  ;;  %v8168_v6 = vld [vmem:[#allocation6 + $0x18] sm:$0xff]  }
  0x6b   : > { %7953 = vmatprep.mubr.msk.bf16.mxu1 %vm554_vm0, %v1030_v42  ;;  %7416 = vmatpush3.bf16.msra.mxu1 %v8162_v61  ;;  %v413_v2 = vld [vmem:[#allocation2 + $0xc] sm:$0x1]  ;;  %v473_v8 = vsel %vm8818_vm5, 0, %v472_v5  ;;  %v469_v9 = vld [vmem:[#allocation2 + $0x14] sm:$0x1]  ;;  %v8171_v19 = vld [vmem:[#allocation6 + $0x60] sm:$0xff]  }
  0x6c   : > { %7354 = vmatpush3.bf16.msra.mxu0 %v8164_v63  ;;  %7417 = vmatprep.subr.bf16.mxu1 %v8165_v0  ;;  %v414_v4 = vsel %vm8782_vm3, 0, %v413_v2  ;;  %474 = vst [vmem:[#allocation2 + $0x20] sm:$0x1] %v473_v8  ;;  %v470_v10 = vsel %vm8818_vm5, 0, %v469_v9  ;;  %v410_v11 = vld [vmem:[#allocation2] sm:$0x1]  ;;  %vm8848_vm8 = vmor %vm1506_vm6, %vm1507_vm7 }
  0x6d   : > { %415 = vst [vmem:[#allocation2 + $0xc] sm:$0x1] %v414_v4  ;;  %7355 = vmatprep.subr.bf16.mxu0 %v8167_v3  ;;  %471 = vst [vmem:[#allocation2 + $0x14] sm:$0x1] %v470_v10  ;;  %v422_v12 = vld [vmem:[#allocation2 + $0x30] sm:$0x1] }
  0x6e   : > { %7936 = vmatmul.mubr.msk.bf16.gmra.mrb[8].mxu0 %vm554_vm0, %v543_v41  ;;  %v423_v13 = vsel %vm8782_vm3, 0, %v422_v12  ;;  %v419_v14 = vld [vmem:[#allocation2 + $0x24] sm:$0x1]  ;;  %v411_v15 = vsel %vm8782_vm3, 0, %v410_v11  ;;  %v8169_v17 = vld [vmem:[#allocation6 + $0xd8] sm:$0xff]   ;;  %v8172_v22 = vld [vmem:[#allocation6 + $0x20] sm:$0xff]  }
  0x6f   : > { %7939 = vmatprep.mubr.msk.bf16.mxu0 %vm554_vm0, %v544_v44  ;;  %7418 = vmatpush3.bf16.msra.mxu1 %v8166_v1  ;;  %424 = vst [vmem:[#allocation2 + $0x30] sm:$0x1] %v423_v13  ;;  %v420_v16 = vsel %vm8782_vm3, 0, %v419_v14  ;;  %v8170_v18 = vld [vmem:[#allocation6 + $0x98] sm:$0xff]   ;;  %412 = vst [vmem:[#allocation2] sm:$0x1] %v411_v15 }
  0x70   : > { %7356 = vmatpush3.bf16.msra.mxu0 %v8168_v6  ;;  %421 = vst [vmem:[#allocation2 + $0x24] sm:$0x1] %v420_v16  ;;  %v466_v20 = vld [vmem:[#allocation2 + $0x8] sm:$0x1]  ;;  %v478_v21 = vld [vmem:[#allocation2 + $0x38] sm:$0x1]  ;;  %7419 = vmatprep.subr.bf16.mxu1 %v8169_v17  ;;  %vm8865_vm11 = vmor %vm1733_vm9, %vm1734_vm10 }
  0x71   : > { %v467_v23 = vsel %vm8818_vm5, 0, %v466_v20  ;;  %v479_v24 = vsel %vm8818_vm5, 0, %v478_v21  ;;  %7357 = vmatprep.subr.bf16.mxu0 %v8171_v19  ;;  %v8173_v25 = vld [vmem:[#allocation6 + $0xe0] sm:$0xff]   ;;  %v8175_v28 = vld [vmem:[#allocation6 + $0x68] sm:$0xff]   ;;  %v8179_v38 = vld [vmem:[#allocation6 + $0x70] sm:$0xff]  }
  0x72   : > { %7954 = vmatmul.mubr.msk.bf16.gmra.mrb[8].mxu1 %vm554_vm0, %v1031_v51  ;;  %468 = vst [vmem:[#allocation2 + $0x8] sm:$0x1] %v467_v23  ;;  %480 = vst [vmem:[#allocation2 + $0x38] sm:$0x1] %v479_v24  ;;  %v8174_v27 = vld [vmem:[#allocation6 + $0xa0] sm:$0xff]   ;;  %v8176_v29 = vld [vmem:[#allocation6 + $0x28] sm:$0xff]  }
  0x73   : > { %7957 = vmatprep.mubr.msk.bf16.mxu1 %vm554_vm0, %v1032_v53  ;;  %7420 = vmatpush3.bf16.msra.mxu1 %v8170_v18  ;;  %v8838_v30 = vld [vmem:[#allocation2 + $0x4] sm:$0xf]  ;;  %v475_v40 = vld [vmem:[#allocation2 + $0x2c] sm:$0x1]  ;;  %v8183_v50 = vld [vmem:[#allocation6 + $0x78] sm:$0xff]  }
  0x74   : > { %7358 = vmatpush3.bf16.msra.mxu0 %v8172_v22  ;;  %7421 = vmatprep.subr.bf16.mxu1 %v8173_v25  ;;  %v8177_v31 = vld [vmem:[#allocation6 + $0xe8] sm:$0xff]   ;;  %v1519_v33 = vshll.u32 %v8838_v30, 16  ;;  %v1523_v37 = vshrl.u32 %v8838_v30, 16  ;;  %v8180_v41 = vld [vmem:[#allocation6 + $0x30] sm:$0xff]   ;;  %v476_v44 = vsel %vm8818_vm5, 0, %v475_v40  ;;  %v8184_v53 = vld [vmem:[#allocation6 + $0x38] sm:$0xff]  }
  0x75   : > { %7359 = vmatprep.subr.bf16.mxu0 %v8175_v28  ;;  %v8178_v34 = vld [vmem:[#allocation6 + $0xa8] sm:$0xff]   ;;  %v8181_v45 = vld [vmem:[#allocation6 + $0xf0] sm:$0xff]   ;;  %477 = vst [vmem:[#allocation2 + $0x2c] sm:$0x1] %v476_v44  ;;  %v1738_v60 = vrot.slane %v8838_v30, 5  ;;  %v8186_v62 = vld [vmem:[#allocation6 + $0xb8] sm:$0xff]  }
  0x76   : > { %7940 = vmatmul.mubr.msk.bf16.gmra.mrb[12].mxu0 %vm554_vm0, %v545_v52  ;;  %v8840_v32 = vld [vmem:[#allocation2] sm:$0xf]  ;;  %v1521_v39 = vrot.slane %v1519_v33, 5  ;;  %v1525_v47 = vrot.slane %v1523_v37, 4  ;;  %v8182_v49 = vld [vmem:[#allocation6 + $0xb0] sm:$0xff]   ;;  %v8189_v18 = vld [vmem:[#allocation6 + $0x140] sm:$0xff]  }
  0x77   : > { %7422 = vmatpush3.bf16.msra.mxu1 %v8174_v27  ;;  %v1510_v35 = vshrl.u32 %v8840_v32, 16  ;;  %v1513_v36 = vshll.u32 %v8840_v32, 16  ;;  %v1701_v63 = vld [vmem:[#allocation2] sm:$0xe]  ;;  %v428_v0 = vld [vmem:[#allocation2 + $0x48] sm:$0x1]  ;;  %v6928_v3 = vcombine.low %v8840_v32, %v8838_v30  ;;  %vm8912_vm14 = vmand %vm950_vm12, %vm464_vm4 }
  0x78   : > { %7360 = vmatpush3.bf16.msra.mxu0 %v8176_v29  ;;  %7423 = vmatprep.subr.bf16.mxu1 %v8177_v31  ;;  %v1526_v52 = vor.u32 %v1525_v47, %v1521_v39  ;;  %v429_v4 = vsel %vm8782_vm3, 0, %v428_v0  ;;  %v425_v5 = vld [vmem:[#allocation2 + $0x3c] sm:$0x1]  ;;  %v484_v6 = vld [vmem:[#allocation2 + $0x50] sm:$0x1]  ;;  %v6904_v11 = vrot.slane %v1701_v63, 9  ;;  %vm8921_vm15 = vmor %vm408_vm2, %vm785_vm13 }
  0x79   : > { %v1498_v42 = vld [vmem:[#allocation2 + $0x8] sm:$0x1]  ;;  %v1512_v43 = vrot.slane %v1510_v35, 4  ;;  %7361 = vmatprep.subr.bf16.mxu0 %v8179_v38  ;;  %v1515_v46 = vrot.slane %v1513_v36, 5  ;;  %430 = vst [vmem:[#allocation2 + $0x48] sm:$0x1] %v429_v4 }
  0x7a   : > { %7958 = vmatmul.mubr.msk.bf16.gmra.mrb[12].mxu1 %vm554_vm0, %v1033_v56  ;;  %v1529_v48 = vshll.u32 %v1498_v42, 16  ;;  %v8185_v56 = vld [vmem:[#allocation6 + $0xf8] sm:$0xff]   ;;  %v1527_v59 = vrot.slane %v1526_v52, 4  ;;  %v1741_v61 = vrot.slane %v1498_v42, 5  ;;  %v426_v8 = vsel %vm8782_vm3, 0, %v425_v5  ;;  %v8191_v19 = vld [vmem:[#allocation6 + $0x100] sm:$0xff]  }
  0x7b   : > { %7424 = vmatpush3.bf16.msra.mxu1 %v8178_v34  ;;  %v1516_v51 = vor.u32 %v1515_v46, %v1512_v43  ;;  %v485_v9 = vsel %vm8818_vm5, 0, %v484_v6  ;;  %v1740_v12 = vrot.slane %v1738_v60, 4  ;;  %427 = vst [vmem:[#allocation2 + $0x3c] sm:$0x1] %v426_v8  ;;  %v8871_v13 = vsel %vm8865_vm11, %v6904_v11, %v1738_v60  ;;  %v481_v16 = vld [vmem:[#allocation2 + $0x44] sm:$0x1] }
  0x7c   : > { %7362 = vmatpush3.bf16.msra.mxu0 %v8180_v41  ;;  %7425 = vmatprep.subr.bf16.mxu1 %v8181_v45  ;;  %v1531_v55 = vrot.slane %v1529_v48, 5  ;;  %486 = vst [vmem:[#allocation2 + $0x50] sm:$0x1] %v485_v9  ;;  %v482_v17 = vsel %vm8818_vm5, 0, %v481_v16  ;;  %v8192_v20 = vld [vmem:[#allocation6 + $0x148] sm:$0xff]   ;;  %v8196_v31 = vld [vmem:[#allocation6 + $0x150] sm:$0xff]  }
  0x7d   : > { %7363 = vmatprep.subr.bf16.mxu0 %v8183_v50  ;;  %v1517_v58 = vrot.slane %v1516_v51, 4  ;;  %v8875_v14 = vsel %vm8865_vm11, %v1740_v12, %v1741_v61  ;;  %483 = vst [vmem:[#allocation2 + $0x44] sm:$0x1] %v482_v17  ;;  %v434_v21 = vld [vmem:[#allocation2 + $0x60] sm:$0x1]  ;;  %v8199_v32 = vld [vmem:[#allocation6 + $0x110] sm:$0xff]  }
  0x7e   : > { %v1532_v2 = vsel %vm8848_vm8, %v1527_v59, %v1531_v55  ;;  %v6944_v15 = vcombine.low %v8871_v13, %v8875_v14  ;;  %v435_v22 = vsel %vm8782_vm3, 0, %v434_v21  ;;  %v8194_v23 = vld [vmem:[#allocation6 + $0x108] sm:$0xff]   ;;  %v431_v24 = vld [vmem:[#allocation2 + $0x54] sm:$0x1]  ;;  %v490_v27 = vld [vmem:[#allocation2 + $0x68] sm:$0x1] }
  0x7f   : > { %7426 = vmatpush3.bf16.msra.mxu1 %v8182_v49  ;;  %v1522_v1 = vsel %vm8848_vm8, %v1517_v58, %v1521_v39  ;;  %436 = vst [vmem:[#allocation2 + $0x60] sm:$0x1] %v435_v22  ;;  %v432_v25 = vsel %vm8782_vm3, 0, %v431_v24  ;;  %v491_v28 = vsel %vm8818_vm5, 0, %v490_v27  ;;  %v487_v29 = vld [vmem:[#allocation2 + $0x5c] sm:$0x1] }
  0x80   : > { %7364 = vmatpush3.bf16.msra.mxu0 %v8184_v53  ;;  %7427 = vmatprep.subr.bf16.mxu1 %v8185_v56  ;;  %v6936_v7 = vcombine.low %v1522_v1, %v1532_v2  ;;  %433 = vst [vmem:[#allocation2 + $0x54] sm:$0x1] %v432_v25  ;;  %492 = vst [vmem:[#allocation2 + $0x68] sm:$0x1] %v491_v28  ;;  %v488_v30 = vsel %vm8818_vm5, 0, %v487_v29  ;;  %v8200_v33 = vld [vmem:[#allocation6 + $0x158] sm:$0xff]  }
  0x81   : > { %7477 = vmatprep.subr.bf16.mxu0 %v8189_v18  ;;  %489 = vst [vmem:[#allocation2 + $0x5c] sm:$0x1] %v488_v30  ;;  %v8202_v34 = vld [vmem:[#allocation6 + $0x118] sm:$0xff]   ;;  %v8204_v35 = vld [vmem:[#allocation6 + $0x1c0] sm:$0xff]   ;;  %v8212_v38 = vld [vmem:[#allocation6 + $0x168] sm:$0xff]  }
  0x82   : > { %3324 = vmatprep.mubr.bf16.mxu0 %v6936_v7  ;;  %v8206_v36 = vld [vmem:[#allocation6 + $0x160] sm:$0xff]   ;;  %v8215_v39 = vld [vmem:[#allocation6 + $0x128] sm:$0xff]   ;;  %v8220_v40 = vld [vmem:[#allocation6 + $0x170] sm:$0xff]  }
  0x83   : > { %7428 = vmatpush3.bf16.msra.mxu1 %v8186_v62  ;;  %3325 = vmatmul.mubr.bf16.vlgmr.msra.gmra.mrb[16].mxu0 %v6928_v3  ;;  %v8209_v37 = vld [vmem:[#allocation6 + $0x120] sm:$0xff]   ;;  %v8224_v41 = vld [vmem:[#allocation6 + $0x130] sm:$0xff]   ;;  %v8228_v42 = vld [vmem:[#allocation6 + $0x178] sm:$0xff]  }
  0x84   : > { %7478 = vmatpush3.bf16.msra.mxu0 %v8191_v19  ;;  %7541 = vmatprep.subr.bf16.mxu1 %v8204_v35  ;;  %v8231_v43 = vld [vmem:[#allocation6 + $0x138] sm:$0xff]   ;;  %v8236_v44 = vld [vmem:[#allocation6 + $0x200] sm:$0xff]   ;;  %v8892_v45 = vld [vmem:[%s10973_s2] ss:$0 sm:$0xff] }
  0x85   : > { %7479 = vmatprep.subr.bf16.mxu0 %v8192_v20  ;;  %v8897_v46 = vld [vmem:[%s10974_s3] ss:$0 sm:$0xff]  ;;  %v959_v24 = vld [vmem:[#allocation2 + $0x18] sm:$0xf] }
  0x88   : > { %7480 = vmatpush3.bf16.msra.mxu0 %v8194_v23 }
  0x89   : > { %7481 = vmatprep.subr.bf16.mxu0 %v8196_v31 }
  0x8c   : > { %7482 = vmatpush3.bf16.msra.mxu0 %v8199_v32  ;;  %v952_v32 = vld [vmem:[#allocation2 + $0xc] sm:$0xf] }
  0x8d   : > { %7483 = vmatprep.subr.bf16.mxu0 %v8200_v33 }
  0x90   : > { %7484 = vmatpush3.bf16.msra.mxu0 %v8202_v34 }
  0x91   : > { %7485 = vmatprep.subr.bf16.mxu0 %v8206_v36 }
  0x94   : > { %7486 = vmatpush3.bf16.msra.mxu0 %v8209_v37 }
  0x95   : > { %7487 = vmatprep.subr.bf16.mxu0 %v8212_v38 }
  0x98   : > { %7488 = vmatpush3.bf16.msra.mxu0 %v8215_v39  ;;  %v963_v39 = vld [vmem:[#allocation2 + $0x20] sm:$0x1] }
  0x99   : > { %7489 = vmatprep.subr.bf16.mxu0 %v8220_v40 }
  0x9c   : > { %7490 = vmatpush3.bf16.msra.mxu0 %v8224_v41 }
  0x9d   : > { %7491 = vmatprep.subr.bf16.mxu0 %v8228_v42 }
  0xa0   : > { %7492 = vmatpush3.bf16.msra.mxu0 %v8231_v43 }
  0xa1   : > { %7961 = vmatprep.subr.bf16.mxu0 %v8236_v44 }
 0x131   : > { %v7929_v47 = vpop.f32.mrb[0].mxu0 }
 0x132   : > { %v684_v48 = vmul.f32 %v7929_v47, %v8892_v45  ;;  %v613_v49 = vpop.f32.mrb[1].mxu0  ;;  %v956_v47 = vld [vmem:[#allocation2 + $0x14] sm:$0x1] }
 0x133   : > { %v682_v50 = vmul.f32 %v8892_v45, %v613_v49  ;;  %v7930_v51 = vpop.f32.mrb[2].mxu0 }
 0x134   : > { %v706_v52 = vadd.f32 %v8897_v46, %v684_v48  ;;  %v685_v53 = vmul.f32 %v7930_v51, %v8892_v45  ;;  %v616_v55 = vpop.f32.mrb[3].mxu0 }
 0x135   : > { %v704_v56 = vadd.f32 %v8897_v46, %v682_v50  ;;  %v683_v58 = vmul.f32 %v8892_v45, %v616_v55  ;;  %v8917_v35 = vpop.f32.mrb[0].mxu1 }
 0x136   : > { %v722_v59 = vmax.f32 %v706_v52, 0.0  ;;  %v707_v60 = vadd.f32 %v8897_v46, %v685_v53 }
 0x137   : > { %v720_v61 = vmax.f32 %v704_v56, 0.0  ;;  %v705_v62 = vadd.f32 %v8897_v46, %v683_v58 }
 0x138   : > { %v7300_v63 = vpack.c.bf16 %v722_v59, %v722_v59  ;;  %v723_v0 = vmax.f32 %v707_v60, 0.0 }
 0x139   : > { %v7298_v1 = vpack.c.bf16 %v720_v61, %v720_v61  ;;  %v721_v2 = vmax.f32 %v705_v62, 0.0  ;;  %v7933_v3 = vpop.f32.mrb[4].mxu0 }
 0x13a   : > { %v805_v4 = vshrl.u32 %v7300_v63, 16  ;;  %v808_v5 = vshll.u32 %v7300_v63, 16  ;;  %v7301_v6 = vpack.c.bf16 %v723_v0, %v723_v0  ;;  %v688_v7 = vmul.f32 %v7933_v3, %v8892_v45  ;;  %v629_v8 = vpop.f32.mrb[5].mxu0 }
 0x13b   : > { %v788_v9 = vshrl.u32 %v7298_v1, 16  ;;  %v791_v11 = vshll.u32 %v7298_v1, 16  ;;  %v7299_v12 = vpack.c.bf16 %v721_v2, %v721_v2  ;;  %v686_v16 = vmul.f32 %v8892_v45, %v629_v8  ;;  %v7934_v17 = vpop.f32.mrb[6].mxu0 }
 0x13c   : > { %v807_v18 = vrot.slane %v805_v4, 7  ;;  %v813_v19 = vshrl.u32 %v7301_v6, 16  ;;  %v816_v20 = vshll.u32 %v7301_v6, 16  ;;  %v710_v21 = vadd.f32 %v8897_v46, %v688_v7  ;;  %v632_v22 = vpop.f32.mrb[7].mxu0  ;;  %v973_v7 = vld [vmem:[#allocation2 + $0x30] sm:$0xf] }
 0x13d   : > { %v790_v25 = vrot.slane %v788_v9, 7  ;;  %v796_v27 = vshrl.u32 %v7299_v12, 16  ;;  %v799_v28 = vshll.u32 %v7299_v12, 16  ;;  %v708_v29 = vadd.f32 %v8897_v46, %v686_v16 }
 0x13e   : > { %v810_v30 = vor.u32 %v808_v5, %v807_v18  ;;  %v811_v31 = vrot.slane %v807_v18, 4  ;;  %v815_v33 = vrot.slane %v813_v19, 7  ;;  %v726_v34 = vmax.f32 %v710_v21, 0.0  ;;  %v966_v19 = vld [vmem:[#allocation2 + $0x24] sm:$0xf]  ;;  %v8951_v21 = vpop.f32.mrb[1].mxu1 }
 0x13f   : > { %v793_v36 = vor.u32 %v791_v11, %v790_v25  ;;  %v794_v37 = vrot.slane %v790_v25, 4  ;;  %v798_v40 = vrot.slane %v796_v27, 7  ;;  %v724_v41 = vmax.f32 %v708_v29, 0.0 }
 0x140   : > { %v960_v42 = vsel %vm8912_vm14, %v810_v30, %v959_v24  ;;  %v818_v43 = vor.u32 %v816_v20, %v815_v33  ;;  %v820_v44 = vrot.slane %v815_v33, 4  ;;  %v7304_v48 = vpack.c.bf16 %v726_v34, %v726_v34 }
 0x141   : > { %961 = vst [vmem:[#allocation2 + $0x18] sm:$0xf] %v960_v42  ;;  %v953_v49 = vsel %vm8912_vm14, %v793_v36, %v952_v32  ;;  %v801_v50 = vor.u32 %v799_v28, %v798_v40  ;;  %v803_v51 = vrot.slane %v798_v40, 4  ;;  %v7302_v52 = vpack.c.bf16 %v724_v41, %v724_v41  ;;  %v7937_v53 = vpop.f32.mrb[8].mxu0 }
 0x142   : > { %954 = vst [vmem:[#allocation2 + $0xc] sm:$0xf] %v953_v49  ;;  %v819_v55 = vsel %vm8921_vm15, %v811_v31, %v818_v43  ;;  %v964_v56 = vsel %vm8782_vm3, %v820_v44, %v963_v39  ;;  %v839_v58 = vshrl.u32 %v7304_v48, 16  ;;  %v842_v59 = vshll.u32 %v7304_v48, 16  ;;  %v645_v60 = vpop.f32.mrb[9].mxu0 }
 0x143   : > { %962 = vst [vmem:[#allocation2 + $0x1c] sm:$0xf] %v819_v55  ;;  %965 = vst [vmem:[#allocation2 + $0x20] sm:$0x1] %v964_v56  ;;  %v802_v61 = vsel %vm8921_vm15, %v794_v37, %v801_v50  ;;  %v957_v62 = vsel %vm8782_vm3, %v803_v51, %v956_v47  ;;  %v822_v63 = vshrl.u32 %v7302_v52, 16  ;;  %v825_v0 = vshll.u32 %v7302_v52, 16 }
 0x144   : > { %v7938_v1 = vpop.f32.mrb[10].mxu0  ;;  %955 = vst [vmem:[#allocation2 + $0x10] sm:$0xf] %v802_v61  ;;  %958 = vst [vmem:[#allocation2 + $0x14] sm:$0x1] %v957_v62  ;;  %v8937_v2 = vrot.slane %v839_v58, 7  ;;  %v689_v3 = vmul.f32 %v7934_v17, %v8892_v45  ;;  %v687_v4 = vmul.f32 %v8892_v45, %v632_v22  ;;  %v692_v5 = vmul.f32 %v7937_v53, %v8892_v45 }
 0x145   : > { %v648_v6 = vpop.f32.mrb[11].mxu0  ;;  %v8942_v8 = vrot.slane %v822_v63, 7  ;;  %v690_v9 = vmul.f32 %v8892_v45, %v645_v60  ;;  %v693_v11 = vmul.f32 %v7938_v1, %v8892_v45  ;;  %v977_v53 = vld [vmem:[#allocation2 + $0x38] sm:$0x1]  ;;  %v8969_v61 = vpop.f32.mrb[2].mxu1 }
 0x146   : > { %v691_v12 = vmul.f32 %v8892_v45, %v648_v6  ;;  %v844_v16 = vor.u32 %v842_v59, %v8937_v2  ;;  %v845_v18 = vrot.slane %v8937_v2, 4  ;;  %v711_v17 = vadd.f32 %v8897_v46, %v689_v3 }
 0x147   : > { %v709_v20 = vadd.f32 %v8897_v46, %v687_v4  ;;  %v827_v22 = vor.u32 %v825_v0, %v8942_v8  ;;  %v828_v24 = vrot.slane %v8942_v8, 4  ;;  %v714_v25 = vadd.f32 %v8897_v46, %v692_v5  ;;  %v970_v0 = vld [vmem:[#allocation2 + $0x2c] sm:$0x1]  ;;  %v8973_v5 = vpop.f32.mrb[3].mxu1 }
 0x148   : > { %v712_v27 = vadd.f32 %v8897_v46, %v690_v9  ;;  %v974_v28 = vsel %vm8912_vm14, %v844_v16, %v973_v7  ;;  %v727_v29 = vmax.f32 %v711_v17, 0.0  ;;  %v715_v31 = vadd.f32 %v8897_v46, %v693_v11  ;;  %v987_v7 = vld [vmem:[#allocation2 + $0x48] sm:$0xf] }
 0x149   : > { %v725_v30 = vmax.f32 %v709_v20, 0.0  ;;  %975 = vst [vmem:[#allocation2 + $0x30] sm:$0xf] %v974_v28  ;;  %v967_v32 = vsel %vm8912_vm14, %v827_v22, %v966_v19  ;;  %v730_v33 = vmax.f32 %v714_v25, 0.0  ;;  %v713_v36 = vadd.f32 %v8897_v46, %v691_v12  ;;  %v8963_v37 = vld [vmem:[#allocation2 + $0xc] sm:$0xf] }
 0x14a   : > { %v728_v34 = vmax.f32 %v712_v27, 0.0  ;;  %968 = vst [vmem:[#allocation2 + $0x24] sm:$0xf] %v967_v32  ;;  %v7305_v39 = vpack.c.bf16 %v727_v29, %v727_v29  ;;  %v731_v41 = vmax.f32 %v715_v31, 0.0  ;;  %v1817_v42 = vshrl.u32 %v8963_v37, 16  ;;  %v8967_v60 = vpop.f32.mrb[12].mxu0 }
 0x14b   : > { %v7303_v40 = vpack.c.bf16 %v725_v30, %v725_v30  ;;  %v7308_v43 = vpack.c.bf16 %v730_v33, %v730_v33  ;;  %v729_v47 = vmax.f32 %v713_v36, 0.0  ;;  %v1820_v48 = vshll.u32 %v8963_v37, 16  ;;  %v8971_v4 = vpop.f32.mrb[13].mxu0  ;;  %v980_v20 = vld [vmem:[#allocation2 + $0x3c] sm:$0xf] }
 0x14c   : > { %v7306_v44 = vpack.c.bf16 %v728_v34, %v728_v34  ;;  %v847_v49 = vshrl.u32 %v7305_v39, 16  ;;  %v850_v50 = vshll.u32 %v7305_v39, 16  ;;  %v7309_v1 = vpack.c.bf16 %v731_v41, %v731_v41  ;;  %v8979_v22 = vpop.f32.mrb[14].mxu0  ;;  %v8985_v30 = vld [vmem:[#allocation2 + $0x10] sm:$0xf] }
 0x14d   : > { %v830_v51 = vshrl.u32 %v7303_v40, 16  ;;  %v833_v52 = vshll.u32 %v7303_v40, 16  ;;  %v873_v55 = vshrl.u32 %v7308_v43, 16  ;;  %v876_v56 = vshll.u32 %v7308_v43, 16  ;;  %v8987_v31 = vpop.f32.mrb[15].mxu0 }
 0x14e   : > { %v856_v58 = vshrl.u32 %v7306_v44, 16  ;;  %v859_v59 = vshll.u32 %v7306_v44, 16  ;;  %v849_v62 = vrot.slane %v847_v49, 7  ;;  %v7307_v3 = vpack.c.bf16 %v729_v47, %v729_v47  ;;  %v1794_v39 = vld [vmem:[#allocation2 + $0x18] sm:$0xf] }
 0x14f   : > { %v832_v63 = vrot.slane %v830_v51, 7  ;;  %v8975_v6 = vrot.slane %v873_v55, 7  ;;  %v1819_v9 = vrot.slane %v1817_v42, 4  ;;  %v1822_v11 = vrot.slane %v1820_v48, 5  ;;  %v991_v42 = vld [vmem:[#allocation2 + $0x50] sm:$0x1] }
 0x150   : > { %v8977_v8 = vrot.slane %v856_v58, 7  ;;  %v852_v12 = vor.u32 %v850_v50, %v849_v62  ;;  %v854_v16 = vrot.slane %v849_v62, 4  ;;  %v881_v40 = vshrl.u32 %v7309_v1, 16  ;;  %v8205_v48 = vld [vmem:[#allocation6 + $0x180] sm:$0xff]   ;;  %v984_v50 = vld [vmem:[#allocation2 + $0x44] sm:$0x1] }
 0x151   : > { %v835_v19 = vor.u32 %v833_v52, %v832_v63  ;;  %v837_v17 = vrot.slane %v832_v63, 4  ;;  %v878_v25 = vor.u32 %v876_v56, %v8975_v6  ;;  %v879_v27 = vrot.slane %v8975_v6, 4  ;;  %v8210_v56 = vld [vmem:[#allocation6 + $0x1c8] sm:$0xff]  }
 0x152   : > { %v861_v28 = vor.u32 %v859_v59, %v8977_v8  ;;  %v862_v29 = vrot.slane %v8977_v8, 4  ;;  %v853_v32 = vsel %vm8921_vm15, %v845_v18, %v852_v12  ;;  %v978_v33 = vsel %vm8782_vm3, %v854_v16, %v977_v53  ;;  %v9007_v53 = vld [vmem:[#allocation2 + $0x1c] sm:$0xf]  ;;  %v9017_v8 = vld [vmem:[#allocation2 + $0x10] sm:$0xf] }
 0x153   : > { %v836_v34 = vsel %vm8921_vm15, %v828_v24, %v835_v19  ;;  %v971_v36 = vsel %vm8782_vm3, %v837_v17, %v970_v0  ;;  %976 = vst [vmem:[#allocation2 + $0x34] sm:$0xf] %v853_v32  ;;  %979 = vst [vmem:[#allocation2 + $0x38] sm:$0x1] %v978_v33  ;;  %v988_v2 = vsel %vm8912_vm14, %v878_v25, %v987_v7  ;;  %v884_v41 = vshll.u32 %v7309_v1, 16  ;;  %v8211_v32 = vld [vmem:[#allocation6 + $0x188] sm:$0xff]  }
 0x154   : > { %969 = vst [vmem:[#allocation2 + $0x28] sm:$0xf] %v836_v34  ;;  %972 = vst [vmem:[#allocation2 + $0x2c] sm:$0x1] %v971_v36  ;;  %v981_v18 = vsel %vm8912_vm14, %v861_v28, %v980_v20  ;;  %v864_v24 = vshrl.u32 %v7307_v3, 16  ;;  %v867_v43 = vshll.u32 %v7307_v3, 16  ;;  %v1823_v44 = vor.u32 %v1822_v11, %v1819_v9 }
 0x155   : > { %989 = vst [vmem:[#allocation2 + $0x48] sm:$0xf] %v988_v2  ;;  %982 = vst [vmem:[#allocation2 + $0x3c] sm:$0xf] %v981_v18  ;;  %v1826_v47 = vshll.u32 %v8985_v30, 16  ;;  %v883_v49 = vrot.slane %v881_v40, 7  ;;  %v6952_v52 = vcombine.low %v8963_v37, %v8985_v30  ;;  %v6953_v25 = vcombine.low %v1794_v39, %v9007_v53 }
 0x156   : > { %v1830_v51 = vshrl.u32 %v8985_v30, 16  ;;  %v1841_v55 = vshrl.u32 %v1794_v39, 16  ;;  %v866_v58 = vrot.slane %v864_v24, 7  ;;  %v9009_v59 = vrot.slane %v1823_v44, 4  ;;  %v9013_v0 = vld [vmem:[#allocation2 + $0xc] sm:$0xf] }
 0x157   : > { %v9011_v62 = vrot.slane %v1826_v47, 5  ;;  %v1844_v63 = vshll.u32 %v1794_v39, 16  ;;  %v886_v1 = vor.u32 %v884_v41, %v883_v49  ;;  %v888_v3 = vrot.slane %v883_v49, 4  ;;  %3421 = vmatprep.mubr.bf16.mxu1 %v6952_v52  ;;  %v1499_v16 = vld [vmem:[#allocation2 + $0x14] sm:$0x1]  ;;  %v8213_v33 = vld [vmem:[#allocation6 + $0x1d0] sm:$0xff]  }
 0x158   : > { %v1832_v6 = vrot.slane %v1830_v51, 4  ;;  %v9015_v7 = vrot.slane %v1841_v55, 4  ;;  %v869_v37 = vor.u32 %v867_v43, %v866_v58  ;;  %v871_v9 = vrot.slane %v866_v58, 4  ;;  %3422 = vmatmul.mubr.bf16.vlgmr.msra.gmra.mrb[16].mxu1 %v6944_v15  ;;  %v1702_v28 = vld [vmem:[#allocation2 + $0xc] sm:$0xe]  ;;  %v8218_v55 = vld [vmem:[#allocation6 + $0x1d8] sm:$0xff]  }
 0x159   : > { %v9022_v11 = vrot.slane %v1844_v63, 5  ;;  %v887_v19 = vsel %vm8921_vm15, %v879_v27, %v886_v1  ;;  %v992_v17 = vsel %vm8782_vm3, %v888_v3, %v991_v42  ;;  %7542 = vmatpush3.bf16.msra.mxu1 %v8205_v48  ;;  %v1534_v15 = vshrl.u32 %v9013_v0, 16  ;;  %3429 = vmatprep.mubr.bf16.mxu1 %v6953_v25  ;;  %v9042_v42 = vld [vmem:[#allocation2 + $0x18] sm:$0xf]  ;;  %v8216_v48 = vld [vmem:[#allocation6 + $0x190] sm:$0xff]  }
 0x15a   : > { %v1833_v20 = vor.u32 %v1832_v6, %v9011_v62  ;;  %990 = vst [vmem:[#allocation2 + $0x4c] sm:$0xf] %v887_v19  ;;  %993 = vst [vmem:[#allocation2 + $0x50] sm:$0x1] %v992_v17  ;;  %v870_v13 = vsel %vm8921_vm15, %v862_v29, %v869_v37  ;;  %v985_v14 = vsel %vm8782_vm3, %v871_v9, %v984_v50  ;;  %v1537_v27 = vshll.u32 %v9013_v0, 16 }
 0x15b   : > { %7543 = vmatprep.subr.bf16.mxu1 %v8210_v56  ;;  %983 = vst [vmem:[#allocation2 + $0x40] sm:$0xf] %v870_v13  ;;  %986 = vst [vmem:[#allocation2 + $0x44] sm:$0x1] %v985_v14  ;;  %v1543_v36 = vshll.u32 %v9017_v8, 16  ;;  %v1547_v39 = vshrl.u32 %v9017_v8, 16  ;;  %v696_v52 = vmul.f32 %v8967_v60, %v8892_v45  ;;  %v6929_v58 = vcombine.low %v9013_v0, %v9017_v8 }
 0x15c   : > { %v9037_v34 = vrot.slane %v1833_v20, 4  ;;  %v1553_v2 = vshll.u32 %v1499_v16, 16  ;;  %v1536_v29 = vrot.slane %v1534_v15, 4  ;;  %v1539_v18 = vrot.slane %v1537_v27, 5  ;;  %v9052_v1 = vld [vmem:[#allocation2 + $0x1c] sm:$0xf] }
 0x15d   : > { %v6905_v40 = vrot.slane %v1702_v28, 9  ;;  %v1745_v41 = vrot.slane %v9017_v8, 5  ;;  %v1545_v24 = vrot.slane %v1543_v36, 5  ;;  %v1549_v43 = vrot.slane %v1547_v39, 4  ;;  %7544 = vmatpush3.bf16.msra.mxu1 %v8211_v32  ;;  %v9058_v60 = vld [vmem:[#allocation2 + $0x20] sm:$0x1] }
 0x15e   : > { %v1555_v44 = vrot.slane %v1553_v2, 5  ;;  %v1748_v47 = vrot.slane %v1499_v16, 5  ;;  %v1540_v49 = vor.u32 %v1539_v18, %v1536_v29  ;;  %7545 = vmatprep.subr.bf16.mxu1 %v8213_v33  ;;  %v694_v63 = vmul.f32 %v8892_v45, %v8971_v4  ;;  %v8219_v4 = vld [vmem:[#allocation6 + $0x198] sm:$0xff]   ;;  %v1796_v13 = vld [vmem:[#allocation2 + $0x24] sm:$0xf]  ;;  %v8221_v14 = vld [vmem:[#allocation6 + $0x1e0] sm:$0xff]  }
 0x15f   : > { %v1746_v50 = vsel %vm8865_vm11, %v6905_v40, %v1745_v41  ;;  %v1747_v51 = vrot.slane %v1745_v41, 4  ;;  %v1550_v56 = vor.u32 %v1549_v43, %v1545_v24  ;;  %v1558_v3 = vshrl.u32 %v9042_v42, 16  ;;  %v9069_v43 = vld [vmem:[#allocation2 + $0x28] sm:$0xf] }
 0x160   : > { %v1541_v6 = vrot.slane %v1540_v49, 4  ;;  %v718_v9 = vadd.f32 %v8897_v46, %v696_v52  ;;  %v1561_v16 = vshll.u32 %v9042_v42, 16  ;;  %v716_v0 = vadd.f32 %v8897_v46, %v694_v63  ;;  %v8226_v52 = vld [vmem:[#allocation6 + $0x1e8] sm:$0xff]  }
 0x161   : > { %v1749_v37 = vsel %vm8865_vm11, %v1747_v51, %v1748_v47  ;;  %v1551_v19 = vrot.slane %v1550_v56, 4  ;;  %v1560_v8 = vrot.slane %v1558_v3, 4  ;;  %7546 = vmatpush3.bf16.msra.mxu1 %v8216_v48  ;;  %v1567_v32 = vshll.u32 %v9052_v1, 16  ;;  %v8225_v48 = vld [vmem:[#allocation6 + $0x1a0] sm:$0xff]  }
 0x162   : > { %v6945_v17 = vcombine.low %v1746_v50, %v1749_v37  ;;  %v1546_v20 = vsel %vm8848_vm8, %v1541_v6, %v1545_v24  ;;  %v734_v25 = vmax.f32 %v718_v9, 0.0  ;;  %v1563_v28 = vrot.slane %v1561_v16, 5  ;;  %7547 = vmatprep.subr.bf16.mxu1 %v8218_v55  ;;  %v1703_v6 = vld [vmem:[#allocation2 + $0x18] sm:$0xe] }
 0x163   : > { %v1556_v15 = vsel %vm8848_vm8, %v1551_v19, %v1555_v44  ;;  %v732_v27 = vmax.f32 %v716_v0, 0.0  ;;  %v1571_v33 = vshrl.u32 %v9052_v1, 16  ;;  %v1577_v36 = vshll.u32 %v9058_v60, 16 }
 0x164   : > { %3430 = vmatmul.mubr.bf16.gmra.mrb[20].mxu1 %v6945_v17  ;;  %v6937_v39 = vcombine.low %v1546_v20, %v1556_v15  ;;  %v7312_v2 = vpack.c.bf16 %v734_v25, %v734_v25  ;;  %v1564_v29 = vor.u32 %v1563_v28, %v1560_v8  ;;  %v1569_v18 = vrot.slane %v1567_v32, 5  ;;  %v1001_v17 = vld [vmem:[#allocation2 + $0x60] sm:$0xf]  ;;  %v994_v32 = vld [vmem:[#allocation2 + $0x54] sm:$0xf] }
 0x165   : > { %v7310_v40 = vpack.c.bf16 %v732_v27, %v732_v27  ;;  %v1573_v41 = vrot.slane %v1571_v33, 4  ;;  %v1579_v24 = vrot.slane %v1577_v36, 5  ;;  %v1865_v47 = vshrl.u32 %v1796_v13, 16  ;;  %7548 = vmatpush3.bf16.msra.mxu1 %v8219_v4  ;;  %v8227_v20 = vld [vmem:[#allocation6 + $0x1a8] sm:$0xff]   ;;  %v8229_v27 = vld [vmem:[#allocation6 + $0x1f0] sm:$0xff]  }
 0x166   : > { %3332 = vmatprep.mubr.bf16.mxu0 %v6937_v39  ;;  %v907_v44 = vshrl.u32 %v7312_v2, 16  ;;  %v910_v49 = vshll.u32 %v7312_v2, 16  ;;  %v1565_v50 = vrot.slane %v1564_v29, 4  ;;  %v1868_v51 = vshll.u32 %v1796_v13, 16  ;;  %7549 = vmatprep.subr.bf16.mxu1 %v8221_v14  ;;  %v1798_v39 = vld [vmem:[#allocation2 + $0x30] sm:$0xf] }
 0x167   : > { %3333 = vmatmul.mubr.bf16.gmra.mrb[20].mxu0 %v6929_v58  ;;  %v890_v55 = vshrl.u32 %v7310_v40, 16  ;;  %v893_v56 = vshll.u32 %v7310_v40, 16  ;;  %v1574_v63 = vor.u32 %v1573_v41, %v1569_v18  ;;  %v9071_v3 = vrot.slane %v1865_v47, 4 }
 0x168   : > { %v9073_v37 = vrot.slane %v907_v44, 7  ;;  %v1570_v9 = vsel %vm8848_vm8, %v1565_v50, %v1569_v18  ;;  %v9077_v16 = vrot.slane %v1868_v51, 5  ;;  %v6954_v58 = vcombine.low %v1796_v13, %v9069_v43  ;;  %v9098_v18 = vld [vmem:[#allocation2 + $0x34] sm:$0xf]  ;;  %v8232_v44 = vld [vmem:[#allocation6 + $0x1b0] sm:$0xff]  }
 0x169   : > { %v9080_v0 = vrot.slane %v890_v55, 7  ;;  %v1575_v8 = vrot.slane %v1574_v63, 4  ;;  %v697_v4 = vmul.f32 %v8979_v22, %v8892_v45  ;;  %7550 = vmatpush3.bf16.msra.mxu1 %v8225_v48  ;;  %v695_v14 = vmul.f32 %v8892_v45, %v8987_v31  ;;  %v9105_v48 = vld [vmem:[#allocation2 + $0x24] sm:$0xf] }
 0x16a   : > { %v912_v25 = vor.u32 %v910_v49, %v9073_v37  ;;  %v913_v28 = vrot.slane %v9073_v37, 4  ;;  %v6906_v15 = vrot.slane %v1703_v6, 9  ;;  %7551 = vmatprep.subr.bf16.mxu1 %v8226_v52  ;;  %3437 = vmatprep.mubr.bf16.mxu1 %v6954_v58  ;;  %v1752_v31 = vrot.slane %v9052_v1, 5  ;;  %v8233_v52 = vld [vmem:[#allocation6 + $0x1f8] sm:$0xff]  }
 0x16b   : > { %v895_v33 = vor.u32 %v893_v56, %v9080_v0  ;;  %v896_v13 = vrot.slane %v9080_v0, 4  ;;  %v1580_v22 = vsel %vm8848_vm8, %v1575_v8, %v1579_v24  ;;  %v719_v36 = vadd.f32 %v8897_v46, %v697_v4 }
 0x16c   : > { %v1002_v2 = vsel %vm8912_vm14, %v912_v25, %v1001_v17  ;;  %v6938_v29 = vcombine.low %v1570_v9, %v1580_v22  ;;  %v717_v45 = vadd.f32 %v8897_v46, %v695_v14  ;;  %v1755_v24 = vrot.slane %v9058_v60, 5  ;;  %v9115_v9 = vld [vmem:[#allocation2 + $0x28] sm:$0xf]  ;;  %v1501_v17 = vld [vmem:[#allocation2 + $0x2c] sm:$0x1]  ;;  %v8234_v14 = vld [vmem:[#allocation6 + $0x1b8] sm:$0xff]  }
 0x16d   : > { %1003 = vst [vmem:[#allocation2 + $0x60] sm:$0xf] %v1002_v2  ;;  %v995_v40 = vsel %vm8912_vm14, %v895_v33, %v994_v32  ;;  %v735_v41 = vmax.f32 %v719_v36, 0.0  ;;  %v6930_v47 = vcombine.low %v9042_v42, %v9052_v1  ;;  %7552 = vmatpush3.bf16.msra.mxu1 %v8227_v20  ;;  %v1753_v49 = vsel %vm8865_vm11, %v6906_v15, %v1752_v31  ;;  %v1704_v32 = vld [vmem:[#allocation2 + $0x24] sm:$0xe] }
 0x16e   : > { %996 = vst [vmem:[#allocation2 + $0x54] sm:$0xf] %v995_v40  ;;  %3340 = vmatprep.mubr.bf16.mxu0 %v6938_v29  ;;  %v733_v46 = vmax.f32 %v717_v45, 0.0  ;;  %v1754_v50 = vrot.slane %v1752_v31, 4  ;;  %v1889_v51 = vshrl.u32 %v1798_v39, 16  ;;  %7553 = vmatprep.subr.bf16.mxu1 %v8229_v27  ;;  %v1892_v60 = vshll.u32 %v1798_v39, 16 }
 0x16f   : > { %v7313_v55 = vpack.c.bf16 %v735_v41, %v735_v41  ;;  %3341 = vmatmul.mubr.bf16.gmra.mrb[24].mxu0 %v6930_v47  ;;  %v6955_v42 = vcombine.low %v1798_v39, %v9098_v18  ;;  %v1582_v8 = vshrl.u32 %v9105_v48, 16  ;;  %v1585_v22 = vshll.u32 %v9105_v48, 16  ;;  %v1005_v45 = vld [vmem:[#allocation2 + $0x68] sm:$0x1] }
 0x170   : > { %v7311_v1 = vpack.c.bf16 %v733_v46, %v733_v46  ;;  %v1756_v63 = vsel %vm8865_vm11, %v1754_v50, %v1755_v24  ;;  %v9113_v6 = vrot.slane %v1889_v51, 4  ;;  %v9118_v25 = vrot.slane %v1892_v60, 5  ;;  %v998_v46 = vld [vmem:[#allocation2 + $0x5c] sm:$0x1] }
 0x171   : > { %v915_v58 = vshrl.u32 %v7313_v55, 16  ;;  %v918_v4 = vshll.u32 %v7313_v55, 16  ;;  %v6946_v20 = vcombine.low %v1753_v49, %v1756_v63  ;;  %7554 = vmatpush3.bf16.msra.mxu1 %v8232_v44  ;;  %v1584_v33 = vrot.slane %v1582_v8, 4 }
 0x172   : > { %v898_v15 = vshrl.u32 %v7311_v1, 16  ;;  %v901_v27 = vshll.u32 %v7311_v1, 16  ;;  %7555 = vmatprep.subr.bf16.mxu1 %v8233_v52  ;;  %v1591_v39 = vshll.u32 %v9115_v9, 16  ;;  %v1595_v2 = vshrl.u32 %v9115_v9, 16  ;;  %v9124_v1 = vld [vmem:[#allocation2 + $0x30] sm:$0xf] }
 0x173   : > { %v917_v36 = vrot.slane %v915_v58, 7  ;;  %3438 = vmatmul.mubr.bf16.gmra.mrb[24].mxu1 %v6946_v20  ;;  %v1601_v29 = vshll.u32 %v1501_v17, 16  ;;  %v1587_v40 = vrot.slane %v1585_v22, 5  ;;  %v6907_v41 = vrot.slane %v1704_v32, 9 }
 0x174   : > { %v900_v31 = vrot.slane %v898_v15, 7  ;;  %3445 = vmatprep.mubr.bf16.mxu1 %v6955_v42  ;;  %v1759_v24 = vrot.slane %v9115_v9, 5  ;;  %v1593_v49 = vrot.slane %v1591_v39, 5  ;;  %v1597_v50 = vrot.slane %v1595_v2, 4  ;;  %v1800_v2 = vld [vmem:[#allocation2 + $0x3c] sm:$0xf] }
 0x175   : > { %v920_v47 = vor.u32 %v918_v4, %v917_v36  ;;  %v922_v44 = vrot.slane %v917_v36, 4  ;;  %7556 = vmatpush3.bf16.msra.mxu1 %v8234_v14  ;;  %v1588_v55 = vor.u32 %v1587_v40, %v1584_v33  ;;  %v1603_v60 = vrot.slane %v1601_v29, 5  ;;  %v9134_v4 = vld [vmem:[#allocation2 + $0x34] sm:$0xf]  ;;  %v1502_v14 = vld [vmem:[#allocation2 + $0x38] sm:$0x1] }
 0x176   : > { %v903_v51 = vor.u32 %v901_v27, %v900_v31  ;;  %v905_v52 = vrot.slane %v900_v31, 4  ;;  %v1598_v8 = vor.u32 %v1597_v50, %v1593_v49  ;;  %v1760_v58 = vsel %vm8865_vm11, %v6907_v41, %v1759_v24  ;;  %v1705_v31 = vld [vmem:[#allocation2 + $0x30] sm:$0xe] }
 0x177   : > { %v921_v42 = vsel %vm8921_vm15, %v913_v28, %v920_v47  ;;  %v1006_v63 = vsel %vm8782_vm3, %v922_v44, %v1005_v45  ;;  %v1589_v28 = vrot.slane %v1588_v55, 4  ;;  %v1761_v32 = vrot.slane %v1759_v24, 4 }
 0x178   : > { %1004 = vst [vmem:[#allocation2 + $0x64] sm:$0xf] %v921_v42  ;;  %1007 = vst [vmem:[#allocation2 + $0x68] sm:$0x1] %v1006_v63  ;;  %v904_v20 = vsel %vm8921_vm15, %v896_v13, %v903_v51  ;;  %v999_v37 = vsel %vm8782_vm3, %v905_v52, %v998_v46  ;;  %v1599_v15 = vrot.slane %v1598_v8, 4  ;;  %v1762_v27 = vrot.slane %v1501_v17, 5 }
 0x179   : > { %997 = vst [vmem:[#allocation2 + $0x58] sm:$0xf] %v904_v20  ;;  %1000 = vst [vmem:[#allocation2 + $0x5c] sm:$0x1] %v999_v37  ;;  %v6931_v33 = vcombine.low %v9105_v48, %v9115_v9  ;;  %v1606_v22 = vshrl.u32 %v9124_v1, 16  ;;  %v1594_v0 = vsel %vm8848_vm8, %v1589_v28, %v1593_v49  ;;  %v1609_v13 = vshll.u32 %v9124_v1, 16 }
 0x17a   : > { %v1615_v36 = vshll.u32 %v9134_v4, 16  ;;  %v1619_v39 = vshrl.u32 %v9134_v4, 16  ;;  %v1604_v29 = vsel %vm8848_vm8, %v1599_v15, %v1603_v60  ;;  %v1763_v17 = vsel %vm8865_vm11, %v1761_v32, %v1762_v27  ;;  %v9154_v9 = vld [vmem:[#allocation2 + $0x40] sm:$0xf]  ;;  %v1802_v51 = vld [vmem:[#allocation2 + $0x48] sm:$0xf] }
 0x17b   : > { %v1608_v45 = vrot.slane %v1606_v22, 4  ;;  %v1625_v48 = vshll.u32 %v1502_v14, 16  ;;  %v6939_v40 = vcombine.low %v1594_v0, %v1604_v29  ;;  %v6947_v41 = vcombine.low %v1760_v58, %v1763_v17  ;;  %v9163_v37 = vld [vmem:[#allocation2 + $0x4c] sm:$0xf]  ;;  %v9167_v22 = vld [vmem:[#allocation2 + $0x3c] sm:$0xf] }
 0x17c   : > { %v1611_v24 = vrot.slane %v1609_v13, 5  ;;  %v1617_v47 = vrot.slane %v1615_v36, 5  ;;  %v1621_v44 = vrot.slane %v1619_v39, 4  ;;  %v1913_v49 = vshrl.u32 %v1800_v2, 16  ;;  %v9171_v39 = vld [vmem:[#allocation2 + $0x40] sm:$0xf] }
 0x17d   : > { %v1627_v46 = vrot.slane %v1625_v48, 5  ;;  %v1916_v50 = vshll.u32 %v1800_v2, 16  ;;  %3348 = vmatprep.mubr.bf16.mxu0 %v6939_v40  ;;  %3446 = vmatmul.mubr.bf16.gmra.mrb[28].mxu1 %v6947_v41  ;;  %v6956_v60 = vcombine.low %v1800_v2, %v9154_v9  ;;  %v6908_v42 = vrot.slane %v1705_v31, 9  ;;  %v1706_v17 = vld [vmem:[#allocation2 + $0x3c] sm:$0xe] }
 0x17e   : > { %v1612_v52 = vor.u32 %v1611_v24, %v1608_v45  ;;  %3349 = vmatmul.mubr.bf16.gmra.mrb[28].mxu0 %v6931_v33  ;;  %v1622_v63 = vor.u32 %v1621_v44, %v1617_v47  ;;  %v9158_v8 = vrot.slane %v1913_v49, 4  ;;  %v1766_v20 = vrot.slane %v9134_v4, 5  ;;  %v9188_v49 = vld [vmem:[#allocation2 + $0x48] sm:$0xf] }
 0x17f   : > { %v9160_v58 = vrot.slane %v1916_v50, 5  ;;  %3453 = vmatprep.mubr.bf16.mxu1 %v6956_v60  ;;  %v1769_v32 = vrot.slane %v1502_v14, 5  ;;  %v6932_v15 = vcombine.low %v9124_v1, %v9134_v4  ;;  %v1937_v27 = vshrl.u32 %v1802_v51, 16  ;;  %v1503_v4 = vld [vmem:[#allocation2 + $0x44] sm:$0x1] }
 0x180   : > { %v1613_v28 = vrot.slane %v1612_v52, 4  ;;  %v1623_v0 = vrot.slane %v1622_v63, 4  ;;  %v1767_v33 = vsel %vm8865_vm11, %v6908_v42, %v1766_v20  ;;  %v1768_v13 = vrot.slane %v1766_v20, 4 }
 0x181   : > { %v1940_v36 = vshll.u32 %v1802_v51, 16  ;;  %v9175_v29 = vrot.slane %v1937_v27, 4  ;;  %v6957_v1 = vcombine.low %v1802_v51, %v9163_v37  ;;  %v1630_v40 = vshrl.u32 %v9167_v22, 16 }
 0x182   : > { %v1618_v2 = vsel %vm8848_vm8, %v1613_v28, %v1617_v47  ;;  %v1628_v45 = vsel %vm8848_vm8, %v1623_v0, %v1627_v46  ;;  %v1770_v48 = vsel %vm8865_vm11, %v1768_v13, %v1769_v32  ;;  %v1633_v47 = vshll.u32 %v9167_v22, 16  ;;  %v9192_v28 = vld [vmem:[#allocation2 + $0x4c] sm:$0xf] }
 0x183   : > { %v9183_v31 = vrot.slane %v1940_v36, 5  ;;  %v6940_v41 = vcombine.low %v1618_v2, %v1628_v45  ;;  %v6948_v24 = vcombine.low %v1767_v33, %v1770_v48  ;;  %v1639_v44 = vshll.u32 %v9171_v39, 16  ;;  %v9196_v33 = vld [vmem:[#allocation2 + $0x50] sm:$0x1] }
 0x184   : > { %v1632_v50 = vrot.slane %v1630_v40, 4  ;;  %v1643_v51 = vshrl.u32 %v9171_v39, 16  ;;  %v1649_v52 = vshll.u32 %v1503_v4, 16  ;;  %v6909_v46 = vrot.slane %v1706_v17, 9  ;;  %v1804_v40 = vld [vmem:[#allocation2 + $0x54] sm:$0xf] }
 0x185   : > { %3356 = vmatprep.mubr.bf16.mxu0 %v6940_v41  ;;  %3454 = vmatmul.mubr.bf16.gmra.mrb[32].mxu1 %v6948_v24  ;;  %v1635_v60 = vrot.slane %v1633_v47, 5  ;;  %v1641_v42 = vrot.slane %v1639_v44, 5  ;;  %v1773_v63 = vrot.slane %v9171_v39, 5  ;;  %v1776_v20 = vrot.slane %v1503_v4, 5  ;;  %v9207_v47 = vld [vmem:[#allocation2 + $0x58] sm:$0xf] }
 0x186   : > { %3357 = vmatmul.mubr.bf16.gmra.mrb[32].mxu0 %v6932_v15  ;;  %3461 = vmatprep.mubr.bf16.mxu1 %v6957_v1  ;;  %v1645_v32 = vrot.slane %v1643_v51, 4  ;;  %v1651_v27 = vrot.slane %v1649_v52, 5  ;;  %v6933_v0 = vcombine.low %v9167_v22, %v9171_v39  ;;  %v1654_v13 = vshrl.u32 %v9188_v49, 16 }
 0x187   : > { %v1636_v36 = vor.u32 %v1635_v60, %v1632_v50  ;;  %v1774_v2 = vsel %vm8865_vm11, %v6909_v46, %v1773_v63  ;;  %v1775_v17 = vrot.slane %v1773_v63, 4  ;;  %v1657_v4 = vshll.u32 %v9188_v49, 16 }
 0x188   : > { %v1646_v45 = vor.u32 %v1645_v32, %v1641_v42  ;;  %v1656_v48 = vrot.slane %v1654_v13, 4  ;;  %v1663_v15 = vshll.u32 %v9192_v28, 16  ;;  %v1667_v1 = vshrl.u32 %v9192_v28, 16  ;;  %v1707_v13 = vld [vmem:[#allocation2 + $0x48] sm:$0xe] }
 0x189   : > { %v1637_v41 = vrot.slane %v1636_v36, 4  ;;  %v1777_v22 = vsel %vm8865_vm11, %v1775_v17, %v1776_v20  ;;  %v1659_v39 = vrot.slane %v1657_v4, 5  ;;  %v1673_v24 = vshll.u32 %v9196_v33, 16  ;;  %v9211_v36 = vpop.f32.mrb[4].mxu1 }
 0x18a   : > { %v1647_v44 = vrot.slane %v1646_v45, 4  ;;  %v6949_v50 = vcombine.low %v1774_v2, %v1777_v22  ;;  %v1665_v51 = vrot.slane %v1663_v15, 5  ;;  %v1669_v52 = vrot.slane %v1667_v1, 4  ;;  %11020 = vst [vmem:[#allocation17_spill] sm:$0xff] %v9211_v36  ;;  %v1806_v45 = vld [vmem:[#allocation2 + $0x60] sm:$0xf] }
 0x18b   : > { %v1642_v46 = vsel %vm8848_vm8, %v1637_v41, %v1641_v42  ;;  %v1660_v60 = vor.u32 %v1659_v39, %v1656_v48  ;;  %v1675_v63 = vrot.slane %v1673_v24, 5  ;;  %v1961_v32 = vshrl.u32 %v1804_v40, 16  ;;  %v9216_v2 = vpop.f32.mrb[5].mxu1 }
 0x18c   : > { %v1652_v20 = vsel %vm8848_vm8, %v1647_v44, %v1651_v27  ;;  %v1670_v17 = vor.u32 %v1669_v52, %v1665_v51  ;;  %v1964_v4 = vshll.u32 %v1804_v40, 16  ;;  %11021 = vst [vmem:[#allocation18_spill] sm:$0xff] %v9216_v2  ;;  %v6958_v48 = vcombine.low %v1804_v40, %v9207_v47  ;;  %v9221_v41 = vpop.f32.mrb[6].mxu1  ;;  %v9226_v44 = vld [vmem:[#allocation2 + $0x64] sm:$0xf] }
 0x18d   : > { %v6941_v15 = vcombine.low %v1642_v46, %v1652_v20  ;;  %3462 = vmatmul.mubr.bf16.gmra.mrb[36].mxu1 %v6949_v50  ;;  %v1661_v1 = vrot.slane %v1660_v60, 4  ;;  %v9218_v42 = vrot.slane %v1961_v32, 4  ;;  %11022 = vst [vmem:[#allocation19_spill] sm:$0xff] %v9221_v41  ;;  %v6910_v27 = vrot.slane %v1707_v13, 9  ;;  %v9233_v60 = vld [vmem:[#allocation2 + $0x54] sm:$0xf] }
 0x18e   : > { %v1671_v22 = vrot.slane %v1670_v17, 4  ;;  %v9223_v39 = vrot.slane %v1964_v4, 5  ;;  %v1780_v24 = vrot.slane %v9192_v28, 5  ;;  %3469 = vmatprep.mubr.bf16.mxu1 %v6958_v48  ;;  %v1783_v50 = vrot.slane %v9196_v33, 5  ;;  %v9235_v32 = vpop.f32.mrb[7].mxu1 }
 0x18f   : > { %3364 = vmatprep.mubr.bf16.mxu0 %v6941_v15  ;;  %v1666_v52 = vsel %vm8848_vm8, %v1661_v1, %v1665_v51  ;;  %v6934_v40 = vcombine.low %v9188_v49, %v9192_v28  ;;  %v1985_v46 = vshrl.u32 %v1806_v45, 16  ;;  %11023 = vst [vmem:[#allocation20_spill] sm:$0xff] %v9235_v32  ;;  %v1988_v51 = vshll.u32 %v1806_v45, 16  ;;  %v9241_v4 = vld [vmem:[#allocation2 + $0x58] sm:$0xf] }
 0x190   : > { %3365 = vmatmul.mubr.bf16.gmra.mrb[36].mxu0 %v6933_v0  ;;  %v1676_v13 = vsel %vm8848_vm8, %v1671_v22, %v1675_v63  ;;  %v1781_v20 = vsel %vm8865_vm11, %v6910_v27, %v1780_v24  ;;  %v1782_v17 = vrot.slane %v1780_v24, 4  ;;  %v1505_v33 = vld [vmem:[#allocation2 + $0x5c] sm:$0x1]  ;;  %v6959_v28 = vcombine.low %v1806_v45, %v9226_v44  ;;  %v1708_v48 = vld [vmem:[#allocation2 + $0x54] sm:$0xe] }
 0x191   : > { %v6942_v15 = vcombine.low %v1666_v52, %v1676_v13  ;;  %v9243_v1 = vrot.slane %v1985_v46, 4  ;;  %v9249_v63 = vrot.slane %v1988_v51, 5  ;;  %v1678_v22 = vshrl.u32 %v9233_v60, 16  ;;  %v9255_v49 = vld [vmem:[#allocation2 + $0x18] sm:$0xf] }
 0x192   : > { %v1784_v0 = vsel %vm8865_vm11, %v1782_v17, %v1783_v50  ;;  %v1681_v27 = vshll.u32 %v9233_v60, 16  ;;  %v1687_v52 = vshll.u32 %v9241_v4, 16  ;;  %v1691_v46 = vshrl.u32 %v9241_v4, 16  ;;  %v9258_v17 = vld [vmem:[#allocation2 + $0x1c] sm:$0xf] }
 0x193   : > { %11024 = vst [vmem:[#allocation21_spill] sm:$0xff] %v9249_v63  ;;  %3372 = vmatprep.mubr.bf16.mxu0 %v6942_v15  ;;  %v6950_v24 = vcombine.low %v1781_v20, %v1784_v0  ;;  %v1697_v13 = vshll.u32 %v1505_v33, 16  ;;  %v1680_v45 = vrot.slane %v1678_v22, 4  ;;  %v6911_v55 = vrot.slane %v1708_v48, 9  ;;  %v9260_v20 = vld [vmem:[#allocation2 + $0x20] sm:$0x1] }
 0x194   : > { %v1683_v14 = vrot.slane %v1681_v27, 5  ;;  %v1787_v50 = vrot.slane %v9241_v4, 5  ;;  %v1689_v51 = vrot.slane %v1687_v52, 5  ;;  %v1693_v56 = vrot.slane %v1691_v46, 4  ;;  %11025 = vst [vmem:[#allocation22_spill] sm:$0xff] %v9260_v20 }
 0x195   : > { %3470 = vmatmul.mubr.bf16.gmra.mrb[40].mxu1 %v6950_v24  ;;  %v1699_v19 = vrot.slane %v1697_v13, 5  ;;  %v1790_v15 = vrot.slane %v1505_v33, 5  ;;  %v6935_v48 = vcombine.low %v9233_v60, %v9241_v4  ;;  %v2125_v27 = vshrl.u32 %v9255_v49, 16  ;;  %v1808_v46 = vld [vmem:[#allocation2 + $0x14] sm:$0x1] }
 0x196   : > { %3477 = vmatprep.mubr.bf16.mxu1 %v6959_v28  ;;  %v1684_v0 = vor.u32 %v1683_v14, %v1680_v45  ;;  %v1788_v12 = vsel %vm8865_vm11, %v6911_v55, %v1787_v50  ;;  %v1789_v32 = vrot.slane %v1787_v50, 4  ;;  %v1694_v22 = vor.u32 %v1693_v56, %v1689_v51  ;;  %v2008_v13 = vld [vmem:[#allocation2 + $0xc] sm:$0xe] }
 0x197   : > { %v2128_v24 = vshll.u32 %v9255_v49, 16  ;;  %v2134_v52 = vshll.u32 %v9258_v17, 16  ;;  %v2138_v28 = vshrl.u32 %v9258_v17, 16  ;;  %v2144_v55 = vshll.u32 %v9260_v20, 16  ;;  %v9279_v20 = vld [vmem:[#allocation2 + $0x24] sm:$0xf] }
 0x198   : > { %3373 = vmatmul.mubr.bf16.gmra.mrb[40].mxu0 %v6934_v40  ;;  %v1685_v33 = vrot.slane %v1684_v0, 4  ;;  %v1791_v14 = vsel %vm8865_vm11, %v1789_v32, %v1790_v15  ;;  %v1695_v45 = vrot.slane %v1694_v22, 4  ;;  %v2127_v56 = vrot.slane %v2125_v27, 4  ;;  %v9275_v40 = vpop.f32.mrb[8].mxu1 }
 0x199   : > { %v6951_v60 = vcombine.low %v1788_v12, %v1791_v14  ;;  %v2130_v4 = vrot.slane %v2128_v24, 5  ;;  %v2136_v41 = vrot.slane %v2134_v52, 5  ;;  %v2140_v2 = vrot.slane %v2138_v28, 4  ;;  %v9281_v22 = vpop.f32.mrb[9].mxu1  ;;  %v9284_v52 = vld [vmem:[#allocation2 + $0x28] sm:$0xf] }
 0x19a   : > { %v1690_v50 = vsel %vm8848_vm8, %v1685_v33, %v1689_v51  ;;  %v2146_v36 = vrot.slane %v2144_v55, 5  ;;  %v1700_v32 = vsel %vm8848_vm8, %v1695_v45, %v1699_v19  ;;  %v1836_v0 = vshll.u32 %v1808_v46, 16  ;;  %v9292_v55 = vpop.f32.mrb[10].mxu1 }
 0x19b   : > { %v2131_v15 = vor.u32 %v2130_v4, %v2127_v56  ;;  %v6912_v63 = vrot.slane %v2008_v13, 9  ;;  %v6943_v12 = vcombine.low %v1690_v50, %v1700_v32  ;;  %v2141_v27 = vor.u32 %v2140_v2, %v2136_v41  ;;  %v9297_v45 = vpop.f32.mrb[11].mxu1  ;;  %v2009_v4 = vld [vmem:[#allocation2 + $0x18] sm:$0xe] }
 0x19c   : > { %v2042_v24 = vrot.slane %v8985_v30, 5  ;;  %v2045_v51 = vrot.slane %v1808_v46, 5  ;;  %v1838_v14 = vrot.slane %v1836_v0, 5  ;;  %v6976_v19 = vcombine.low %v9255_v49, %v9258_v17  ;;  %11026 = vst [vmem:[#allocation23_spill] sm:$0xff] %v9297_v45 }
 0x19d   : > { %3478 = vmatmul.mubr.bf16.gmra.mrb[44].mxu1 %v6951_v60  ;;  %v2132_v33 = vrot.slane %v2131_v15, 4  ;;  %v1829_v28 = vsel %vm8848_vm8, %v9009_v59, %v9011_v62  ;;  %3380 = vmatprep.mubr.bf16.mxu0 %v6943_v12  ;;  %v2142_v2 = vrot.slane %v2141_v27, 4  ;;  %v2149_v13 = vshrl.u32 %v9279_v20, 16  ;;  %v9304_v59 = vld [vmem:[#allocation2 + $0x2c] sm:$0x1] }
 0x19e   : > { %v2043_v30 = vsel %vm8865_vm11, %v6912_v63, %v2042_v24  ;;  %v2044_v46 = vrot.slane %v2042_v24, 4  ;;  %v1839_v60 = vsel %vm8848_vm8, %v9037_v34, %v1838_v14  ;;  %v2152_v62 = vshll.u32 %v9279_v20, 16  ;;  %v1809_v15 = vld [vmem:[#allocation2 + $0x20] sm:$0x1] }
 0x19f   : > { %v2137_v49 = vsel %vm8848_vm8, %v2132_v33, %v2136_v41  ;;  %v2158_v56 = vshll.u32 %v9284_v52, 16  ;;  %v2147_v63 = vsel %vm8848_vm8, %v2142_v2, %v2146_v36  ;;  %v6960_v32 = vcombine.low %v1829_v28, %v1839_v60  ;;  %v9321_v60 = vld [vmem:[#allocation2 + $0x30] sm:$0xf] }
 0x1a0   : > { %3381 = vmatmul.mubr.bf16.gmra.mrb[44].mxu0 %v6935_v48  ;;  %v2046_v50 = vsel %vm8865_vm11, %v2044_v46, %v2045_v51  ;;  %v2151_v41 = vrot.slane %v2149_v13, 4  ;;  %v6984_v0 = vcombine.low %v2137_v49, %v2147_v63  ;;  %v2154_v34 = vrot.slane %v2152_v62, 5 }
 0x1a1   : > { %v6968_v12 = vcombine.low %v2043_v30, %v2046_v50  ;;  %v2160_v27 = vrot.slane %v2158_v56, 5  ;;  %v2162_v24 = vshrl.u32 %v9284_v52, 16  ;;  %v2168_v33 = vshll.u32 %v9304_v59, 16 }
 0x1a2   : > { %v6913_v48 = vrot.slane %v2009_v4, 9  ;;  %3615 = vmatprep.mubr.bf16.mxu1 %v6984_v0  ;;  %v2155_v36 = vor.u32 %v2154_v34, %v2151_v41  ;;  %v2049_v2 = vrot.slane %v9007_v53, 5  ;;  %v2052_v51 = vrot.slane %v1809_v15, 5 }
 0x1a3   : > { %3518 = vmatprep.mubr.bf16.mxu0 %v6968_v12  ;;  %v6977_v28 = vcombine.low %v9279_v20, %v9284_v52  ;;  %v2164_v46 = vrot.slane %v2162_v24, 4  ;;  %v2170_v30 = vrot.slane %v2168_v33, 5  ;;  %v1847_v13 = vor.u32 %v9022_v11, %v9015_v7  ;;  %v8238_v20 = vld [vmem:[#allocation6 + $0x208] sm:$0xff]   ;;  %v9327_v24 = vld [vmem:[#allocation2 + $0x34] sm:$0xf] }
 0x1a4   : > { %v1850_v49 = vshll.u32 %v9007_v53, 16  ;;  %v2156_v62 = vrot.slane %v2155_v36, 4  ;;  %v2050_v56 = vsel %vm8865_vm11, %v6913_v48, %v2049_v2  ;;  %v2051_v4 = vrot.slane %v2049_v2, 4 }
 0x1a5   : > { %3616 = vmatmul.mubr.bf16.vlgmr.msra.gmra.mrb[48].mxu1 %v6976_v19  ;;  %v11027_v63 = vshrl.u32 %v9007_v53, 16  ;;  %v2165_v41 = vor.u32 %v2164_v46, %v2160_v27  ;;  %v1848_v0 = vrot.slane %v1847_v13, 4  ;;  %v1860_v34 = vshll.u32 %v1809_v15, 16  ;;  %v9333_v19 = vld [vmem:[#allocation2 + $0x38] sm:$0x1] }
 0x1a6   : > { %v1852_v12 = vrot.slane %v1850_v49, 5  ;;  %v2161_v7 = vsel %vm8848_vm8, %v2156_v62, %v2160_v27  ;;  %v2053_v11 = vsel %vm8865_vm11, %v2051_v4, %v2052_v51  ;;  %v2173_v33 = vshrl.u32 %v9321_v60, 16  ;;  %v2010_v46 = vld [vmem:[#allocation2 + $0x24] sm:$0xe]  ;;  %v8363_v13 = vld [vmem:[#allocation6 + $0x200] sm:$0xff]   ;;  %v8240_v4 = vld [vmem:[#allocation6 + $0x210] sm:$0xff]  }
 0x1a7   : > { %v1856_v50 = vrot.slane %v11027_v63, 4  ;;  %v2176_v53 = vshll.u32 %v9321_v60, 16  ;;  %v2166_v48 = vrot.slane %v2165_v41, 4  ;;  %v6969_v36 = vcombine.low %v2050_v56, %v2053_v11 }
 0x1a8   : > { %3519 = vmatmul.mubr.bf16.vlgmr.msra.gmra.mrb[48].mxu0 %v6960_v32  ;;  %v1853_v15 = vsel %vm8848_vm8, %v1848_v0, %v1852_v12  ;;  %v1862_v27 = vrot.slane %v1860_v34, 5  ;;  %v2175_v49 = vrot.slane %v2173_v33, 4  ;;  %v2182_v51 = vshll.u32 %v9327_v24, 16  ;;  %v9344_v0 = vpop.f32.mrb[12].mxu1 }
 0x1a9   : > { %v1857_v2 = vor.u32 %v1856_v50, %v1852_v12  ;;  %7962 = vmatpush3.bf16.msra.mxu0 %v8363_v13  ;;  %v2178_v62 = vrot.slane %v2176_v53, 5  ;;  %v2171_v63 = vsel %vm8848_vm8, %v2166_v48, %v2170_v30  ;;  %3526 = vmatprep.mubr.bf16.mxu0 %v6969_v36  ;;  %v2186_v56 = vshrl.u32 %v9327_v24, 16  ;;  %v1810_v50 = vld [vmem:[#allocation2 + $0x2c] sm:$0x1]  ;;  %11028 = vst [vmem:[#allocation24_spill] sm:$0xff] %v9344_v0 }
 0x1aa   : > { %7963 = vmatprep.subr.bf16.mxu0 %v8238_v20  ;;  %v2192_v41 = vshll.u32 %v9333_v19, 16  ;;  %v6985_v12 = vcombine.low %v2161_v7, %v2171_v63  ;;  %v2184_v11 = vrot.slane %v2182_v51, 5  ;;  %v6914_v33 = vrot.slane %v2010_v46, 9  ;;  %v9351_v0 = vld [vmem:[#allocation2 + $0x3c] sm:$0xf]  ;;  %v9353_v7 = vpop.f32.mrb[13].mxu1 }
 0x1ab   : > { %v1858_v32 = vrot.slane %v1857_v2, 4  ;;  %v2179_v34 = vor.u32 %v2178_v62, %v2175_v49  ;;  %v2188_v13 = vrot.slane %v2186_v56, 4  ;;  %v2056_v30 = vrot.slane %v9069_v43, 5  ;;  %11029 = vst [vmem:[#allocation25_spill] sm:$0xff] %v9353_v7  ;;  %v8242_v62 = vld [vmem:[#allocation6 + $0x218] sm:$0xff]  }
 0x1ac   : > { %v2194_v14 = vrot.slane %v2192_v41, 5  ;;  %3623 = vmatprep.mubr.bf16.mxu1 %v6985_v12  ;;  %v2059_v2 = vrot.slane %v1810_v50, 5  ;;  %v6978_v45 = vcombine.low %v9321_v60, %v9327_v24  ;;  %v1874_v51 = vshll.u32 %v9069_v43, 16  ;;  %v9366_v56 = vld [vmem:[#allocation2 + $0x40] sm:$0xf] }
 0x1ad   : > { %v1863_v53 = vsel %vm8848_vm8, %v1858_v32, %v1862_v27  ;;  %v2180_v36 = vrot.slane %v2179_v34, 4  ;;  %7964 = vmatpush3.bf16.msra.mxu0 %v8238_v20  ;;  %3624 = vmatmul.mubr.bf16.gmra.mrb[52].mxu1 %v6977_v28  ;;  %v2189_v46 = vor.u32 %v2188_v13, %v2184_v11  ;;  %v2057_v27 = vsel %vm8865_vm11, %v6914_v33, %v2056_v30  ;;  %v9359_v20 = vpop.f32.mrb[14].mxu1  ;;  %v9372_v34 = vld [vmem:[#allocation2 + $0x44] sm:$0x1] }
 0x1ae   : > { %v6961_v48 = vcombine.low %v1853_v15, %v1863_v53  ;;  %v2058_v49 = vrot.slane %v2056_v30, 4  ;;  %7965 = vmatprep.subr.bf16.mxu0 %v8240_v4  ;;  %v1871_v15 = vor.u32 %v9077_v16, %v9071_v3  ;;  %11030 = vst [vmem:[#allocation26_spill] sm:$0xff] %v9359_v20  ;;  %v11031_v63 = vshrl.u32 %v9069_v43, 16  ;;  %v9368_v41 = vpop.f32.mrb[15].mxu1 }
 0x1af   : > { %v2185_v60 = vsel %vm8848_vm8, %v2180_v36, %v2184_v11  ;;  %v1884_v32 = vshll.u32 %v1810_v50, 16  ;;  %11032 = vst [vmem:[#allocation27_spill] sm:$0xff] %v9368_v41  ;;  %v2190_v12 = vrot.slane %v2189_v46, 4  ;;  %v2197_v11 = vshrl.u32 %v9351_v0, 16  ;;  %v2011_v50 = vld [vmem:[#allocation2 + $0x30] sm:$0xe] }
 0x1b0   : > { %v1880_v28 = vrot.slane %v11031_v63, 4  ;;  %3527 = vmatmul.mubr.bf16.gmra.mrb[52].mxu0 %v6961_v48  ;;  %v2060_v3 = vsel %vm8865_vm11, %v2058_v49, %v2059_v2  ;;  %v1872_v16 = vrot.slane %v1871_v15, 4  ;;  %v1876_v53 = vrot.slane %v1874_v51, 5  ;;  %v9380_v46 = vld [vmem:[#allocation2 + $0x38] sm:$0x1] }
 0x1b1   : > { %v6970_v33 = vcombine.low %v2057_v27, %v2060_v3  ;;  %v1886_v13 = vrot.slane %v1884_v32, 5  ;;  %v2200_v43 = vshll.u32 %v9351_v0, 16  ;;  %7966 = vmatpush3.bf16.msra.mxu0 %v8240_v4  ;;  %v2195_v30 = vsel %vm8848_vm8, %v2190_v12, %v2194_v14  ;;  %v8244_v49 = vld [vmem:[#allocation6 + $0x220] sm:$0xff]  }
 0x1b2   : > { %v2199_v48 = vrot.slane %v2197_v11, 4  ;;  %v2206_v36 = vshll.u32 %v9366_v56, 16  ;;  %v2210_v2 = vshrl.u32 %v9366_v56, 16  ;;  %7967 = vmatprep.subr.bf16.mxu0 %v8242_v62  ;;  %v6986_v15 = vcombine.low %v2185_v60, %v2195_v30  ;;  %v440_v63 = vld [vmem:[#allocation2 + $0x78] sm:$0x1]  ;;  %v8246_v30 = vld [vmem:[#allocation6 + $0x228] sm:$0xff]  }
 0x1b3   : > { %3534 = vmatprep.mubr.bf16.mxu0 %v6970_v33  ;;  %v1877_v27 = vsel %vm8848_vm8, %v1872_v16, %v1876_v53  ;;  %v1881_v51 = vor.u32 %v1880_v28, %v1876_v53  ;;  %v2202_v4 = vrot.slane %v2200_v43, 5  ;;  %v2216_v14 = vshll.u32 %v9372_v34, 16  ;;  %v437_v60 = vld [vmem:[#allocation2 + $0x6c] sm:$0x1]  ;;  %v9392_v53 = vld [vmem:[%s10973_s2] ss:$0 sm:$0xff] }
 0x1b4   : > { %v2208_v32 = vrot.slane %v2206_v36, 5  ;;  %v2212_v3 = vrot.slane %v2210_v2, 4  ;;  %v6915_v12 = vrot.slane %v2011_v50, 9  ;;  %3631 = vmatprep.mubr.bf16.mxu1 %v6986_v15  ;;  %v2063_v20 = vrot.slane %v9098_v18, 5  ;;  %v496_v50 = vld [vmem:[#allocation2 + $0x80] sm:$0x1] }
 0x1b5   : > { %v1882_v11 = vrot.slane %v1881_v51, 4  ;;  %v2203_v41 = vor.u32 %v2202_v4, %v2199_v48  ;;  %v2066_v7 = vrot.slane %v9380_v46, 5  ;;  %7968 = vmatpush3.bf16.msra.mxu0 %v8242_v62  ;;  %3632 = vmatmul.mubr.bf16.gmra.mrb[56].mxu1 %v6978_v45  ;;  %v2218_v16 = vrot.slane %v2216_v14, 5  ;;  %v9403_v51 = vld [vmem:[%s10974_s3] ss:$0 sm:$0xff] }
 0x1b6   : > { %v2213_v33 = vor.u32 %v2212_v3, %v2208_v32  ;;  %v441_v28 = vsel %vm8782_vm3, 0, %v440_v63  ;;  %v1165_v43 = vmul.f32 %v9392_v53, %v8917_v35  ;;  %7969 = vmatprep.subr.bf16.mxu0 %v8244_v49  ;;  %v2064_v48 = vsel %vm8865_vm11, %v6915_v12, %v2063_v20  ;;  %v493_v63 = vld [vmem:[#allocation2 + $0x74] sm:$0x1] }
 0x1b7   : > { %v1887_v62 = vsel %vm8848_vm8, %v1882_v11, %v1886_v13  ;;  %v2204_v45 = vrot.slane %v2203_v41, 4  ;;  %v2065_v36 = vrot.slane %v2063_v20, 4  ;;  %442 = vst [vmem:[#allocation2 + $0x78] sm:$0x1] %v441_v28  ;;  %v438_v4 = vsel %vm8782_vm3, 0, %v437_v60 }
 0x1b8   : > { %v6962_v2 = vcombine.low %v1877_v27, %v1887_v62  ;;  %v2214_v15 = vrot.slane %v2213_v33, 4  ;;  %v1181_v35 = vadd.f32 %v9403_v51, %v1165_v43  ;;  %439 = vst [vmem:[#allocation2 + $0x6c] sm:$0x1] %v438_v4  ;;  %v1163_v13 = vmul.f32 %v9392_v53, %v8951_v21 }
 0x1b9   : > { %v2209_v41 = vsel %vm8848_vm8, %v2204_v45, %v2208_v32  ;;  %v2067_v20 = vsel %vm8865_vm11, %v2065_v36, %v2066_v7  ;;  %v497_v27 = vsel %vm8818_vm5, 0, %v496_v50  ;;  %7970 = vmatpush3.bf16.msra.mxu0 %v8244_v49  ;;  %v1166_v32 = vmul.f32 %v9392_v53, %v8969_v61  ;;  %v8248_v7 = vld [vmem:[#allocation6 + $0x230] sm:$0xff]  }
 0x1ba   : > { %3535 = vmatmul.mubr.bf16.gmra.mrb[56].mxu0 %v6962_v2  ;;  %v2219_v3 = vsel %vm8848_vm8, %v2214_v15, %v2218_v16  ;;  %v6971_v14 = vcombine.low %v2064_v48, %v2067_v20  ;;  %v1197_v12 = vmax.f32 %v1181_v35, 0.0  ;;  %498 = vst [vmem:[#allocation2 + $0x80] sm:$0x1] %v497_v27  ;;  %7971 = vmatprep.subr.bf16.mxu0 %v8246_v30  ;;  %v494_v21 = vsel %vm8818_vm5, 0, %v493_v63  ;;  %v9434_v48 = vld [vmem:[#allocation2 + $0x48] sm:$0xf] }
 0x1bb   : > { %v6987_v11 = vcombine.low %v2209_v41, %v2219_v3  ;;  %v1179_v60 = vadd.f32 %v9403_v51, %v1163_v13  ;;  %v1164_v49 = vmul.f32 %v9392_v53, %v8973_v5  ;;  %v1182_v16 = vadd.f32 %v9403_v51, %v1166_v32  ;;  %495 = vst [vmem:[#allocation2 + $0x74] sm:$0x1] %v494_v21  ;;  %v8249_v35 = vld [vmem:[#allocation6 + $0x238] sm:$0xff]  }
 0x1bc   : > { %3542 = vmatprep.mubr.bf16.mxu0 %v6971_v14  ;;  %v7316_v33 = vpack.c.bf16 %v1197_v12, %v1197_v12  ;;  %v6979_v28 = vcombine.low %v9351_v0, %v9366_v56  ;;  %v1895_v61 = vor.u32 %v9118_v25, %v9113_v6  ;;  %v1898_v62 = vshll.u32 %v9098_v18, 16 }
 0x1bd   : > { %3639 = vmatprep.mubr.bf16.mxu1 %v6987_v11  ;;  %v1195_v43 = vmax.f32 %v1179_v60, 0.0  ;;  %v1180_v50 = vadd.f32 %v9403_v51, %v1164_v49  ;;  %v11033_v45 = vshrl.u32 %v9098_v18, 16  ;;  %7972 = vmatpush3.bf16.msra.mxu0 %v8246_v30  ;;  %v1198_v15 = vmax.f32 %v1182_v16, 0.0 }
 0x1be   : > { %v1278_v36 = vshrl.u32 %v7316_v33, 16  ;;  %v1281_v2 = vshll.u32 %v7316_v33, 16  ;;  %3640 = vmatmul.mubr.bf16.gmra.mrb[60].mxu1 %v6979_v28  ;;  %v1896_v0 = vrot.slane %v1895_v61, 4  ;;  %7973 = vmatprep.subr.bf16.mxu0 %v8248_v7  ;;  %v1900_v4 = vrot.slane %v1898_v62, 5  ;;  %v1430_v27 = vld [vmem:[#allocation2 + $0x78] sm:$0xf] }
 0x1bf   : > { %v1904_v5 = vrot.slane %v11033_v45, 4  ;;  %v7314_v6 = vpack.c.bf16 %v1195_v43, %v1195_v43  ;;  %v1196_v25 = vmax.f32 %v1180_v50, 0.0  ;;  %v1908_v63 = vshll.u32 %v9380_v46, 16  ;;  %v8251_v46 = vld [vmem:[#allocation6 + $0x40] sm:$0xff]   ;;  %v9441_v61 = vld [vmem:[#allocation2 + $0x4c] sm:$0xf] }
 0x1c0   : > { %v1280_v41 = vrot.slane %v1278_v36, 7  ;;  %v7317_v20 = vpack.c.bf16 %v1198_v15, %v1198_v15  ;;  %v2221_v18 = vshrl.u32 %v9434_v48, 16  ;;  %v2224_v13 = vshll.u32 %v9434_v48, 16  ;;  %v1423_v50 = vld [vmem:[#allocation2 + $0x6c] sm:$0xf] }
 0x1c1   : > { %v1261_v30 = vshrl.u32 %v7314_v6, 16  ;;  %v1264_v3 = vshll.u32 %v7314_v6, 16  ;;  %v7315_v14 = vpack.c.bf16 %v1196_v25, %v1196_v25  ;;  %v1901_v12 = vsel %vm8848_vm8, %v1896_v0, %v1900_v4  ;;  %7974 = vmatpush3.bf16.msra.mxu0 %v8248_v7  ;;  %v1434_v15 = vld [vmem:[#allocation2 + $0x80] sm:$0x1]  ;;  %v9445_v25 = vpop.f32.mrb[16].mxu0 }
 0x1c2   : > { %v1283_v32 = vor.u32 %v1281_v2, %v1280_v41  ;;  %v1284_v11 = vrot.slane %v1280_v41, 4  ;;  %v1286_v60 = vshrl.u32 %v7317_v20, 16  ;;  %v1289_v21 = vshll.u32 %v7317_v20, 16  ;;  %7975 = vmatprep.subr.bf16.mxu0 %v8249_v35 }
 0x1c3   : > { %v1263_v49 = vrot.slane %v1261_v30, 7  ;;  %v1269_v33 = vshrl.u32 %v7315_v14, 16  ;;  %v1272_v16 = vshll.u32 %v7315_v14, 16  ;;  %v1905_v28 = vor.u32 %v1904_v5, %v1900_v4  ;;  %v1427_v4 = vld [vmem:[#allocation2 + $0x74] sm:$0x1] }
 0x1c4   : > { %v1431_v43 = vsel %vm8912_vm14, %v1283_v32, %v1430_v27  ;;  %v1288_v62 = vrot.slane %v1286_v60, 7  ;;  %v1910_v45 = vrot.slane %v1908_v63, 5  ;;  %v2223_v36 = vrot.slane %v2221_v18, 4  ;;  %v9452_v14 = vld [vmem:[#allocation2 + $0x50] sm:$0x1] }
 0x1c5   : > { %1432 = vst [vmem:[#allocation2 + $0x78] sm:$0xf] %v1431_v43  ;;  %v1266_v7 = vor.u32 %v1264_v3, %v1263_v49  ;;  %v1267_v2 = vrot.slane %v1263_v49, 4  ;;  %v1271_v0 = vrot.slane %v1269_v33, 7  ;;  %v1906_v6 = vrot.slane %v1905_v28, 4  ;;  %7976 = vmatpush3.bf16.msra.mxu0 %v8249_v35 }
 0x1c6   : > { %v1291_v41 = vor.u32 %v1289_v21, %v1288_v62  ;;  %v1293_v5 = vrot.slane %v1288_v62, 4  ;;  %v2226_v20 = vrot.slane %v2224_v13, 5  ;;  %v2230_v30 = vshll.u32 %v9441_v61, 16  ;;  %7637 = vmatprep.subr.bf16.mxu0 %v8251_v46  ;;  %v2012_v35 = vld [vmem:[#allocation2 + $0x3c] sm:$0xe] }
 0x1c7   : > { %v1424_v63 = vsel %vm8912_vm14, %v1266_v7, %v1423_v50  ;;  %v1274_v18 = vor.u32 %v1272_v16, %v1271_v0  ;;  %v1276_v27 = vrot.slane %v1271_v0, 4  ;;  %v1911_v3 = vsel %vm8848_vm8, %v1906_v6, %v1910_v45  ;;  %v1812_v46 = vld [vmem:[#allocation2 + $0x44] sm:$0x1] }
 0x1c8   : > { %1425 = vst [vmem:[#allocation2 + $0x6c] sm:$0xf] %v1424_v63  ;;  %v1292_v32 = vsel %vm8921_vm15, %v1284_v11, %v1291_v41  ;;  %v1435_v13 = vsel %vm8782_vm3, %v1293_v5, %v1434_v15  ;;  %v6963_v60 = vcombine.low %v1901_v12, %v1911_v3  ;;  %v2227_v21 = vor.u32 %v2226_v20, %v2223_v36  ;;  %v9475_v5 = vld [vmem:[#allocation2 + $0x58] sm:$0xf] }
 0x1c9   : > { %1433 = vst [vmem:[#allocation2 + $0x7c] sm:$0xf] %v1292_v32  ;;  %1436 = vst [vmem:[#allocation2 + $0x80] sm:$0x1] %v1435_v13  ;;  %v1275_v49 = vsel %vm8921_vm15, %v1267_v2, %v1274_v18  ;;  %v1428_v33 = vsel %vm8782_vm3, %v1276_v27, %v1427_v4  ;;  %v2232_v16 = vrot.slane %v2230_v30, 5  ;;  %v2234_v28 = vshrl.u32 %v9441_v61, 16 }
 0x1ca   : > { %1426 = vst [vmem:[#allocation2 + $0x70] sm:$0xf] %v1275_v49  ;;  %1429 = vst [vmem:[#allocation2 + $0x74] sm:$0x1] %v1428_v33  ;;  %3543 = vmatmul.mubr.bf16.gmra.mrb[60].mxu0 %v6963_v60  ;;  %v2228_v11 = vrot.slane %v2227_v21, 4  ;;  %v2240_v43 = vshll.u32 %v9452_v14, 16  ;;  %v6980_v36 = vcombine.low %v9434_v48, %v9441_v61  ;;  %v1919_v7 = vor.u32 %v9160_v58, %v9158_v8 }
 0x1cb   : > { %v6916_v12 = vrot.slane %v2012_v35, 9  ;;  %v2070_v50 = vrot.slane %v9154_v9, 5  ;;  %v2236_v62 = vrot.slane %v2234_v28, 4  ;;  %v2073_v45 = vrot.slane %v1812_v46, 5  ;;  %v9469_v2 = vld [vmem:[#allocation2 + $0x54] sm:$0xf] }
 0x1cc   : > { %v2233_v15 = vsel %vm8848_vm8, %v2228_v11, %v2232_v16  ;;  %v2242_v0 = vrot.slane %v2240_v43, 5  ;;  %v9477_v4 = vpop.f32.mrb[17].mxu0  ;;  %v1920_v30 = vrot.slane %v1919_v7, 4  ;;  %v1922_v48 = vshll.u32 %v9154_v9, 16  ;;  %v1813_v32 = vld [vmem:[#allocation2 + $0x50] sm:$0x1] }
 0x1cd   : > { %v2071_v6 = vsel %vm8865_vm11, %v6916_v12, %v2070_v50  ;;  %v2072_v41 = vrot.slane %v2070_v50, 4  ;;  %v2237_v20 = vor.u32 %v2236_v62, %v2232_v16  ;;  %v11034_v8 = vshrl.u32 %v9154_v9, 16  ;;  %v9482_v63 = vpop.f32.mrb[18].mxu0  ;;  %v9490_v33 = vld [vmem:[#allocation2 + $0x5c] sm:$0x1] }
 0x1ce   : > { %v1932_v27 = vshll.u32 %v1812_v46, 16  ;;  %v2245_v3 = vshrl.u32 %v9469_v2, 16  ;;  %v2248_v35 = vshll.u32 %v9469_v2, 16  ;;  %v9488_v13 = vpop.f32.mrb[19].mxu0  ;;  %v1924_v49 = vrot.slane %v1922_v48, 5 }
 0x1cf   : > { %v1928_v58 = vrot.slane %v11034_v8, 4  ;;  %v2074_v18 = vsel %vm8865_vm11, %v2072_v41, %v2073_v45  ;;  %v2238_v60 = vrot.slane %v2237_v20, 4  ;;  %v2254_v9 = vshll.u32 %v9475_v5, 16  ;;  %v2013_v46 = vld [vmem:[#allocation2 + $0x48] sm:$0xe] }
 0x1d0   : > { %v6972_v21 = vcombine.low %v2071_v6, %v2074_v18  ;;  %v1934_v16 = vrot.slane %v1932_v27, 5  ;;  %v2247_v28 = vrot.slane %v2245_v3, 4  ;;  %v2250_v11 = vrot.slane %v2248_v35, 5 }
 0x1d1   : > { %v2258_v43 = vshrl.u32 %v9475_v5, 16  ;;  %v2243_v12 = vsel %vm8848_vm8, %v2238_v60, %v2242_v0  ;;  %v1925_v50 = vsel %vm8848_vm8, %v1920_v30, %v1924_v49  ;;  %v1929_v62 = vor.u32 %v1928_v58, %v1924_v49  ;;  %v9508_v49 = vld [vmem:[#allocation2 + $0x60] sm:$0xf] }
 0x1d2   : > { %3550 = vmatprep.mubr.bf16.mxu0 %v6972_v21  ;;  %v2256_v45 = vrot.slane %v2254_v9, 5  ;;  %v6988_v7 = vcombine.low %v2233_v15, %v2243_v12  ;;  %v2251_v6 = vor.u32 %v2250_v11, %v2247_v28  ;;  %v2264_v20 = vshll.u32 %v9490_v33, 16 }
 0x1d3   : > { %v2260_v41 = vrot.slane %v2258_v43, 4  ;;  %v1930_v48 = vrot.slane %v1929_v62, 4  ;;  %v6917_v8 = vrot.slane %v2013_v46, 9  ;;  %v2077_v18 = vrot.slane %v9163_v37, 5 }
 0x1d4   : > { %v2080_v27 = vrot.slane %v1813_v32, 5  ;;  %3647 = vmatprep.mubr.bf16.mxu1 %v6988_v7  ;;  %v2252_v3 = vrot.slane %v2251_v6, 4  ;;  %v2266_v0 = vrot.slane %v2264_v20, 5  ;;  %v6981_v60 = vcombine.low %v9469_v2, %v9475_v5  ;;  %v2014_v6 = vld [vmem:[#allocation2 + $0x54] sm:$0xe] }
 0x1d5   : > { %v2261_v35 = vor.u32 %v2260_v41, %v2256_v45  ;;  %3648 = vmatmul.mubr.bf16.gmra.mrb[64].mxu1 %v6980_v36  ;;  %v1935_v15 = vsel %vm8848_vm8, %v1930_v48, %v1934_v16  ;;  %v2078_v30 = vsel %vm8865_vm11, %v6917_v8, %v2077_v18  ;;  %v2079_v58 = vrot.slane %v2077_v18, 4  ;;  %v9513_v36 = vld [vmem:[#allocation2 + $0x64] sm:$0xf] }
 0x1d6   : > { %v1943_v21 = vor.u32 %v9183_v31, %v9175_v29  ;;  %v6964_v9 = vcombine.low %v1925_v50, %v1935_v15  ;;  %v2257_v28 = vsel %vm8848_vm8, %v2252_v3, %v2256_v45  ;;  %v1946_v2 = vshll.u32 %v9163_v37, 16  ;;  %v9521_v45 = vld [vmem:[#allocation2 + $0x68] sm:$0x1] }
 0x1d7   : > { %v2262_v11 = vrot.slane %v2261_v35, 4  ;;  %v2081_v16 = vsel %vm8865_vm11, %v2079_v58, %v2080_v27  ;;  %v11035_v46 = vshrl.u32 %v9163_v37, 16  ;;  %v1956_v62 = vshll.u32 %v1813_v32, 16  ;;  %v1814_v37 = vld [vmem:[#allocation2 + $0x5c] sm:$0x1] }
 0x1d8   : > { %v1944_v43 = vrot.slane %v1943_v21, 4  ;;  %3551 = vmatmul.mubr.bf16.gmra.mrb[64].mxu0 %v6964_v9  ;;  %v6973_v31 = vcombine.low %v2078_v30, %v2081_v16  ;;  %v1948_v50 = vrot.slane %v1946_v2, 5  ;;  %v2269_v7 = vshrl.u32 %v9508_v49, 16 }
 0x1d9   : > { %v1952_v12 = vrot.slane %v11035_v46, 4  ;;  %v2267_v29 = vsel %vm8848_vm8, %v2262_v11, %v2266_v0  ;;  %v1958_v20 = vrot.slane %v1956_v62, 5  ;;  %v2272_v48 = vshll.u32 %v9508_v49, 16 }
 0x1da   : > { %v6989_v41 = vcombine.low %v2257_v28, %v2267_v29  ;;  %v2278_v8 = vshll.u32 %v9513_v36, 16  ;;  %3558 = vmatprep.mubr.bf16.mxu0 %v6973_v31  ;;  %v1949_v32 = vsel %vm8848_vm8, %v1944_v43, %v1948_v50  ;;  %v2271_v27 = vrot.slane %v2269_v7, 4  ;;  %v2015_v31 = vld [vmem:[#allocation2 + $0x60] sm:$0xe] }
 0x1db   : > { %v1953_v18 = vor.u32 %v1952_v12, %v1948_v50  ;;  %v2282_v3 = vshrl.u32 %v9513_v36, 16  ;;  %v2274_v35 = vrot.slane %v2272_v48, 5  ;;  %v2288_v15 = vshll.u32 %v9521_v45, 16 }
 0x1dc   : > { %3655 = vmatprep.mubr.bf16.mxu1 %v6989_v41  ;;  %v2280_v0 = vrot.slane %v2278_v8, 5  ;;  %v6918_v30 = vrot.slane %v2014_v6, 9  ;;  %v2084_v9 = vrot.slane %v9207_v47, 5  ;;  %v2087_v28 = vrot.slane %v1814_v37, 5  ;;  %v1815_v41 = vld [vmem:[#allocation2 + $0x68] sm:$0x1] }
 0x1dd   : > { %v1954_v58 = vrot.slane %v1953_v18, 4  ;;  %v2284_v21 = vrot.slane %v2282_v3, 4  ;;  %3656 = vmatmul.mubr.bf16.gmra.mrb[68].mxu1 %v6981_v60  ;;  %v2275_v11 = vor.u32 %v2274_v35, %v2271_v27  ;;  %v2290_v2 = vrot.slane %v2288_v15, 5 }
 0x1de   : > { %v6982_v16 = vcombine.low %v9508_v49, %v9513_v36  ;;  %v1967_v43 = vor.u32 %v9223_v39, %v9218_v42  ;;  %v2085_v62 = vsel %vm8865_vm11, %v6918_v30, %v2084_v9  ;;  %v2086_v29 = vrot.slane %v2084_v9, 4 }
 0x1df   : > { %v1959_v46 = vsel %vm8848_vm8, %v1954_v58, %v1958_v20  ;;  %v2285_v12 = vor.u32 %v2284_v21, %v2280_v0  ;;  %v2276_v7 = vrot.slane %v2275_v11, 4  ;;  %v1970_v6 = vshll.u32 %v9207_v47, 16  ;;  %v9549_v58 = vld [vmem:[#allocation2 + $0x6c] sm:$0xf] }
 0x1e0   : > { %v6965_v50 = vcombine.low %v1949_v32, %v1959_v46  ;;  %v1968_v60 = vrot.slane %v1967_v43, 4  ;;  %v2088_v49 = vsel %vm8865_vm11, %v2086_v29, %v2087_v28  ;;  %v11036_v42 = vshrl.u32 %v9207_v47, 16  ;;  %v9555_v28 = vld [vmem:[#allocation2 + $0x70] sm:$0xf] }
 0x1e1   : > { %v2286_v48 = vrot.slane %v2285_v12, 4  ;;  %v1980_v20 = vshll.u32 %v1814_v37, 16  ;;  %v2281_v8 = vsel %vm8848_vm8, %v2276_v7, %v2280_v0  ;;  %v6974_v18 = vcombine.low %v2085_v62, %v2088_v49  ;;  %v11037_v0 = vld [vmem:[#allocation21_spill] sm:$0xff]  ;;  %v2316_v7 = vld [vmem:[#allocation2 + $0x18] sm:$0xe] }
 0x1e2   : > { %v1976_v39 = vrot.slane %v11036_v42, 4  ;;  %3559 = vmatmul.mubr.bf16.gmra.mrb[68].mxu0 %v6965_v50  ;;  %v1972_v27 = vrot.slane %v1970_v6, 5  ;;  %v6919_v32 = vrot.slane %v2015_v31, 9  ;;  %v2091_v15 = vrot.slane %v9226_v44, 5  ;;  %v9565_v6 = vld [vmem:[#allocation2 + $0x74] sm:$0x1] }
 0x1e3   : > { %v2291_v3 = vsel %vm8848_vm8, %v2286_v48, %v2290_v2  ;;  %v1982_v35 = vrot.slane %v1980_v20, 5  ;;  %v2094_v30 = vrot.slane %v1815_v41, 5  ;;  %3566 = vmatprep.mubr.bf16.mxu0 %v6974_v18  ;;  %v1991_v9 = vor.u32 %v11037_v0, %v9243_v1  ;;  %v11039_v0 = vld [vmem:[#allocation22_spill] sm:$0xff] }
 0x1e4   : > { %v6990_v21 = vcombine.low %v2281_v8, %v2291_v3  ;;  %v1973_v47 = vsel %vm8848_vm8, %v1968_v60, %v1972_v27  ;;  %v1977_v37 = vor.u32 %v1976_v39, %v1972_v27  ;;  %v2092_v11 = vsel %vm8865_vm11, %v6919_v32, %v2091_v15  ;;  %v2317_v27 = vld [vmem:[#allocation2 + $0x24] sm:$0xe] }
 0x1e5   : > { %v2093_v2 = vrot.slane %v2091_v15, 4  ;;  %v1994_v43 = vshll.u32 %v9226_v44, 16  ;;  %v11038_v46 = vshrl.u32 %v9226_v44, 16  ;;  %v1992_v29 = vrot.slane %v1991_v9, 4 }
 0x1e6   : > { %3663 = vmatprep.mubr.bf16.mxu1 %v6990_v21  ;;  %v1978_v62 = vrot.slane %v1977_v37, 4  ;;  %v2004_v31 = vshll.u32 %v1815_v41, 16  ;;  %v2293_v50 = vshrl.u32 %v9549_v58, 16  ;;  %v2296_v48 = vshll.u32 %v9549_v58, 16 }
 0x1e7   : > { %v2000_v12 = vrot.slane %v11038_v46, 4  ;;  %3664 = vmatmul.mubr.bf16.gmra.mrb[72].mxu1 %v6982_v16  ;;  %v2095_v1 = vsel %vm8865_vm11, %v2093_v2, %v2094_v30  ;;  %v1996_v60 = vrot.slane %v1994_v43, 5  ;;  %v2302_v49 = vshll.u32 %v9555_v28, 16 }
 0x1e8   : > { %v1983_v44 = vsel %vm8848_vm8, %v1978_v62, %v1982_v35  ;;  %v6975_v42 = vcombine.low %v2092_v11, %v2095_v1  ;;  %v2006_v39 = vrot.slane %v2004_v31, 5  ;;  %v2295_v41 = vrot.slane %v2293_v50, 4 }
 0x1e9   : > { %v6966_v20 = vcombine.low %v1973_v47, %v1983_v44  ;;  %v1997_v16 = vsel %vm8848_vm8, %v1992_v29, %v1996_v60  ;;  %v2001_v8 = vor.u32 %v2000_v12, %v1996_v60  ;;  %v2298_v18 = vrot.slane %v2296_v48, 5  ;;  %v2318_v47 = vld [vmem:[#allocation2 + $0x30] sm:$0xe]  ;;  %v2319_v60 = vld [vmem:[#allocation2 + $0x3c] sm:$0xe] }
 0x1ea   : > { %v2304_v32 = vrot.slane %v2302_v49, 5  ;;  %v2306_v3 = vshrl.u32 %v9555_v28, 16  ;;  %v2312_v15 = vshll.u32 %v9565_v6, 16  ;;  %v6920_v30 = vrot.slane %v2316_v7, 9 }
 0x1eb   : > { %3567 = vmatmul.mubr.bf16.gmra.mrb[72].mxu0 %v6966_v20  ;;  %v2002_v21 = vrot.slane %v2001_v8, 4  ;;  %v2299_v37 = vor.u32 %v2298_v18, %v2295_v41  ;;  %v2350_v35 = vrot.slane %v9258_v17, 5  ;;  %v2353_v9 = vrot.slane %v11039_v0, 5 }
 0x1ec   : > { %3574 = vmatprep.mubr.bf16.mxu0 %v6975_v42  ;;  %v2308_v11 = vrot.slane %v2306_v3, 4  ;;  %v2314_v2 = vrot.slane %v2312_v15, 5  ;;  %v6983_v43 = vcombine.low %v9549_v58, %v9555_v28  ;;  %v6921_v46 = vrot.slane %v2317_v27, 9  ;;  %v2320_v42 = vld [vmem:[#allocation2 + $0x48] sm:$0xe] }
 0x1ed   : > { %v2007_v12 = vsel %vm8848_vm8, %v2002_v21, %v2006_v39  ;;  %v2300_v62 = vrot.slane %v2299_v37, 4  ;;  %v2351_v29 = vsel %vm8865_vm11, %v6920_v30, %v2350_v35  ;;  %v2352_v31 = vrot.slane %v2350_v35, 4  ;;  %v2321_v30 = vld [vmem:[#allocation2 + $0x54] sm:$0xe]  ;;  %v446_v21 = vld [vmem:[#allocation2 + $0x90] sm:$0x1] }
 0x1ee   : > { %v6967_v50 = vcombine.low %v1997_v16, %v2007_v12  ;;  %v2309_v17 = vor.u32 %v2308_v11, %v2304_v32  ;;  %v2357_v7 = vrot.slane %v9284_v52, 5  ;;  %v6922_v1 = vrot.slane %v2318_v47, 9  ;;  %v2322_v11 = vld [vmem:[#allocation2 + $0x60] sm:$0xe] }
 0x1ef   : > { %v2305_v48 = vsel %vm8848_vm8, %v2300_v62, %v2304_v32  ;;  %v2354_v58 = vsel %vm8865_vm11, %v2352_v31, %v2353_v9  ;;  %v2364_v49 = vrot.slane %v9327_v24, 5  ;;  %v2367_v44 = vrot.slane %v9333_v19, 5  ;;  %v11041_v31 = vld [vmem:[#allocation17_spill] sm:$0xff] }
 0x1f0   : > { %v2310_v39 = vrot.slane %v2309_v17, 4  ;;  %v6992_v41 = vcombine.low %v2351_v29, %v2354_v58  ;;  %v2358_v20 = vsel %vm8865_vm11, %v6921_v46, %v2357_v7  ;;  %v2359_v16 = vrot.slane %v2357_v7, 4  ;;  %v8252_v17 = vld [vmem:[#allocation6] sm:$0xff]  }
 0x1f1   : > { %v2365_v52 = vsel %vm8865_vm11, %v6922_v1, %v2364_v49  ;;  %v2366_v8 = vrot.slane %v2364_v49, 4  ;;  %v6923_v18 = vrot.slane %v2319_v60, 9  ;;  %v2371_v27 = vrot.slane %v9366_v56, 5 }
 0x1f2   : > { %v2315_v32 = vsel %vm8848_vm8, %v2310_v39, %v2314_v2  ;;  %v11040_v24 = vrot.slane %v9304_v59, 5  ;;  %v2374_v3 = vrot.slane %v9372_v34, 5  ;;  %v6924_v15 = vrot.slane %v2320_v42, 9  ;;  %v499_v42 = vld [vmem:[#allocation2 + $0x8c] sm:$0x1]  ;;  %v8253_v39 = vld [vmem:[#allocation6 + $0x48] sm:$0xff]  }
 0x1f3   : > { %3575 = vmatmul.mubr.bf16.gmra.mrb[76].mxu0 %v6967_v50  ;;  %v6991_v37 = vcombine.low %v2305_v48, %v2315_v32  ;;  %v2368_v0 = vsel %vm8865_vm11, %v2366_v8, %v2367_v44  ;;  %v9606_v56 = vsel %vm8865_vm11, %v6923_v18, %v2371_v27  ;;  %v2373_v9 = vrot.slane %v2371_v27, 4  ;;  %v502_v44 = vld [vmem:[#allocation2 + $0x98] sm:$0x1]  ;;  %v2323_v32 = vld [vmem:[#allocation2 + $0x6c] sm:$0xe] }
 0x1f4   : > { %v2361_v19 = vsel %vm8865_vm11, %v2359_v16, %v11040_v24  ;;  %7977 = vmatprep.mubr.bf16.mxu0 %v6992_v41  ;;  %v6994_v59 = vcombine.low %v2365_v52, %v2368_v0  ;;  %v2378_v47 = vrot.slane %v9441_v61, 5  ;;  %v2381_v34 = vrot.slane %v9452_v14, 5  ;;  %v11042_v52 = vld [vmem:[#allocation18_spill] sm:$0xff] }
 0x1f5   : > { %v6993_v35 = vcombine.low %v2358_v20, %v2361_v19  ;;  %3671 = vmatprep.mubr.bf16.mxu1 %v6991_v37  ;;  %v6925_v2 = vrot.slane %v2321_v30, 9  ;;  %v2385_v46 = vrot.slane %v9475_v5, 5  ;;  %v2388_v12 = vrot.slane %v9490_v33, 5  ;;  %v443_v5 = vld [vmem:[#allocation2 + $0x84] sm:$0x1] }
 0x1f6   : > { %v447_v62 = vsel %vm8782_vm3, 0, %v446_v21  ;;  %3672 = vmatmul.mubr.bf16.gmra.mrb[76].mxu1 %v6983_v43  ;;  %v9616_v29 = vsel %vm8865_vm11, %v2373_v9, %v2374_v3  ;;  %v9620_v61 = vsel %vm8865_vm11, %v6924_v15, %v2378_v47  ;;  %v2380_v14 = vrot.slane %v2378_v47, 4  ;;  %v11043_v3 = vld [vmem:[#allocation19_spill] sm:$0xff]  ;;  %v8254_v21 = vld [vmem:[#allocation6 + $0x8] sm:$0xff]   ;;  %v8255_v47 = vld [vmem:[#allocation6 + $0x50] sm:$0xff]  }
 0x1f7   : > { %448 = vst [vmem:[#allocation2 + $0x90] sm:$0x1] %v447_v62  ;;  %v1169_v50 = vmul.f32 %v9392_v53, %v11041_v31  ;;  %v6995_v33 = vcombine.low %v9606_v56, %v9616_v29  ;;  %v9628_v43 = vsel %vm8865_vm11, %v6925_v2, %v2385_v46  ;;  %v2387_v7 = vrot.slane %v2385_v46, 4  ;;  %v9668_v46 = vld [vmem:[#allocation2 + $0x60] sm:$0xf] }
 0x1f8   : > { %v6926_v1 = vrot.slane %v2322_v11, 9  ;;  %v9632_v60 = vsel %vm8865_vm11, %v2380_v14, %v2381_v34  ;;  %v2392_v58 = vrot.slane %v9513_v36, 5  ;;  %v2395_v49 = vrot.slane %v9521_v45, 5 }
 0x1f9   : > { %v1185_v48 = vadd.f32 %v9403_v51, %v1169_v50  ;;  %v6996_v41 = vcombine.low %v9620_v61, %v9632_v60  ;;  %v9641_v20 = vsel %vm8865_vm11, %v2387_v7, %v2388_v12  ;;  %v444_v16 = vsel %vm8782_vm3, 0, %v443_v5  ;;  %v8256_v7 = vld [vmem:[#allocation6 + $0x10] sm:$0xff]  }
 0x1fa   : > { %v1167_v8 = vmul.f32 %v9392_v53, %v11042_v52  ;;  %v6997_v36 = vcombine.low %v9628_v43, %v9641_v20  ;;  %v9651_v18 = vsel %vm8865_vm11, %v6926_v1, %v2392_v58  ;;  %v2394_v27 = vrot.slane %v2392_v58, 4  ;;  %445 = vst [vmem:[#allocation2 + $0x84] sm:$0x1] %v444_v16  ;;  %v8257_v58 = vld [vmem:[#allocation6 + $0x58] sm:$0xff]   ;;  %v8262_v43 = vld [vmem:[#allocation6 + $0x28] sm:$0xff]  }
 0x1fb   : > { %v1201_v45 = vmax.f32 %v1185_v48, 0.0  ;;  %7978 = vmatmul.mubr.bf16.vlgmr.msra.gmra.mrb[80].mxu0 %v6993_v35  ;;  %v503_v19 = vsel %vm8818_vm5, 0, %v502_v44  ;;  %v1170_v15 = vmul.f32 %v9392_v53, %v11043_v3  ;;  %v500_v30 = vsel %vm8818_vm5, 0, %v499_v42  ;;  %v11044_v35 = vld [vmem:[#allocation20_spill] sm:$0xff]  ;;  %v4134_v3 = vld [vmem:[#allocation2 + $0x68] sm:$0x1] }
 0x1fc   : > { %v1183_v24 = vadd.f32 %v9403_v51, %v1167_v8  ;;  %7981 = vmatprep.mubr.bf16.mxu0 %v6994_v59  ;;  %7638 = vmatpush3.bf16.msra.mxu0 %v8252_v17  ;;  %v9662_v0 = vsel %vm8865_vm11, %v2394_v27, %v2395_v49  ;;  %504 = vst [vmem:[#allocation2 + $0x98] sm:$0x1] %v503_v19  ;;  %501 = vst [vmem:[#allocation2 + $0x8c] sm:$0x1] %v500_v30  ;;  %v6927_v2 = vrot.slane %v2323_v32, 9  ;;  %v8258_v30 = vld [vmem:[#allocation6 + $0x18] sm:$0xff]  }
 0x1fd   : > { %v7320_v37 = vpack.c.bf16 %v1201_v45, %v1201_v45  ;;  %v1168_v9 = vmul.f32 %v9392_v53, %v11044_v35  ;;  %7639 = vmatprep.subr.bf16.mxu0 %v8253_v39  ;;  %v1186_v11 = vadd.f32 %v9403_v51, %v1170_v15  ;;  %v2399_v59 = vrot.slane %v9555_v28, 5  ;;  %v9684_v27 = vld [vmem:[#allocation2 + $0x64] sm:$0xf] }
 0x1fe   : > { %v1199_v34 = vmax.f32 %v1183_v24, 0.0  ;;  %v2402_v14 = vrot.slane %v9565_v6, 5  ;;  %v6998_v31 = vcombine.low %v9651_v18, %v9662_v0  ;;  %v4143_v28 = vshrl.u32 %v9668_v46, 16  ;;  %v1444_v49 = vld [vmem:[#allocation2 + $0x90] sm:$0xf] }
 0x1ff   : > { %v1312_v12 = vshrl.u32 %v7320_v37, 16  ;;  %v1315_v62 = vshll.u32 %v7320_v37, 16  ;;  %v1184_v61 = vadd.f32 %v9403_v51, %v1168_v9  ;;  %v1202_v5 = vmax.f32 %v1186_v11, 0.0  ;;  %v508_v0 = vld [vmem:[#allocation2 + $0xb0] sm:$0x1] }
 0x200   : > { %v7318_v50 = vpack.c.bf16 %v1199_v34, %v1199_v34  ;;  %v2401_v17 = vrot.slane %v2399_v59, 4  ;;  %7640 = vmatpush3.bf16.msra.mxu0 %v8254_v21  ;;  %v4146_v48 = vshll.u32 %v9668_v46, 16  ;;  %v9678_v39 = vsel %vm8865_vm11, %v6927_v2, %v2399_v59  ;;  %v8259_v34 = vld [vmem:[#allocation6 + $0x60] sm:$0xff]  }
 0x201   : > { %v1314_v1 = vrot.slane %v1312_v12, 7  ;;  %v1200_v60 = vmax.f32 %v1184_v61, 0.0  ;;  %7641 = vmatprep.subr.bf16.mxu0 %v8255_v47  ;;  %v7321_v6 = vpack.c.bf16 %v1202_v5, %v1202_v5  ;;  %v4145_v15 = vrot.slane %v4143_v28, 4  ;;  %v1437_v37 = vld [vmem:[#allocation2 + $0x84] sm:$0xf] }
 0x202   : > { %v1295_v44 = vshrl.u32 %v7318_v50, 16  ;;  %v1298_v42 = vshll.u32 %v7318_v50, 16  ;;  %v9682_v45 = vsel %vm8865_vm11, %v2401_v17, %v2402_v14  ;;  %v4148_v47 = vrot.slane %v4146_v48, 5 }
 0x203   : > { %v1317_v16 = vor.u32 %v1315_v62, %v1314_v1  ;;  %v1318_v52 = vrot.slane %v1314_v1, 4  ;;  %v7319_v8 = vpack.c.bf16 %v1200_v60, %v1200_v60  ;;  %7982 = vmatmul.mubr.bf16.gmra.mrb[84].mxu0 %v6995_v33  ;;  %v1320_v24 = vshrl.u32 %v7321_v6, 16  ;;  %v1448_v2 = vld [vmem:[#allocation2 + $0x98] sm:$0x1]  ;;  %v1441_v5 = vld [vmem:[#allocation2 + $0x8c] sm:$0x1] }
 0x204   : > { %v1297_v32 = vrot.slane %v1295_v44, 7  ;;  %v1323_v19 = vshll.u32 %v7321_v6, 16  ;;  %7985 = vmatprep.mubr.bf16.mxu0 %v6996_v41  ;;  %7642 = vmatpush3.bf16.msra.mxu0 %v8256_v7  ;;  %v4152_v11 = vshll.u32 %v9684_v27, 16  ;;  %v4149_v41 = vor.u32 %v4148_v47, %v4145_v15  ;;  %v452_v7 = vld [vmem:[#allocation2 + $0xa8] sm:$0x1]  ;;  %v8260_v1 = vld [vmem:[#allocation6 + $0x20] sm:$0xff]  }
 0x205   : > { %v1445_v21 = vsel %vm8912_vm14, %v1317_v16, %v1444_v49  ;;  %v1303_v35 = vshrl.u32 %v7319_v8, 16  ;;  %v1306_v9 = vshll.u32 %v7319_v8, 16  ;;  %7643 = vmatprep.subr.bf16.mxu0 %v8257_v58  ;;  %v1322_v33 = vrot.slane %v1320_v24, 7  ;;  %v9695_v49 = vld [vmem:[#allocation2 + $0x6c] sm:$0xf]  ;;  %v8261_v6 = vld [vmem:[#allocation6 + $0x68] sm:$0xff]  }
 0x206   : > { %1446 = vst [vmem:[#allocation2 + $0x90] sm:$0xf] %v1445_v21  ;;  %v1300_v56 = vor.u32 %v1298_v42, %v1297_v32  ;;  %v1301_v29 = vrot.slane %v1297_v32, 4  ;;  %v4156_v12 = vshrl.u32 %v9684_v27, 16  ;;  %v4162_v62 = vshll.u32 %v4134_v3, 16  ;;  %v8263_v47 = vld [vmem:[#allocation6 + $0x70] sm:$0xff]  }
 0x207   : > { %v1305_v59 = vrot.slane %v1303_v35, 7  ;;  %v1325_v14 = vor.u32 %v1323_v19, %v1322_v33  ;;  %v1327_v50 = vrot.slane %v1322_v33, 4  ;;  %v4154_v17 = vrot.slane %v4152_v11, 5  ;;  %v9703_v32 = vld [vmem:[#allocation2 + $0x70] sm:$0xf] }
 0x208   : > { %v1438_v61 = vsel %vm8912_vm14, %v1300_v56, %v1437_v37  ;;  %7644 = vmatpush3.bf16.msra.mxu0 %v8258_v30  ;;  %v4150_v48 = vrot.slane %v4149_v41, 4  ;;  %v4158_v58 = vrot.slane %v4156_v12, 4  ;;  %v6999_v16 = vcombine.low %v9678_v39, %v9682_v45  ;;  %v4135_v15 = vld [vmem:[#allocation2 + $0x74] sm:$0x1]  ;;  %v449_v30 = vld [vmem:[#allocation2 + $0x9c] sm:$0x1] }
 0x209   : > { %1439 = vst [vmem:[#allocation2 + $0x84] sm:$0xf] %v1438_v61  ;;  %v1308_v60 = vor.u32 %v1306_v9, %v1305_v59  ;;  %v1310_v28 = vrot.slane %v1305_v59, 4  ;;  %7645 = vmatprep.subr.bf16.mxu0 %v8259_v34  ;;  %v1326_v44 = vsel %vm8921_vm15, %v1318_v52, %v1325_v14  ;;  %v1449_v42 = vsel %vm8782_vm3, %v1327_v50, %v1448_v2  ;;  %v505_v2 = vld [vmem:[#allocation2 + $0xa4] sm:$0x1]  ;;  %v8264_v61 = vld [vmem:[#allocation6 + $0x30] sm:$0xff]  }
 0x20a   : > { %v4164_v8 = vrot.slane %v4162_v62, 5  ;;  %1447 = vst [vmem:[#allocation2 + $0x94] sm:$0xf] %v1326_v44  ;;  %1450 = vst [vmem:[#allocation2 + $0x98] sm:$0x1] %v1449_v42  ;;  %v4155_v52 = vsel %vm8848_vm8, %v4150_v48, %v4154_v17  ;;  %v4159_v3 = vor.u32 %v4158_v58, %v4154_v17  ;;  %v7108_v39 = vcombine.low %v9668_v46, %v9684_v27 }
 0x20b   : > { %v1309_v24 = vsel %vm8921_vm15, %v1301_v29, %v1308_v60  ;;  %v1442_v19 = vsel %vm8782_vm3, %v1310_v28, %v1441_v5  ;;  %7986 = vmatmul.mubr.bf16.gmra.mrb[88].mxu0 %v6997_v36  ;;  %v453_v45 = vsel %vm8782_vm3, 0, %v452_v7  ;;  %v1173_v21 = vmul.f32 %v9392_v53, %v9275_v40  ;;  %v8265_v7 = vld [vmem:[#allocation6 + $0x78] sm:$0xff]   ;;  %v9743_v58 = vld [vmem:[#allocation2 + $0x78] sm:$0xf] }
 0x20c   : > { %1440 = vst [vmem:[#allocation2 + $0x88] sm:$0xf] %v1309_v24  ;;  %1443 = vst [vmem:[#allocation2 + $0x8c] sm:$0x1] %v1442_v19  ;;  %v4167_v37 = vshrl.u32 %v9695_v49, 16  ;;  %7989 = vmatprep.mubr.bf16.mxu0 %v6998_v31  ;;  %7646 = vmatpush3.bf16.msra.mxu0 %v8260_v1  ;;  %v4160_v20 = vrot.slane %v4159_v3, 4  ;;  %v1171_v62 = vmul.f32 %v9392_v53, %v9281_v22 }
 0x20d   : > { %454 = vst [vmem:[#allocation2 + $0xa8] sm:$0x1] %v453_v45  ;;  %v4170_v36 = vshll.u32 %v9695_v49, 16  ;;  %v4176_v35 = vshll.u32 %v9703_v32, 16  ;;  %v4180_v9 = vshrl.u32 %v9703_v32, 16  ;;  %7647 = vmatprep.subr.bf16.mxu0 %v8261_v6  ;;  %v1189_v40 = vadd.f32 %v9403_v51, %v1173_v21  ;;  %v11045_v22 = vld [vmem:[#allocation23_spill] sm:$0xff] }
 0x20e   : > { %v4169_v34 = vrot.slane %v4167_v37, 4  ;;  %v4186_v56 = vshll.u32 %v4135_v15, 16  ;;  %v450_v18 = vsel %vm8782_vm3, 0, %v449_v30  ;;  %v4165_v31 = vsel %vm8848_vm8, %v4160_v20, %v4164_v8  ;;  %v9749_v3 = vld [vmem:[#allocation2 + $0x7c] sm:$0xf] }
 0x20f   : > { %v4172_v29 = vrot.slane %v4170_v36, 5  ;;  %v4178_v33 = vrot.slane %v4176_v35, 5  ;;  %v4182_v11 = vrot.slane %v4180_v9, 4  ;;  %451 = vst [vmem:[#allocation2 + $0x9c] sm:$0x1] %v450_v18  ;;  %v7116_v59 = vcombine.low %v4155_v52, %v4165_v31 }
 0x210   : > { %v1205_v41 = vmax.f32 %v1189_v40, 0.0  ;;  %v4188_v12 = vrot.slane %v4186_v56, 5  ;;  %7648 = vmatpush3.bf16.msra.mxu0 %v8262_v43  ;;  %v509_v5 = vsel %vm8818_vm5, 0, %v508_v0  ;;  %v1174_v17 = vmul.f32 %v9392_v53, %v9292_v55 }
 0x211   : > { %v4173_v14 = vor.u32 %v4172_v29, %v4169_v34  ;;  %v4183_v50 = vor.u32 %v4182_v11, %v4178_v33  ;;  %7649 = vmatprep.subr.bf16.mxu0 %v8263_v47  ;;  %v1187_v60 = vadd.f32 %v9403_v51, %v1171_v62  ;;  %510 = vst [vmem:[#allocation2 + $0xb0] sm:$0x1] %v509_v5  ;;  %v506_v28 = vsel %vm8818_vm5, 0, %v505_v2  ;;  %v4136_v11 = vld [vmem:[#allocation2 + $0x80] sm:$0x1] }
 0x212   : > { %v7324_v1 = vpack.c.bf16 %v1205_v41, %v1205_v41  ;;  %v1172_v48 = vmul.f32 %v9392_v53, %v11045_v22  ;;  %v1190_v6 = vadd.f32 %v9403_v51, %v1174_v17  ;;  %507 = vst [vmem:[#allocation2 + $0xa4] sm:$0x1] %v506_v28  ;;  %v7109_v55 = vcombine.low %v9695_v49, %v9703_v32  ;;  %v8266_v53 = vld [vmem:[#allocation6 + $0x38] sm:$0xff]  }
 0x213   : > { %v4174_v44 = vrot.slane %v4173_v14, 4  ;;  %v4184_v42 = vrot.slane %v4183_v50, 4  ;;  %7990 = vmatmul.mubr.bf16.gmra.mrb[92].mxu0 %v6999_v16  ;;  %v1203_v19 = vmax.f32 %v1187_v60, 0.0  ;;  %v4191_v21 = vshrl.u32 %v9743_v58, 16  ;;  %v8274_v14 = vld [vmem:[#allocation6 + $0x148] sm:$0xff]  }
 0x214   : > { %v1346_v8 = vshrl.u32 %v7324_v1, 16  ;;  %v1349_v24 = vshll.u32 %v7324_v1, 16  ;;  %v1188_v52 = vadd.f32 %v9403_v51, %v1172_v48  ;;  %7650 = vmatpush3.bf16.msra.mxu0 %v8264_v61  ;;  %5954 = vmatprep.mubr.bf16.mxu0 %v7116_v59  ;;  %v1206_v45 = vmax.f32 %v1190_v6, 0.0  ;;  %v8272_v51 = vld [vmem:[#allocation6 + $0x140] sm:$0xff]   ;;  %v1458_v36 = vld [vmem:[#allocation2 + $0xa8] sm:$0xf] }
 0x215   : > { %v4179_v15 = vsel %vm8848_vm8, %v4174_v44, %v4178_v33  ;;  %v4189_v30 = vsel %vm8848_vm8, %v4184_v42, %v4188_v12  ;;  %7651 = vmatprep.subr.bf16.mxu0 %v8265_v7  ;;  %v7322_v43 = vpack.c.bf16 %v1203_v19, %v1203_v19  ;;  %v4193_v9 = vrot.slane %v4191_v21, 4  ;;  %v8273_v59 = vld [vmem:[#allocation6 + $0x100] sm:$0xff]   ;;  %v458_v60 = vld [vmem:[#allocation2 + $0xc0] sm:$0x1] }
 0x216   : > { %v1348_v16 = vrot.slane %v1346_v8, 7  ;;  %v7117_v37 = vcombine.low %v4179_v15, %v4189_v30  ;;  %v1204_v20 = vmax.f32 %v1188_v52, 0.0  ;;  %v7325_v35 = vpack.c.bf16 %v1206_v45, %v1206_v45  ;;  %v1451_v50 = vld [vmem:[#allocation2 + $0x9c] sm:$0xf]  ;;  %v455_v52 = vld [vmem:[#allocation2 + $0xb4] sm:$0x1] }
 0x217   : > { %v4194_v47 = vshll.u32 %v9743_v58, 16  ;;  %v4200_v40 = vshll.u32 %v9749_v3, 16  ;;  %v1329_v18 = vshrl.u32 %v7322_v43, 16  ;;  %v1332_v0 = vshll.u32 %v7322_v43, 16  ;;  %v8277_v45 = vld [vmem:[#allocation6 + $0x150] sm:$0xff]   ;;  %v8299_v21 = vld [vmem:[%s10978_s7] sm:$0xff]  }
 0x218   : > { %v1351_v34 = vor.u32 %v1349_v24, %v1348_v16  ;;  %v1352_v56 = vrot.slane %v1348_v16, 4  ;;  %7652 = vmatpush3.bf16.msra.mxu0 %v8266_v53  ;;  %v1354_v31 = vshrl.u32 %v7325_v35, 16  ;;  %v1357_v29 = vshll.u32 %v7325_v35, 16  ;;  %v1462_v48 = vld [vmem:[#allocation2 + $0xb0] sm:$0x1]  ;;  %v8275_v53 = vld [vmem:[#allocation6 + $0x108] sm:$0xff]   ;;  %7993 = vmatprep.subr.bf16.mxu1 %v8299_v21 }
 0x219   : > { %v7323_v33 = vpack.c.bf16 %v1204_v20, %v1204_v20  ;;  %v4196_v2 = vrot.slane %v4194_v47, 5  ;;  %v1331_v12 = vrot.slane %v1329_v18, 7  ;;  %v9760_v62 = vrot.slane %v4200_v40, 5  ;;  %7765 = vmatprep.subr.bf16.mxu0 %v8272_v51  ;;  %v1455_v30 = vld [vmem:[#allocation2 + $0xa4] sm:$0x1]  ;;  %7994 = vmatpush3.bf16.msra.mxu1 %v8299_v21 }
 0x21a   : > { %v1459_v41 = vsel %vm8912_vm14, %v1351_v34, %v1458_v36  ;;  %v4204_v61 = vshrl.u32 %v9749_v3, 16  ;;  %v1356_v5 = vrot.slane %v1354_v31, 7  ;;  %v4210_v42 = vshll.u32 %v4136_v11, 16  ;;  %v514_v51 = vld [vmem:[#allocation2 + $0xc8] sm:$0x1]  ;;  %v11046_v40 = vld [vmem:[#allocation24_spill] sm:$0xff] }
 0x21b   : > { %1460 = vst [vmem:[#allocation2 + $0xa8] sm:$0xf] %v1459_v41  ;;  %v1337_v17 = vshrl.u32 %v7323_v33, 16  ;;  %v1340_v7 = vshll.u32 %v7323_v33, 16  ;;  %v4197_v1 = vor.u32 %v4196_v2, %v4193_v9  ;;  %5955 = vmatmul.mubr.bf16.vlgmr.msra.gmra.mrb[96].mxu0 %v7108_v39  ;;  %v1334_v28 = vor.u32 %v1332_v0, %v1331_v12  ;;  %v8366_v47 = vld [vmem:[%s10973_s2] ss:$0 sm:$0xff] }
 0x21c   : > { %v1335_v22 = vrot.slane %v1331_v12, 4  ;;  %v4206_v44 = vrot.slane %v4204_v61, 4  ;;  %5962 = vmatprep.mubr.bf16.mxu0 %v7117_v37  ;;  %v1359_v6 = vor.u32 %v1357_v29, %v1356_v5  ;;  %v1361_v8 = vrot.slane %v1356_v5, 4  ;;  %7766 = vmatpush3.bf16.msra.mxu0 %v8273_v59  ;;  %v11047_v29 = vld [vmem:[#allocation25_spill] sm:$0xff]  ;;  %v9794_v11 = vld [vmem:[#allocation2 + $0x84] sm:$0xf] }
 0x21d   : > { %v1339_v24 = vrot.slane %v1337_v17, 7  ;;  %v4198_v19 = vrot.slane %v4197_v1, 4  ;;  %v1452_v15 = vsel %vm8912_vm14, %v1334_v28, %v1451_v50  ;;  %v4212_v27 = vrot.slane %v4210_v42, 5  ;;  %7767 = vmatprep.subr.bf16.mxu0 %v8274_v14  ;;  %v8278_v2 = vld [vmem:[#allocation6 + $0x110] sm:$0xff]   ;;  %v8367_v41 = vld [vmem:[%s10974_s3] ss:$0 sm:$0xff] }
 0x21e   : > { %v4207_v46 = vor.u32 %v4206_v44, %v9760_v62  ;;  %v7110_v39 = vcombine.low %v9743_v58, %v9749_v3  ;;  %1453 = vst [vmem:[#allocation2 + $0x9c] sm:$0xf] %v1452_v15  ;;  %v1360_v16 = vsel %vm8921_vm15, %v1352_v56, %v1359_v6  ;;  %v1463_v37 = vsel %vm8782_vm3, %v1361_v8, %v1462_v48  ;;  %v511_v56 = vld [vmem:[#allocation2 + $0xbc] sm:$0x1]  ;;  %v11048_v61 = vld [vmem:[#allocation26_spill] sm:$0xff] }
 0x21f   : > { %v1342_v43 = vor.u32 %v1340_v7, %v1339_v24  ;;  %v1344_v20 = vrot.slane %v1339_v24, 4  ;;  %1461 = vst [vmem:[#allocation2 + $0xac] sm:$0xf] %v1360_v16  ;;  %1464 = vst [vmem:[#allocation2 + $0xb0] sm:$0x1] %v1463_v37  ;;  %v4203_v36 = vsel %vm8848_vm8, %v4198_v19, %v9760_v62  ;;  %v459_v9 = vsel %vm8782_vm3, 0, %v458_v60 }
 0x220   : > { %v4208_v35 = vrot.slane %v4207_v46, 4  ;;  %v1177_v34 = vmul.f32 %v8366_v47, %v11046_v40  ;;  %460 = vst [vmem:[#allocation2 + $0xc0] sm:$0x1] %v459_v9  ;;  %v456_v31 = vsel %vm8782_vm3, 0, %v455_v52  ;;  %v1175_v33 = vmul.f32 %v8366_v47, %v11047_v29  ;;  %7768 = vmatpush3.bf16.msra.mxu0 %v8275_v53  ;;  %v9804_v50 = vld [vmem:[#allocation2 + $0x88] sm:$0xf] }
 0x221   : > { %v1343_v18 = vsel %vm8921_vm15, %v1335_v22, %v1342_v43  ;;  %v1456_v0 = vsel %vm8782_vm3, %v1344_v20, %v1455_v30  ;;  %457 = vst [vmem:[#allocation2 + $0xb4] sm:$0x1] %v456_v31  ;;  %v515_v62 = vsel %vm8818_vm5, 0, %v514_v51  ;;  %v1178_v14 = vmul.f32 %v8366_v47, %v11048_v61  ;;  %7769 = vmatprep.subr.bf16.mxu0 %v8277_v45  ;;  %v8279_v5 = vld [vmem:[#allocation6 + $0x158] sm:$0xff]   ;;  %v11049_v60 = vld [vmem:[#allocation27_spill] sm:$0xff]  ;;  %v8300_v30 = vld [vmem:[%s10978_s7 + $0x8] sm:$0xff]  }
 0x222   : > { %1454 = vst [vmem:[#allocation2 + $0xa0] sm:$0xf] %v1343_v18  ;;  %1457 = vst [vmem:[#allocation2 + $0xa4] sm:$0x1] %v1456_v0  ;;  %v4213_v59 = vsel %vm8848_vm8, %v4208_v35, %v4212_v27  ;;  %v1193_v12 = vadd.f32 %v8367_v41, %v1177_v34  ;;  %v1191_v7 = vadd.f32 %v8367_v41, %v1175_v33  ;;  %v512_v1 = vsel %vm8818_vm5, 0, %v511_v56  ;;  %v8280_v52 = vld [vmem:[#allocation6 + $0x118] sm:$0xff]  }
 0x223   : > { %v7118_v17 = vcombine.low %v4203_v36, %v4213_v59  ;;  %516 = vst [vmem:[#allocation2 + $0xc8] sm:$0x1] %v515_v62  ;;  %v1176_v28 = vmul.f32 %v8366_v47, %v11049_v60  ;;  %5963 = vmatmul.mubr.bf16.gmra.mrb[100].mxu0 %v7109_v55  ;;  %v1194_v48 = vadd.f32 %v8367_v41, %v1178_v14  ;;  %513 = vst [vmem:[#allocation2 + $0xbc] sm:$0x1] %v512_v1  ;;  %v8282_v55 = vld [vmem:[#allocation6 + $0x160] sm:$0xff]   ;;  %v8284_v40 = vld [vmem:[#allocation6 + $0x168] sm:$0xff]  }
 0x224   : > { %v1209_v22 = vmax.f32 %v1193_v12, 0.0  ;;  %v4215_v44 = vshrl.u32 %v9794_v11, 16  ;;  %v4218_v42 = vshll.u32 %v9794_v11, 16  ;;  %v1207_v6 = vmax.f32 %v1191_v7, 0.0  ;;  %7770 = vmatpush3.bf16.msra.mxu0 %v8278_v2  ;;  %7995 = vmatprep.subr.bf16.mxu1 %v8300_v30  ;;  %v8283_v47 = vld [vmem:[#allocation6 + $0x120] sm:$0xff]   ;;  %v8285_v62 = vld [vmem:[#allocation6 + $0x128] sm:$0xff]  }
 0x225   : > { %5970 = vmatprep.mubr.bf16.mxu0 %v7118_v17  ;;  %v1192_v8 = vadd.f32 %v8367_v41, %v1176_v28  ;;  %v4224_v24 = vshll.u32 %v9804_v50, 16  ;;  %v4228_v19 = vshrl.u32 %v9804_v50, 16  ;;  %v1210_v15 = vmax.f32 %v1194_v48, 0.0  ;;  %7771 = vmatprep.subr.bf16.mxu0 %v8279_v5  ;;  %v4137_v0 = vld [vmem:[#allocation2 + $0x8c] sm:$0x1] }
 0x226   : > { %v7328_v53 = vpack.c.bf16 %v1209_v22, %v1209_v22  ;;  %v4217_v49 = vrot.slane %v4215_v44, 4  ;;  %v4220_v32 = vrot.slane %v4218_v42, 5  ;;  %v7326_v46 = vpack.c.bf16 %v1207_v6, %v1207_v6  ;;  %7996 = vmatpush3.bf16.msra.mxu1 %v8300_v30  ;;  %v9822_v12 = vld [vmem:[#allocation2 + $0x90] sm:$0xf]  ;;  %v8287_v60 = vld [vmem:[#allocation6 + $0x170] sm:$0xff]  }
 0x227   : > { %v1208_v27 = vmax.f32 %v1192_v8, 0.0  ;;  %v9819_v45 = vrot.slane %v4224_v24, 5  ;;  %v4230_v21 = vrot.slane %v4228_v19, 4  ;;  %v7329_v43 = vpack.c.bf16 %v1210_v15, %v1210_v15  ;;  %v1472_v29 = vld [vmem:[#allocation2 + $0xc0] sm:$0xf]  ;;  %v8301_v30 = vld [vmem:[%s10978_s7 + $0x10] sm:$0xff]  }
 0x228   : > { %v1380_v16 = vshrl.u32 %v7328_v53, 16  ;;  %v1383_v37 = vshll.u32 %v7328_v53, 16  ;;  %v4221_v20 = vor.u32 %v4220_v32, %v4217_v49  ;;  %v1363_v51 = vshrl.u32 %v7326_v46, 16  ;;  %7772 = vmatpush3.bf16.msra.mxu0 %v8280_v52  ;;  %v1465_v5 = vld [vmem:[#allocation2 + $0xb4] sm:$0xf]  ;;  %7997 = vmatprep.subr.bf16.mxu1 %v8301_v30 }
 0x229   : > { %v1366_v36 = vshll.u32 %v7326_v46, 16  ;;  %v7327_v35 = vpack.c.bf16 %v1208_v27, %v1208_v27  ;;  %v4231_v9 = vor.u32 %v4230_v21, %v9819_v45  ;;  %v1388_v56 = vshrl.u32 %v7329_v43, 16  ;;  %7773 = vmatprep.subr.bf16.mxu0 %v8282_v55  ;;  %v9838_v19 = vld [vmem:[#allocation2 + $0x94] sm:$0xf]  ;;  %v4138_v46 = vld [vmem:[#allocation2 + $0x98] sm:$0x1] }
 0x22a   : > { %v1382_v34 = vrot.slane %v1380_v16, 7  ;;  %v1391_v18 = vshll.u32 %v7329_v43, 16  ;;  %v4222_v31 = vrot.slane %v4221_v20, 4  ;;  %v1365_v33 = vrot.slane %v1363_v51, 7  ;;  %v1476_v48 = vld [vmem:[#allocation2 + $0xc8] sm:$0x1]  ;;  %7998 = vmatpush3.bf16.msra.mxu1 %v8301_v30 }
 0x22b   : > { %v1371_v2 = vshrl.u32 %v7327_v35, 16  ;;  %v1374_v59 = vshll.u32 %v7327_v35, 16  ;;  %v4232_v41 = vrot.slane %v4231_v9, 4  ;;  %5971 = vmatmul.mubr.bf16.gmra.mrb[104].mxu0 %v7110_v39  ;;  %v1390_v17 = vrot.slane %v1388_v56, 7  ;;  %v9830_v1 = vpop.f32.mrb[16].mxu1 }
 0x22c   : > { %v1385_v61 = vor.u32 %v1383_v37, %v1382_v34  ;;  %v1386_v14 = vrot.slane %v1382_v34, 4  ;;  %v4227_v7 = vsel %vm8848_vm8, %v4222_v31, %v9819_v45  ;;  %v1368_v28 = vor.u32 %v1366_v36, %v1365_v33  ;;  %7774 = vmatpush3.bf16.msra.mxu0 %v8283_v47  ;;  %v9832_v6 = vpop.f32.mrb[17].mxu1  ;;  %v1469_v8 = vld [vmem:[#allocation2 + $0xbc] sm:$0x1]  ;;  %v9864_v20 = vld [vmem:[#allocation2 + $0xa0] sm:$0xf] }
 0x22d   : > { %v1369_v22 = vrot.slane %v1365_v33, 4  ;;  %v1373_v44 = vrot.slane %v1371_v2, 7  ;;  %v4234_v42 = vshll.u32 %v4137_v0, 16  ;;  %v1393_v3 = vor.u32 %v1391_v18, %v1390_v17  ;;  %v9840_v52 = vpop.f32.mrb[18].mxu1  ;;  %7775 = vmatprep.subr.bf16.mxu0 %v8284_v40  ;;  %v9855_v45 = vld [vmem:[#allocation2 + $0x9c] sm:$0xf] }
 0x22e   : > { %v1473_v58 = vsel %vm8912_vm14, %v1385_v61, %v1472_v29  ;;  %v1395_v39 = vrot.slane %v1390_v17, 4  ;;  %v7111_v24 = vcombine.low %v9794_v11, %v9804_v50  ;;  %v1466_v53 = vsel %vm8912_vm14, %v1368_v28, %v1465_v5  ;;  %v9844_v55 = vpop.f32.mrb[19].mxu1  ;;  %v4139_v9 = vld [vmem:[#allocation2 + $0xa4] sm:$0x1]  ;;  %v8288_v47 = vld [vmem:[#allocation6 + $0x130] sm:$0xff]   ;;  %v8289_v18 = vld [vmem:[#allocation6 + $0x178] sm:$0xff]  }
 0x22f   : > { %1474 = vst [vmem:[#allocation2 + $0xc0] sm:$0xf] %v1473_v58  ;;  %v1376_v15 = vor.u32 %v1374_v59, %v1373_v44  ;;  %v1378_v49 = vrot.slane %v1373_v44, 4  ;;  %v4236_v32 = vrot.slane %v4234_v42, 5  ;;  %1467 = vst [vmem:[#allocation2 + $0xb4] sm:$0xf] %v1466_v53  ;;  %v1394_v11 = vsel %vm8921_vm15, %v1386_v14, %v1393_v3 }
 0x230   : > { %v1477_v50 = vsel %vm8782_vm3, %v1395_v39, %v1476_v48  ;;  %v4239_v23 = vshrl.u32 %v9822_v12, 16  ;;  %v4242_v27 = vshll.u32 %v9822_v12, 16  ;;  %1475 = vst [vmem:[#allocation2 + $0xc4] sm:$0xf] %v1394_v11  ;;  %v4248_v43 = vshll.u32 %v9838_v19, 16  ;;  %7776 = vmatpush3.bf16.msra.mxu0 %v8285_v62  ;;  %v8302_v0 = vld [vmem:[%s10978_s7 + $0x18] sm:$0xff]  }
 0x231   : > { %1478 = vst [vmem:[#allocation2 + $0xc8] sm:$0x1] %v1477_v50  ;;  %v1377_v21 = vsel %vm8921_vm15, %v1369_v22, %v1376_v15  ;;  %v1470_v16 = vsel %vm8782_vm3, %v1378_v49, %v1469_v8  ;;  %v4237_v37 = vsel %vm8848_vm8, %v4232_v41, %v4236_v32  ;;  %v4252_v38 = vshrl.u32 %v9838_v19, 16  ;;  %7777 = vmatprep.subr.bf16.mxu0 %v8287_v60  ;;  %v9873_v59 = vld [vmem:[#allocation2 + $0xa8] sm:$0xf]  ;;  %v8290_v5 = vld [vmem:[#allocation6 + $0x138] sm:$0xff]  }
 0x232   : > { %1468 = vst [vmem:[#allocation2 + $0xb8] sm:$0xf] %v1377_v21  ;;  %1471 = vst [vmem:[#allocation2 + $0xbc] sm:$0x1] %v1470_v16  ;;  %v7119_v51 = vcombine.low %v4227_v7, %v4237_v37  ;;  %v4241_v36 = vrot.slane %v4239_v23, 4  ;;  %v4244_v35 = vrot.slane %v4242_v27, 5  ;;  %7999 = vmatprep.subr.bf16.mxu1 %v8302_v0  ;;  %v7112_v44 = vcombine.low %v9822_v12, %v9838_v19 }
 0x233   : > { %v4250_v40 = vrot.slane %v4248_v43, 5  ;;  %v4258_v34 = vshll.u32 %v4138_v46, 16  ;;  %v4263_v56 = vshrl.u32 %v9855_v45, 16  ;;  %v4254_v29 = vrot.slane %v4252_v38, 4  ;;  %v9876_v22 = vld [vmem:[#allocation2 + $0xac] sm:$0xf]  ;;  %8000 = vmatpush3.bf16.msra.mxu1 %v8302_v0 }
 0x234   : > { %5978 = vmatprep.mubr.bf16.mxu0 %v7119_v51  ;;  %v4245_v31 = vor.u32 %v4244_v35, %v4241_v36  ;;  %v4266_v33 = vshll.u32 %v9855_v45, 16  ;;  %v4272_v2 = vshll.u32 %v9864_v20, 16  ;;  %v4276_v61 = vshrl.u32 %v9864_v20, 16  ;;  %7778 = vmatpush3.bf16.msra.mxu0 %v8288_v47  ;;  %v9878_v48 = vld [vmem:[#allocation6 + $0x200] sm:$0xff]   ;;  %v4140_v3 = vld [vmem:[#allocation2 + $0xb0] sm:$0x1] }
 0x235   : > { %5979 = vmatmul.mubr.bf16.gmra.mrb[108].mxu0 %v7111_v24  ;;  %v4260_v41 = vrot.slane %v4258_v34, 5  ;;  %v4265_v62 = vrot.slane %v4263_v56, 4  ;;  %v4282_v14 = vshll.u32 %v4139_v9, 16  ;;  %v4255_v7 = vor.u32 %v4254_v29, %v4250_v40  ;;  %7779 = vmatprep.subr.bf16.mxu0 %v8289_v18 }
 0x236   : > { %v4246_v17 = vrot.slane %v4245_v31, 4  ;;  %v4268_v60 = vrot.slane %v4266_v33, 5  ;;  %v4274_v28 = vrot.slane %v4272_v2, 5  ;;  %v4278_v42 = vrot.slane %v4276_v61, 4  ;;  %v8303_v2 = vld [vmem:[%s10978_s7 + $0x20] sm:$0xff]  }
 0x237   : > { %v4284_v58 = vrot.slane %v4282_v14, 5  ;;  %v4287_v39 = vshrl.u32 %v9873_v59, 16  ;;  %v9883_v8 = vpop.f32.mrb[20].mxu1  ;;  %v4256_v53 = vrot.slane %v4255_v7, 4  ;;  %v4290_v49 = vshll.u32 %v9873_v59, 16  ;;  %8001 = vmatprep.subr.bf16.mxu1 %v8303_v2 }
 0x238   : > { %v4251_v24 = vsel %vm8848_vm8, %v4246_v17, %v4250_v40  ;;  %v4269_v15 = vor.u32 %v4268_v60, %v4265_v62  ;;  %v9888_v32 = vpop.f32.mrb[21].mxu1  ;;  %v4279_v30 = vor.u32 %v4278_v42, %v4274_v28  ;;  %v4296_v12 = vshll.u32 %v9876_v22, 16  ;;  %7780 = vmatpush3.bf16.msra.mxu0 %v8290_v5  ;;  %v9901_v40 = vld [vmem:[#allocation2 + $0xb4] sm:$0xf]  ;;  %8002 = vmatpush3.bf16.msra.mxu1 %v8303_v2 }
 0x239   : > { %v4289_v11 = vrot.slane %v4287_v39, 4  ;;  %v4300_v19 = vshrl.u32 %v9876_v22, 16  ;;  %v9892_v50 = vpop.f32.mrb[22].mxu1  ;;  %v4261_v46 = vsel %vm8848_vm8, %v4256_v53, %v4260_v41  ;;  %v4292_v27 = vrot.slane %v4290_v49, 5  ;;  %8025 = vmatprep.subr.bf16.mxu0 %v9878_v48  ;;  %v9903_v34 = vld [vmem:[#allocation2 + $0xb8] sm:$0xf] }
 0x23a   : > { %v4270_v23 = vrot.slane %v4269_v15, 4  ;;  %v4306_v21 = vshll.u32 %v4140_v3, 16  ;;  %v9896_v16 = vpop.f32.mrb[23].mxu1  ;;  %v7120_v37 = vcombine.low %v4251_v24, %v4261_v46  ;;  %v4280_v43 = vrot.slane %v4279_v30, 4  ;;  %v7371_v35 = vpop.f32.mrb[20].mxu0 }
 0x23b   : > { %v4298_v51 = vrot.slane %v4296_v12, 5  ;;  %v4302_v36 = vrot.slane %v4300_v19, 4  ;;  %v4293_v9 = vor.u32 %v4292_v27, %v4289_v11  ;;  %v7372_v56 = vpop.f32.mrb[21].mxu0  ;;  %v7367_v31 = vadd.f32 %v9477_v4, %v9445_v25  ;;  %v4141_v25 = vld [vmem:[#allocation2 + $0xbc] sm:$0x1] }
 0x23c   : > { %v4275_v38 = vsel %vm8848_vm8, %v4270_v23, %v4274_v28  ;;  %v4308_v47 = vrot.slane %v4306_v21, 5  ;;  %5986 = vmatprep.mubr.bf16.mxu0 %v7120_v37  ;;  %v4285_v18 = vsel %vm8848_vm8, %v4280_v43, %v4284_v58  ;;  %v7370_v29 = vadd.f32 %v9488_v13, %v9482_v63  ;;  %v7374_v33 = vpop.f32.mrb[22].mxu0  ;;  %v4423_v53 = vld [vmem:[#allocation2 + $0x70] sm:$0xf]  ;;  %v4422_v19 = vld [vmem:[#allocation2 + $0x6c] sm:$0xf] }
 0x23d   : > { %v4303_v0 = vor.u32 %v4302_v36, %v4298_v51  ;;  %5987 = vmatmul.mubr.bf16.gmra.mrb[112].mxu0 %v7112_v44  ;;  %v7121_v41 = vcombine.low %v4275_v38, %v4285_v18  ;;  %v4294_v62 = vrot.slane %v4293_v9, 4  ;;  %v7431_v61 = vadd.f32 %v9832_v6, %v9830_v1  ;;  %v7375_v5 = vpop.f32.mrb[23].mxu0  ;;  %v8304_v23 = vld [vmem:[%s10978_s7 + $0x28] sm:$0xff]  }
 0x23e   : > { %v7434_v14 = vadd.f32 %v9844_v55, %v9840_v52  ;;  %v4311_v4 = vshrl.u32 %v9901_v40, 16  ;;  %v4314_v63 = vshll.u32 %v9901_v40, 16  ;;  %v4320_v13 = vshll.u32 %v9903_v34, 16  ;;  %8003 = vmatprep.subr.bf16.mxu1 %v8304_v23 }
 0x23f   : > { %v4304_v17 = vrot.slane %v4303_v0, 4  ;;  %5994 = vmatprep.mubr.bf16.mxu0 %v7121_v41  ;;  %v4299_v7 = vsel %vm8848_vm8, %v4294_v62, %v4298_v51  ;;  %v9923_v60 = vadd.f32 %v7431_v61, %v7367_v31  ;;  %v4324_v6 = vshrl.u32 %v9903_v34, 16  ;;  %v4638_v0 = vld [vmem:[#allocation2 + $0x6c] sm:$0xe]  ;;  %8004 = vmatpush3.bf16.msra.mxu1 %v8304_v23  ;;  %v9967_v23 = vld [vmem:[#allocation2 + $0x84] sm:$0xf] }
 0x240   : > { %v9925_v1 = vadd.f32 %v7434_v14, %v7370_v29  ;;  %v4313_v55 = vrot.slane %v4311_v4, 4  ;;  %v4316_v28 = vrot.slane %v4314_v63, 5  ;;  %v4322_v44 = vrot.slane %v4320_v13, 5 }
 0x241   : > { %v4309_v52 = vsel %vm8848_vm8, %v4304_v17, %v4308_v47  ;;  %v7113_v42 = vcombine.low %v9855_v45, %v9864_v20  ;;  %v4326_v58 = vrot.slane %v4324_v6, 4  ;;  %v4330_v3 = vshll.u32 %v4141_v25, 16  ;;  %v4425_v6 = vld [vmem:[#allocation2 + $0x7c] sm:$0xf] }
 0x242   : > { %v7122_v39 = vcombine.low %v4299_v7, %v4309_v52  ;;  %v4317_v24 = vor.u32 %v4316_v28, %v4313_v55  ;;  %v7377_v15 = vpop.f32.mrb[24].mxu0  ;;  %v4456_v21 = vshll.u32 %v4423_v53, 16  ;;  %v4460_v45 = vshrl.u32 %v4423_v53, 16  ;;  %v4424_v55 = vld [vmem:[#allocation2 + $0x78] sm:$0xf] }
 0x243   : > { %v4327_v49 = vor.u32 %v4326_v58, %v4322_v44  ;;  %v4332_v30 = vrot.slane %v4330_v3, 5  ;;  %v7378_v11 = vpop.f32.mrb[25].mxu0  ;;  %v7437_v20 = vadd.f32 %v9888_v32, %v9883_v8  ;;  %v4672_v43 = vrot.slane %v4423_v53, 5  ;;  %v4438_v32 = vld [vmem:[#allocation2 + $0x74] sm:$0x1] }
 0x244   : > { %v4318_v12 = vrot.slane %v4317_v24, 4  ;;  %v7380_v46 = vpop.f32.mrb[26].mxu0  ;;  %v7373_v51 = vadd.f32 %v7372_v56, %v7371_v35  ;;  %v7440_v36 = vadd.f32 %v9896_v16, %v9892_v50  ;;  %v7376_v38 = vadd.f32 %v7375_v5, %v7374_v33  ;;  %v8305_v3 = vld [vmem:[%s10978_s7 + $0x30] sm:$0xff]   ;;  %v9961_v24 = vld [vmem:[#allocation2 + $0x80] sm:$0x1] }
 0x245   : > { %5995 = vmatmul.mubr.bf16.gmra.mrb[116].mxu0 %v7113_v42  ;;  %v4328_v27 = vrot.slane %v4327_v49, 4  ;;  %v7381_v37 = vpop.f32.mrb[27].mxu0  ;;  %v4447_v31 = vshrl.u32 %v4422_v19, 16  ;;  %v4450_v29 = vshll.u32 %v4422_v19, 16  ;;  %v7114_v8 = vcombine.low %v9873_v59, %v9876_v22  ;;  %v4639_v59 = vld [vmem:[#allocation2 + $0x78] sm:$0xe]  ;;  %8005 = vmatprep.subr.bf16.mxu1 %v8305_v3 }
 0x246   : > { %6002 = vmatprep.mubr.bf16.mxu0 %v7122_v39  ;;  %v7441_v9 = vpop.f32.mrb[24].mxu1  ;;  %v4323_v47 = vsel %vm8848_vm8, %v4318_v12, %v4322_v44  ;;  %v9945_v35 = vadd.f32 %v7437_v20, %v7373_v51  ;;  %v9947_v50 = vadd.f32 %v7440_v36, %v7376_v38  ;;  %v4462_v56 = vrot.slane %v4460_v45, 4  ;;  %8006 = vmatpush3.bf16.msra.mxu1 %v8305_v3 }
 0x247   : > { %v4333_v18 = vsel %vm8848_vm8, %v4328_v27, %v4332_v30  ;;  %v7442_v2 = vpop.f32.mrb[25].mxu1  ;;  %v4449_v33 = vrot.slane %v4447_v31, 4  ;;  %v4452_v41 = vrot.slane %v4450_v29, 5  ;;  %v9949_v62 = vrot.slane %v4456_v21, 5 }
 0x248   : > { %v7444_v16 = vpop.f32.mrb[26].mxu1  ;;  %v7123_v14 = vcombine.low %v4323_v47, %v4333_v18  ;;  %v7092_v5 = vrot.slane %v4638_v0, 9  ;;  %v7443_v17 = vadd.f32 %v7442_v2, %v7441_v9  ;;  %v7379_v25 = vadd.f32 %v7378_v11, %v7377_v15  ;;  %v9974_v9 = vld [vmem:[#allocation2 + $0x88] sm:$0xf] }
 0x249   : > { %v7445_v61 = vpop.f32.mrb[27].mxu1  ;;  %v4674_v4 = vrot.slane %v4672_v43, 4  ;;  %v4675_v63 = vrot.slane %v4438_v32, 5  ;;  %v7382_v13 = vadd.f32 %v7381_v37, %v7380_v46  ;;  %v4466_v7 = vshll.u32 %v4438_v32, 16 }
 0x24a   : > { %v7446_v22 = vadd.f32 %v7445_v61, %v7444_v16  ;;  %v9951_v52 = vadd.f32 %v7443_v17, %v7379_v25  ;;  %v4453_v28 = vor.u32 %v4452_v41, %v4449_v33  ;;  %v4463_v44 = vor.u32 %v4462_v56, %v9949_v62 }
 0x24b   : > { %v4679_v42 = vrot.slane %v4425_v6, 5  ;;  %v4673_v39 = vsel %vm8865_vm11, %v7092_v5, %v4672_v43  ;;  %v7093_v53 = vrot.slane %v4639_v59, 9  ;;  %v4676_v15 = vsel %vm8865_vm11, %v4674_v4, %v4675_v63 }
 0x24c   : > { %v9954_v58 = vadd.f32 %v7446_v22, %v7382_v13  ;;  %v4471_v49 = vshrl.u32 %v4424_v55, 16  ;;  %v4474_v30 = vshll.u32 %v4424_v55, 16  ;;  %v4480_v11 = vshll.u32 %v4425_v6, 16  ;;  %v9991_v13 = vld [vmem:[#allocation2 + $0x8c] sm:$0x1] }
 0x24d   : > { %6003 = vmatmul.mubr.bf16.gmra.mrb[120].mxu0 %v7114_v8  ;;  %v7115_v12 = vcombine.low %v9901_v40, %v9903_v34  ;;  %v4468_v19 = vrot.slane %v4466_v7, 5  ;;  %v4484_v46 = vshrl.u32 %v4425_v6, 16  ;;  %v4454_v27 = vrot.slane %v4453_v28, 4  ;;  %v4640_v40 = vld [vmem:[#allocation2 + $0x84] sm:$0xe] }
 0x24e   : > { %6010 = vmatprep.mubr.bf16.mxu0 %v7123_v14  ;;  %v4464_v21 = vrot.slane %v4463_v44, 4  ;;  %v4681_v45 = vrot.slane %v4679_v42, 4  ;;  %v4682_v20 = vrot.slane %v9961_v24, 5  ;;  %v7148_v43 = vcombine.low %v4673_v39, %v4676_v15 }
 0x24f   : > { %v9972_v51 = vsel %vm8865_vm11, %v7093_v53, %v4679_v42  ;;  %v4473_v34 = vrot.slane %v4471_v49, 4  ;;  %v4476_v47 = vrot.slane %v4474_v30, 5  ;;  %v9976_v18 = vrot.slane %v4480_v11, 5  ;;  %v8306_v53 = vld [vmem:[%s10978_s7 + $0x38] sm:$0xff]  }
 0x250   : > { %v7447_v37 = vpop.f32.mrb[28].mxu1  ;;  %v4486_v2 = vrot.slane %v4484_v46, 4  ;;  %v4495_v56 = vshrl.u32 %v9967_v23, 16  ;;  %v4498_v33 = vshll.u32 %v9967_v23, 16  ;;  %v4459_v41 = vsel %vm8848_vm8, %v4454_v27, %v9949_v62  ;;  %8007 = vmatprep.subr.bf16.mxu1 %v8306_v53 }
 0x251   : > { %v7383_v36 = vpop.f32.mrb[28].mxu0  ;;  %v7448_v38 = vpop.f32.mrb[29].mxu1  ;;  %v4469_v61 = vsel %vm8848_vm8, %v4464_v21, %v4468_v19  ;;  %v4683_v14 = vsel %vm8865_vm11, %v4681_v45, %v4682_v20  ;;  %v4490_v25 = vshll.u32 %v9961_v24, 16  ;;  %v4504_v59 = vshll.u32 %v9974_v9, 16  ;;  %v9999_v24 = vld [vmem:[#allocation2 + $0x90] sm:$0xf]  ;;  %8008 = vmatpush3.bf16.msra.mxu1 %v8306_v53 }
 0x252   : > { %v7449_v0 = vadd.f32 %v7448_v38, %v7447_v37  ;;  %v7384_v31 = vpop.f32.mrb[29].mxu0  ;;  %v7450_v29 = vpop.f32.mrb[30].mxu1  ;;  %v4477_v22 = vor.u32 %v4476_v47, %v4473_v34  ;;  %v7094_v62 = vrot.slane %v4640_v40, 9  ;;  %v4686_v7 = vrot.slane %v9974_v9, 5  ;;  %v10009_v40 = vld [vmem:[#allocation2 + $0x94] sm:$0xf] }
 0x253   : > { %v7385_v8 = vadd.f32 %v7384_v31, %v7383_v36  ;;  %v7386_v32 = vpop.f32.mrb[30].mxu0  ;;  %v7451_v16 = vpop.f32.mrb[31].mxu1  ;;  %v4508_v6 = vshrl.u32 %v9974_v9, 16  ;;  %v4487_v55 = vor.u32 %v4486_v2, %v9976_v18  ;;  %v4497_v44 = vrot.slane %v4495_v56, 4  ;;  %v4641_v31 = vld [vmem:[#allocation2 + $0x90] sm:$0xe] }
 0x254   : > { %v7452_v5 = vadd.f32 %v7451_v16, %v7450_v29  ;;  %v7387_v17 = vpop.f32.mrb[31].mxu0  ;;  %v4500_v42 = vrot.slane %v4498_v33, 5  ;;  %v7149_v3 = vcombine.low %v9972_v51, %v4683_v14  ;;  %v7140_v15 = vcombine.low %v4459_v41, %v4469_v61  ;;  %v10016_v41 = vld [vmem:[#allocation2 + $0x98] sm:$0x1] }
 0x255   : > { %6011 = vmatmul.mubr.bf16.gmra.mrb[124].mxu0 %v7115_v12  ;;  %v9988_v4 = vadd.f32 %v7449_v0, %v7385_v8  ;;  %v7388_v63 = vadd.f32 %v7387_v17, %v7386_v32  ;;  %v4689_v49 = vrot.slane %v9991_v13, 5  ;;  %v10005_v30 = vrot.slane %v4504_v59, 5  ;;  %v8293_v59 = vld [vmem:[#allocation6 + $0x210] sm:$0xff]  }
 0x256   : > { %6148 = vmatprep.mubr.bf16.mxu0 %v7148_v43  ;;  %v4510_v11 = vrot.slane %v4508_v6, 4  ;;  %v4478_v46 = vrot.slane %v4477_v22, 4  ;;  %v4492_v27 = vrot.slane %v4490_v25, 5  ;;  %v4688_v21 = vrot.slane %v4686_v7, 4  ;;  %v8292_v43 = vld [vmem:[#allocation6 + $0x208] sm:$0xff]  }
 0x257   : > { %v9996_v28 = vadd.f32 %v7452_v5, %v7388_v63  ;;  %v4488_v51 = vrot.slane %v4487_v55, 4  ;;  %v4687_v36 = vsel %vm8865_vm11, %v7094_v62, %v4686_v7  ;;  %v4501_v38 = vor.u32 %v4500_v42, %v4497_v44 }
 0x258   : > { %v7453_v39 = vpop.f32.mrb[32].mxu1  ;;  %v4693_v29 = vrot.slane %v10009_v40, 5  ;;  %v4519_v32 = vshrl.u32 %v9999_v24, 16  ;;  %v4522_v16 = vshll.u32 %v9999_v24, 16  ;;  %v4511_v56 = vor.u32 %v4510_v11, %v10005_v30 }
 0x259   : > { %v7389_v12 = vpop.f32.mrb[32].mxu0  ;;  %v7454_v19 = vpop.f32.mrb[33].mxu1  ;;  %v4514_v33 = vshll.u32 %v9991_v13, 16  ;;  %v4483_v5 = vsel %vm8848_vm8, %v4478_v46, %v9976_v18  ;;  %v4690_v17 = vsel %vm8865_vm11, %v4688_v21, %v4689_v49  ;;  %v4528_v25 = vshll.u32 %v10009_v40, 16 }
 0x25a   : > { %v7455_v45 = vadd.f32 %v7454_v19, %v7453_v39  ;;  %v7390_v20 = vpop.f32.mrb[33].mxu0  ;;  %v7456_v37 = vpop.f32.mrb[34].mxu1  ;;  %v4532_v63 = vshrl.u32 %v10009_v40, 16  ;;  %v4493_v22 = vsel %vm8848_vm8, %v4488_v51, %v4492_v27  ;;  %v4502_v13 = vrot.slane %v4501_v38, 4  ;;  %v8294_v27 = vld [vmem:[#allocation6 + $0x218] sm:$0xff]  }
 0x25b   : > { %v7391_v34 = vadd.f32 %v7390_v20, %v7389_v12  ;;  %v7392_v47 = vpop.f32.mrb[34].mxu0  ;;  %v7457_v0 = vpop.f32.mrb[35].mxu1  ;;  %v7095_v62 = vrot.slane %v4641_v31, 9  ;;  %v4695_v6 = vrot.slane %v4693_v29, 4  ;;  %v4696_v18 = vrot.slane %v10016_v41, 5 }
 0x25c   : > { %v7458_v2 = vadd.f32 %v7457_v0, %v7456_v37  ;;  %v7393_v8 = vpop.f32.mrb[35].mxu0  ;;  %v4521_v55 = vrot.slane %v4519_v32, 4  ;;  %v4524_v44 = vrot.slane %v4522_v16, 5  ;;  %v4512_v39 = vrot.slane %v4511_v56, 4  ;;  %v10037_v37 = vld [vmem:[#allocation2 + $0x9c] sm:$0xf] }
 0x25d   : > { %6149 = vmatmul.mubr.bf16.vlgmr.msra.gmra.mrb[128].mxu0 %v7140_v15  ;;  %v10018_v61 = vadd.f32 %v7455_v45, %v7391_v34  ;;  %v7394_v14 = vadd.f32 %v7393_v8, %v7392_v47  ;;  %v4516_v53 = vrot.slane %v4514_v33, 5  ;;  %v7141_v49 = vcombine.low %v4483_v5, %v4493_v22  ;;  %v10044_v38 = vld [vmem:[#allocation2 + $0xa0] sm:$0xf]  ;;  %v10051_v16 = vld [vmem:[#allocation2 + $0xa4] sm:$0x1]  ;;  %v8295_v5 = vld [vmem:[#allocation6 + $0x220] sm:$0xff]  }
 0x25e   : > { %6156 = vmatprep.mubr.bf16.mxu0 %v7149_v3  ;;  %8026 = vmatpush3.bf16.msra.mxu0 %v9878_v48  ;;  %v8307_v48 = vld [vmem:[#allocation6 + $0xc0] sm:$0xff]   ;;  %v7150_v3 = vcombine.low %v4687_v36, %v4690_v17  ;;  %v10033_v11 = vrot.slane %v4528_v25, 5  ;;  %v4534_v12 = vrot.slane %v4532_v63, 4  ;;  %v4694_v21 = vsel %vm8865_vm11, %v7095_v62, %v4693_v29 }
 0x25f   : > { %8027 = vmatprep.subr.bf16.mxu0 %v8292_v43  ;;  %v10030_v7 = vadd.f32 %v7458_v2, %v7394_v14  ;;  %7701 = vmatprep.subr.bf16.mxu1 %v8307_v48  ;;  %v4697_v51 = vsel %vm8865_vm11, %v4695_v6, %v4696_v18  ;;  %v4525_v36 = vor.u32 %v4524_v44, %v4521_v55  ;;  %v4538_v31 = vshll.u32 %v10016_v41, 16  ;;  %v4642_v29 = vld [vmem:[#allocation2 + $0x9c] sm:$0xe]  ;;  %v10059_v6 = vld [vmem:[#allocation2 + $0xa8] sm:$0xf] }
 0x260   : > { %v7459_v42 = vpop.f32.mrb[36].mxu1  ;;  %v4517_v0 = vsel %vm8848_vm8, %v4512_v39, %v4516_v53  ;;  %v4700_v2 = vrot.slane %v10044_v38, 5  ;;  %v4543_v33 = vshrl.u32 %v10037_v37, 16  ;;  %v4546_v14 = vshll.u32 %v10037_v37, 16 }
 0x261   : > { %v7460_v15 = vpop.f32.mrb[37].mxu1  ;;  %v4552_v25 = vshll.u32 %v10044_v38, 16  ;;  %v4556_v63 = vshrl.u32 %v10044_v38, 16  ;;  %v7096_v62 = vrot.slane %v4642_v29, 9  ;;  %v4540_v18 = vrot.slane %v4538_v31, 5 }
 0x262   : > { %8028 = vmatpush3.bf16.msra.mxu0 %v8292_v43  ;;  %v7461_v19 = vadd.f32 %v7460_v15, %v7459_v42  ;;  %v7462_v46 = vpop.f32.mrb[38].mxu1  ;;  %v4507_v43 = vsel %vm8848_vm8, %v4502_v13, %v10005_v30  ;;  %v4535_v30 = vor.u32 %v4534_v12, %v10033_v11  ;;  %v4526_v13 = vrot.slane %v4525_v36, 4 }
 0x263   : > { %8029 = vmatprep.subr.bf16.mxu0 %v8293_v59  ;;  %v7395_v45 = vpop.f32.mrb[36].mxu0  ;;  %v7463_v20 = vpop.f32.mrb[39].mxu1  ;;  %v7142_v22 = vcombine.low %v4507_v43, %v4517_v0  ;;  %v4702_v55 = vrot.slane %v4700_v2, 4  ;;  %v4703_v44 = vrot.slane %v10051_v16, 5  ;;  %v4545_v15 = vrot.slane %v4543_v33, 4 }
 0x264   : > { %v7396_v34 = vpop.f32.mrb[37].mxu0  ;;  %v7464_v47 = vadd.f32 %v7463_v20, %v7462_v46  ;;  %v4536_v53 = vrot.slane %v4535_v30, 4  ;;  %v8296_v46 = vld [vmem:[#allocation6 + $0x228] sm:$0xff]   ;;  %v4531_v31 = vsel %vm8848_vm8, %v4526_v13, %v10033_v11  ;;  %v4701_v29 = vsel %vm8865_vm11, %v7096_v62, %v4700_v2 }
 0x265   : > { %6157 = vmatmul.mubr.bf16.gmra.mrb[132].mxu0 %v7141_v49  ;;  %v7397_v8 = vadd.f32 %v7396_v34, %v7395_v45  ;;  %v7398_v32 = vpop.f32.mrb[38].mxu0  ;;  %v4548_v49 = vrot.slane %v4546_v14, 5  ;;  %v4558_v45 = vrot.slane %v4556_v63, 4  ;;  %v4562_v14 = vshll.u32 %v10051_v16, 16  ;;  %v4443_v63 = vld [vmem:[#allocation2 + $0xb0] sm:$0x1] }
 0x266   : > { %6164 = vmatprep.mubr.bf16.mxu0 %v7150_v3  ;;  %8030 = vmatpush3.bf16.msra.mxu0 %v8293_v59  ;;  %v7399_v56 = vpop.f32.mrb[39].mxu0  ;;  %v7151_v59 = vcombine.low %v4694_v21, %v4697_v51  ;;  %v10064_v3 = vld [vmem:[#allocation2 + $0xac] sm:$0xf]  ;;  %v10066_v21 = vrot.slane %v4552_v25, 5  ;;  %v4567_v51 = vshrl.u32 %v10059_v6, 16  ;;  %v4541_v30 = vsel %vm8848_vm8, %v4536_v53, %v4540_v18 }
 0x267   : > { %8031 = vmatprep.subr.bf16.mxu0 %v8294_v27  ;;  %v10055_v17 = vadd.f32 %v7461_v19, %v7397_v8  ;;  %v7400_v41 = vadd.f32 %v7399_v56, %v7398_v32  ;;  %v4580_v0 = vshrl.u32 %v10064_v3, 16  ;;  %v4704_v56 = vsel %vm8865_vm11, %v4702_v55, %v4703_v44  ;;  %v8297_v25 = vld [vmem:[#allocation6 + $0x230] sm:$0xff]  }
 0x268   : > { %v7465_v48 = vpop.f32.mrb[40].mxu1  ;;  %v4549_v33 = vor.u32 %v4548_v49, %v4545_v15  ;;  %v4559_v11 = vor.u32 %v4558_v45, %v10066_v21  ;;  %v4707_v2 = vrot.slane %v10064_v3, 5  ;;  %v4569_v13 = vrot.slane %v4567_v51, 4 }
 0x269   : > { %v10062_v42 = vadd.f32 %v7464_v47, %v7400_v41  ;;  %v7466_v39 = vpop.f32.mrb[41].mxu1  ;;  %v4570_v47 = vshll.u32 %v10059_v6, 16  ;;  %v4582_v18 = vrot.slane %v4580_v0, 4  ;;  %v7152_v44 = vcombine.low %v4701_v29, %v4704_v56 }
 0x26a   : > { %8032 = vmatpush3.bf16.msra.mxu0 %v8294_v27  ;;  %v7467_v12 = vadd.f32 %v7466_v39, %v7465_v48  ;;  %v7468_v19 = vpop.f32.mrb[42].mxu1  ;;  %v4576_v27 = vshll.u32 %v10064_v3, 16  ;;  %v10090_v39 = vld [vmem:[#allocation2 + $0xb8] sm:$0xf]  ;;  %v7143_v15 = vcombine.low %v4531_v31, %v4541_v30  ;;  %v4550_v49 = vrot.slane %v4549_v33, 4 }
 0x26b   : > { %8033 = vmatprep.subr.bf16.mxu0 %v8295_v5  ;;  %v7401_v20 = vpop.f32.mrb[40].mxu0  ;;  %v7469_v43 = vpop.f32.mrb[43].mxu1  ;;  %v4572_v62 = vrot.slane %v4570_v47, 5  ;;  %v4560_v51 = vrot.slane %v4559_v11, 4  ;;  %v4709_v47 = vrot.slane %v4707_v2, 4 }
 0x26c   : > { %v7402_v36 = vpop.f32.mrb[41].mxu0  ;;  %v7470_v34 = vadd.f32 %v7469_v43, %v7468_v19  ;;  %v10086_v48 = vrot.slane %v4576_v27, 5  ;;  %v8298_v43 = vld [vmem:[#allocation6 + $0x238] sm:$0xff]   ;;  %v4710_v27 = vrot.slane %v4443_v63, 5 }
 0x26d   : > { %6165 = vmatmul.mubr.bf16.gmra.mrb[136].mxu0 %v7142_v22  ;;  %v7403_v8 = vadd.f32 %v7402_v36, %v7401_v20  ;;  %v7404_v32 = vpop.f32.mrb[42].mxu0  ;;  %v4643_v22 = vld [vmem:[#allocation2 + $0xa8] sm:$0xe]  ;;  %v10092_v20 = vld [vmem:[#allocation2 + $0xb4] sm:$0xf]  ;;  %v4564_v36 = vrot.slane %v4562_v14, 5  ;;  %v4573_v29 = vor.u32 %v4572_v62, %v4569_v13  ;;  %v4555_v14 = vsel %vm8848_vm8, %v4550_v49, %v10066_v21 }
 0x26e   : > { %6172 = vmatprep.mubr.bf16.mxu0 %v7151_v59  ;;  %8034 = vmatpush3.bf16.msra.mxu0 %v8295_v5  ;;  %v7405_v41 = vpop.f32.mrb[43].mxu0  ;;  %v7097_v19 = vrot.slane %v4643_v22, 9  ;;  %v4591_v33 = vshrl.u32 %v10092_v20, 16  ;;  %v4711_v62 = vsel %vm8865_vm11, %v4709_v47, %v4710_v27 }
 0x26f   : > { %8035 = vmatprep.subr.bf16.mxu0 %v8296_v46  ;;  %v10084_v59 = vadd.f32 %v7467_v12, %v7403_v8  ;;  %v7406_v5 = vadd.f32 %v7405_v41, %v7404_v32  ;;  %v4583_v8 = vor.u32 %v4582_v18, %v10086_v48  ;;  %v4594_v41 = vshll.u32 %v10092_v20, 16  ;;  %v4644_v18 = vld [vmem:[#allocation2 + $0xb4] sm:$0xe] }
 0x270   : > { %v7471_v55 = vpop.f32.mrb[44].mxu1  ;;  %v4708_v11 = vsel %vm8865_vm11, %v7097_v19, %v4707_v2  ;;  %v4565_v13 = vsel %vm8848_vm8, %v4560_v51, %v4564_v36 }
 0x271   : > { %v10088_v16 = vadd.f32 %v7470_v34, %v7406_v5  ;;  %v7472_v53 = vpop.f32.mrb[45].mxu1  ;;  %v4604_v5 = vshrl.u32 %v10090_v39, 16  ;;  %v7144_v51 = vcombine.low %v4555_v14, %v4565_v13 }
 0x272   : > { %8036 = vmatpush3.bf16.msra.mxu0 %v8296_v46  ;;  %v7473_v45 = vadd.f32 %v7472_v53, %v7471_v55  ;;  %v7474_v12 = vpop.f32.mrb[46].mxu1  ;;  %v4586_v46 = vshll.u32 %v4443_v63, 16  ;;  %v4600_v63 = vshll.u32 %v10090_v39, 16  ;;  %v4584_v53 = vrot.slane %v4583_v8, 4 }
 0x273   : > { %8037 = vmatprep.subr.bf16.mxu0 %v8297_v25  ;;  %v7407_v0 = vpop.f32.mrb[44].mxu0  ;;  %v7475_v34 = vpop.f32.mrb[47].mxu1  ;;  %v4606_v47 = vrot.slane %v4604_v5, 4  ;;  %v7098_v8 = vrot.slane %v4644_v18, 9 }
 0x274   : > { %v7408_v31 = vpop.f32.mrb[45].mxu0  ;;  %v7476_v32 = vadd.f32 %v7475_v34, %v7474_v12  ;;  %v4588_v2 = vrot.slane %v4586_v46, 5  ;;  %v4593_v12 = vrot.slane %v4591_v33, 4  ;;  %v10113_v36 = vrot.slane %v4600_v63, 5  ;;  %v4645_v63 = vld [vmem:[#allocation2 + $0xc0] sm:$0xe] }
 0x275   : > { %6173 = vmatmul.mubr.bf16.gmra.mrb[140].mxu0 %v7143_v15  ;;  %v7409_v30 = vadd.f32 %v7408_v31, %v7407_v0  ;;  %v7410_v56 = vpop.f32.mrb[46].mxu0  ;;  %v4714_v15 = vrot.slane %v10090_v39, 5  ;;  %v4596_v0 = vrot.slane %v4594_v41, 5  ;;  %v10117_v31 = vld [vmem:[#allocation2 + $0xc0] sm:$0xf] }
 0x276   : > { %6180 = vmatprep.mubr.bf16.mxu0 %v7152_v44  ;;  %8038 = vmatpush3.bf16.msra.mxu0 %v8297_v25  ;;  %v7411_v22 = vpop.f32.mrb[47].mxu0  ;;  %v4444_v25 = vld [vmem:[#allocation2 + $0xbc] sm:$0x1]  ;;  %v4574_v44 = vrot.slane %v4573_v29, 4  ;;  %v7153_v29 = vcombine.low %v4708_v11, %v4711_v62  ;;  %v10124_v41 = vld [vmem:[#allocation2 + $0xc4] sm:$0xf] }
 0x277   : > { %8039 = vmatprep.subr.bf16.mxu0 %v8298_v43  ;;  %v10108_v55 = vadd.f32 %v7473_v45, %v7409_v30  ;;  %v7412_v21 = vadd.f32 %v7411_v22, %v7410_v56  ;;  %v4717_v46 = vrot.slane %v4444_v25, 5  ;;  %v4716_v33 = vrot.slane %v4714_v15, 4 }
 0x278   : > { %v7557_v49 = vpop.f32.mrb[48].mxu1  ;;  %v4597_v11 = vor.u32 %v4596_v0, %v4593_v12  ;;  %v4615_v62 = vshrl.u32 %v10117_v31, 16  ;;  %v4618_v18 = vshll.u32 %v10117_v31, 16  ;;  %v4628_v12 = vshrl.u32 %v10124_v41, 16 }
 0x279   : > { %11050 = vst [vmem:[#allocation21_spill] sm:$0xff] %v10108_v55  ;;  %v10111_v19 = vadd.f32 %v7476_v32, %v7412_v21  ;;  %v7558_v34 = vpop.f32.mrb[49].mxu1  ;;  %v4579_v32 = vsel %vm8848_vm8, %v4574_v44, %v10086_v48  ;;  %v4607_v48 = vor.u32 %v4606_v47, %v10113_v36  ;;  %v4610_v21 = vshll.u32 %v4444_v25, 16 }
 0x27a   : > { %8040 = vmatpush3.bf16.msra.mxu0 %v8298_v43  ;;  %v10115_v27 = vadd.f32 %v7558_v34, %v7557_v49  ;;  %v7560_v45 = vpop.f32.mrb[50].mxu1  ;;  %v4589_v43 = vsel %vm8848_vm8, %v4584_v53, %v4588_v2  ;;  %v4721_v44 = vrot.slane %v10124_v41, 5  ;;  %v4445_v2 = vld [vmem:[#allocation2 + $0xc8] sm:$0x1]  ;;  %v7099_v47 = vrot.slane %v4645_v63, 9 }
 0x27b   : > { %11051 = vst [vmem:[#allocation22_spill] sm:$0xff] %v10111_v19  ;;  %v7493_v30 = vpop.f32.mrb[48].mxu0  ;;  %v7561_v56 = vpop.f32.mrb[51].mxu1  ;;  %v7145_v0 = vcombine.low %v4579_v32, %v4589_v43  ;;  %v4598_v25 = vrot.slane %v4597_v11, 4  ;;  %v4630_v43 = vrot.slane %v4628_v12, 4 }
 0x27c   : > { %v7494_v14 = vpop.f32.mrb[49].mxu0  ;;  %v10126_v22 = vadd.f32 %v7561_v56, %v7560_v45  ;;  %v4715_v45 = vsel %vm8865_vm11, %v7098_v8, %v4714_v15  ;;  %v4617_v56 = vrot.slane %v4615_v62, 4  ;;  %v10147_v62 = vld [vmem:[#allocation2 + $0x7c] sm:$0xf]  ;;  %v10155_v12 = vld [vmem:[#allocation2 + $0x80] sm:$0x1] }
 0x27d   : > { %6181 = vmatmul.mubr.bf16.gmra.mrb[144].mxu0 %v7144_v51  ;;  %v7495_v5 = vadd.f32 %v7494_v14, %v7493_v30  ;;  %v7496_v13 = vpop.f32.mrb[50].mxu0  ;;  %v4624_v51 = vshll.u32 %v10124_v41, 16  ;;  %v4620_v14 = vrot.slane %v4618_v18, 5  ;;  %v4603_v11 = vsel %vm8848_vm8, %v4598_v25, %v10113_v36  ;;  %v4946_v36 = vld [vmem:[#allocation2 + $0x78] sm:$0xe] }
 0x27e   : > { %6188 = vmatprep.mubr.bf16.mxu0 %v7153_v29  ;;  %v7497_v53 = vpop.f32.mrb[51].mxu0  ;;  %v4718_v29 = vsel %vm8865_vm11, %v4716_v33, %v4717_v46  ;;  %v4722_v46 = vsel %vm8865_vm11, %v7099_v47, %v4721_v44 }
 0x27f   : > { %v3521_v49 = vadd.f32 %v7495_v5, %v9923_v60  ;;  %v7498_v34 = vadd.f32 %v7497_v53, %v7496_v13  ;;  %v4608_v60 = vrot.slane %v4607_v48, 4  ;;  %v4612_v5 = vrot.slane %v4610_v21, 5 }
 0x280   : > { %v7563_v57 = vpop.f32.mrb[52].mxu1  ;;  %v4723_v13 = vrot.slane %v4721_v44, 4  ;;  %v4724_v53 = vrot.slane %v4445_v2, 5  ;;  %v7154_v19 = vcombine.low %v4715_v45, %v4718_v29  ;;  %v10140_v32 = vrot.slane %v4624_v51, 5 }
 0x281   : > { %v3524_v30 = vadd.f32 %v7498_v34, %v9925_v1  ;;  %v7564_v26 = vpop.f32.mrb[53].mxu1  ;;  %v4621_v63 = vor.u32 %v4620_v14, %v4617_v56  ;;  %v4634_v44 = vshll.u32 %v4445_v2, 16  ;;  %v4980_v34 = vrot.slane %v10147_v62, 5 }
 0x282   : > { %v7565_v8 = vadd.f32 %v7564_v26, %v7563_v57  ;;  %v7566_v55 = vpop.f32.mrb[54].mxu1  ;;  %v4613_v26 = vsel %vm8848_vm8, %v4608_v60, %v4612_v5  ;;  %v4725_v57 = vsel %vm8865_vm11, %v4723_v13, %v4724_v53  ;;  %v4631_v51 = vor.u32 %v4630_v43, %v10140_v32 }
 0x283   : > { %v7499_v15 = vpop.f32.mrb[52].mxu0  ;;  %v7567_v33 = vpop.f32.mrb[55].mxu1  ;;  %v7146_v29 = vcombine.low %v4603_v11, %v4613_v26  ;;  %v4622_v47 = vrot.slane %v4621_v63, 4  ;;  %v4636_v14 = vrot.slane %v4634_v44, 5  ;;  %v7100_v60 = vrot.slane %v4946_v36, 9 }
 0x284   : > { %v7500_v1 = vpop.f32.mrb[53].mxu0  ;;  %v7568_v21 = vadd.f32 %v7567_v33, %v7566_v55  ;;  %v7155_v55 = vcombine.low %v4722_v46, %v4725_v57  ;;  %v4982_v2 = vrot.slane %v4980_v34, 4  ;;  %v4983_v5 = vrot.slane %v10155_v12, 5 }
 0x285   : > { %6189 = vmatmul.mubr.bf16.gmra.mrb[148].mxu0 %v7145_v0  ;;  %v7501_v18 = vadd.f32 %v7500_v1, %v7499_v15  ;;  %v7502_v48 = vpop.f32.mrb[54].mxu0  ;;  %v4632_v53 = vrot.slane %v4631_v51, 4 }
 0x286   : > { %6196 = vmatprep.mubr.bf16.mxu0 %v7154_v19  ;;  %v7503_v19 = vpop.f32.mrb[55].mxu0  ;;  %v4984_v57 = vsel %vm8865_vm11, %v4982_v2, %v4983_v5 }
 0x287   : > { %v3529_v0 = vadd.f32 %v7501_v18, %v9945_v35  ;;  %v7504_v45 = vadd.f32 %v7503_v19, %v7502_v48  ;;  %v10163_v35 = vadd.f32 %v10115_v27, %v3521_v49  ;;  %v10170_v18 = vadd.f32 %v10126_v22, %v3524_v30  ;;  %v4747_v49 = vld [vmem:[#allocation2 + $0x8c] sm:$0x1]  ;;  %v4947_v48 = vld [vmem:[#allocation2 + $0x84] sm:$0xe]  ;;  %v4735_v22 = vld [vmem:[#allocation2 + $0x94] sm:$0xf] }
 0x288   : > { %v7569_v56 = vpop.f32.mrb[56].mxu1  ;;  %v4981_v27 = vsel %vm8865_vm11, %v7100_v60, %v4980_v34  ;;  %v4948_v30 = vld [vmem:[#allocation2 + $0x90] sm:$0xe]  ;;  %v4994_v36 = vrot.slane %v4735_v22, 5  ;;  %v7134_v34 = vcombine.low %v9967_v23, %v9974_v9  ;;  %v4950_v22 = vld [vmem:[#allocation2 + $0xa8] sm:$0xe] }
 0x289   : > { %v3532_v25 = vadd.f32 %v7504_v45, %v9947_v50  ;;  %v7570_v13 = vpop.f32.mrb[57].mxu1  ;;  %v10160_v1 = vadd.f32 %v7565_v8, %v3529_v0  ;;  %v10167_v50 = vld [vmem:[#allocation2 + $0x88] sm:$0xf]  ;;  %v4627_v8 = vsel %vm8848_vm8, %v4622_v47, %v10140_v32  ;;  %v7101_v0 = vrot.slane %v4947_v48, 9  ;;  %v4748_v45 = vld [vmem:[#allocation2 + $0x98] sm:$0x1] }
 0x28a   : > { %v7571_v43 = vadd.f32 %v7570_v13, %v7569_v56  ;;  %v7572_v15 = vpop.f32.mrb[58].mxu1  ;;  %v4987_v44 = vrot.slane %v10167_v50, 5  ;;  %v7172_v56 = vcombine.low %v4981_v27, %v4984_v57  ;;  %v7102_v60 = vrot.slane %v4948_v30, 9  ;;  %v10198_v57 = vld [vmem:[#allocation2 + $0xa0] sm:$0xf] }
 0x28b   : > { %v7573_v46 = vpop.f32.mrb[59].mxu1  ;;  %v10165_v33 = vadd.f32 %v7568_v21, %v3532_v25  ;;  %v4637_v21 = vsel %vm8848_vm8, %v4632_v53, %v4636_v14  ;;  %v4990_v14 = vrot.slane %v4747_v49, 5  ;;  %v4997_v48 = vrot.slane %v4748_v45, 5  ;;  %v4739_v45 = vld [vmem:[#allocation2 + $0xac] sm:$0xf] }
 0x28c   : > { %v7574_v63 = vadd.f32 %v7573_v46, %v7572_v15  ;;  %v7147_v25 = vcombine.low %v4627_v8, %v4637_v21  ;;  %v4989_v5 = vrot.slane %v4987_v44, 4  ;;  %v7135_v8 = vcombine.low %v9999_v24, %v10009_v40  ;;  %v4730_v21 = vld [vmem:[#allocation2 + $0x78] sm:$0xf]  ;;  %v8343_v24 = vld [vmem:[#allocation6 + $0x1b0] sm:$0xff]  }
 0x28d   : > { %6197 = vmatmul.mubr.bf16.gmra.mrb[152].mxu0 %v7146_v29  ;;  %v7505_v11 = vpop.f32.mrb[56].mxu0 }
 0x28e   : > { %6204 = vmatprep.mubr.bf16.mxu0 %v7155_v55  ;;  %v7506_v26 = vpop.f32.mrb[57].mxu0 }
 0x28f   : > { %v7507_v19 = vadd.f32 %v7506_v26, %v7505_v11  ;;  %v7508_v51 = vpop.f32.mrb[58].mxu0  ;;  %v4996_v11 = vrot.slane %v4994_v36, 4  ;;  %v4949_v26 = vld [vmem:[#allocation2 + $0x9c] sm:$0xe] }
 0x290   : > { %v7509_v32 = vpop.f32.mrb[59].mxu0 }
 0x291   : > { %v3537_v29 = vadd.f32 %v7507_v19, %v9951_v52  ;;  %v7510_v55 = vadd.f32 %v7509_v32, %v7508_v51  ;;  %v7575_v47 = vpop.f32.mrb[60].mxu1  ;;  %v4991_v19 = vsel %vm8865_vm11, %v4989_v5, %v4990_v14  ;;  %v4995_v51 = vsel %vm8865_vm11, %v7102_v60, %v4994_v36 }
 0x292   : > { %v7576_v2 = vpop.f32.mrb[61].mxu1  ;;  %v7103_v32 = vrot.slane %v4949_v26, 9  ;;  %v4768_v14 = vshrl.u32 %v10147_v62, 16  ;;  %v4774_v60 = vshll.u32 %v10155_v12, 16 }
 0x293   : > { %v3540_v13 = vadd.f32 %v7510_v55, %v9954_v58  ;;  %v10186_v53 = vadd.f32 %v7576_v2, %v7575_v47  ;;  %v7578_v15 = vpop.f32.mrb[62].mxu1  ;;  %v10188_v46 = vadd.f32 %v7571_v43, %v3537_v29  ;;  %v4988_v58 = vsel %vm8865_vm11, %v7101_v0, %v4987_v44  ;;  %v4749_v43 = vld [vmem:[#allocation2 + $0xa4] sm:$0x1] }
 0x294   : > { %v7579_v52 = vpop.f32.mrb[63].mxu1  ;;  %v4998_v44 = vsel %vm8865_vm11, %v4996_v11, %v4997_v48  ;;  %v5008_v0 = vrot.slane %v4739_v45, 5  ;;  %v4755_v29 = vshrl.u32 %v4730_v21, 16  ;;  %v4758_v55 = vshll.u32 %v4730_v21, 16  ;;  %v4741_v45 = vld [vmem:[#allocation2 + $0xb8] sm:$0xf] }
 0x295   : > { %6205 = vmatmul.mubr.bf16.gmra.mrb[156].mxu0 %v7147_v25  ;;  %v10192_v27 = vadd.f32 %v7579_v52, %v7578_v15  ;;  %v10194_v49 = vadd.f32 %v7574_v63, %v3540_v13  ;;  %v5001_v63 = vrot.slane %v10198_v57, 5  ;;  %v5004_v47 = vrot.slane %v4749_v43, 5  ;;  %v4750_v25 = vld [vmem:[#allocation2 + $0xb0] sm:$0x1] }
 0x296   : > { %8041 = vmatprep.mubr.bf16.mxu0 %v7172_v56  ;;  %v7104_v56 = vrot.slane %v4950_v22, 9  ;;  %v4764_v2 = vshll.u32 %v10147_v62, 16  ;;  %v7173_v5 = vcombine.low %v4988_v58, %v4991_v19  ;;  %v4757_v13 = vrot.slane %v4755_v29, 4 }
 0x297   : > { %v4760_v36 = vrot.slane %v4758_v55, 5  ;;  %v7174_v15 = vcombine.low %v4995_v51, %v4998_v44  ;;  %v5003_v26 = vrot.slane %v5001_v63, 4  ;;  %v4770_v30 = vrot.slane %v4768_v14, 4  ;;  %v4751_v51 = vld [vmem:[#allocation2 + $0xbc] sm:$0x1] }
 0x298   : > { %v4766_v52 = vrot.slane %v4764_v2, 5  ;;  %v5010_v11 = vrot.slane %v5008_v0, 4  ;;  %v5011_v48 = vrot.slane %v4750_v25, 5  ;;  %v7137_v21 = vcombine.low %v10059_v6, %v10064_v3  ;;  %v4951_v44 = vld [vmem:[#allocation2 + $0xb4] sm:$0xe] }
 0x299   : > { %v4761_v43 = vor.u32 %v4760_v36, %v4757_v13  ;;  %v4776_v58 = vrot.slane %v4774_v60, 5  ;;  %v5002_v19 = vsel %vm8865_vm11, %v7103_v32, %v5001_v63  ;;  %v5005_v55 = vsel %vm8865_vm11, %v5003_v26, %v5004_v47  ;;  %v4752_v47 = vld [vmem:[#allocation2 + $0xc8] sm:$0x1]  ;;  %v4952_v26 = vld [vmem:[#allocation2 + $0xc0] sm:$0xe] }
 0x29a   : > { %v4771_v62 = vor.u32 %v4770_v30, %v4766_v52  ;;  %v5015_v14 = vrot.slane %v4741_v45, 5  ;;  %v5009_v36 = vsel %vm8865_vm11, %v7104_v56, %v5008_v0  ;;  %v5012_v30 = vsel %vm8865_vm11, %v5010_v11, %v5011_v48  ;;  %v8385_v6 = vld [vmem:[#allocation2 + $0xb0] sm:$0x1] }
 0x29b   : > { %v4762_v29 = vrot.slane %v4761_v43, 4  ;;  %v7175_v45 = vcombine.low %v5002_v19, %v5005_v55  ;;  %v7176_v56 = vcombine.low %v5009_v36, %v5012_v30  ;;  %v4413_v3 = vrot.slane %v8385_v6, 5  ;;  %v10455_v6 = vld [vmem:[#allocation2 + $0x9c] sm:$0xf] }
 0x29c   : > { %v4772_v13 = vrot.slane %v4771_v62, 4  ;;  %v7105_v62 = vrot.slane %v4951_v44, 9  ;;  %v5017_v48 = vrot.slane %v5015_v14, 4 }
 0x29d   : > { %8042 = vmatmul.mubr.bf16.vlgmr.msra.gmra.mrb[160].mxu0 %v7173_v5  ;;  %v7511_v22 = vpop.f32.mrb[60].mxu0  ;;  %v4743_v5 = vld [vmem:[#allocation2 + $0xc4] sm:$0xf]  ;;  %v4767_v63 = vsel %vm8848_vm8, %v4762_v29, %v4766_v52  ;;  %v5025_v29 = vrot.slane %v4752_v47, 5 }
 0x29e   : > { %8045 = vmatprep.mubr.bf16.mxu0 %v7174_v15  ;;  %v7512_v12 = vpop.f32.mrb[61].mxu0  ;;  %v5022_v32 = vrot.slane %v4743_v5, 5  ;;  %v5016_v19 = vsel %vm8865_vm11, %v7105_v62, %v5015_v14 }
 0x29f   : > { %v7513_v25 = vadd.f32 %v7512_v12, %v7511_v22  ;;  %v7514_v2 = vpop.f32.mrb[62].mxu0  ;;  %v4777_v22 = vsel %vm8848_vm8, %v4772_v13, %v4776_v58  ;;  %v5018_v12 = vrot.slane %v4751_v51, 5 }
 0x2a0   : > { %v7515_v60 = vpop.f32.mrb[63].mxu0  ;;  %v10227_v0 = vcombine.low %v4767_v63, %v4777_v22  ;;  %v5024_v52 = vrot.slane %v5022_v32, 4 }
 0x2a1   : > { %v3545_v15 = vadd.f32 %v7513_v25, %v9988_v4  ;;  %v7516_v43 = vadd.f32 %v7515_v60, %v7514_v2  ;;  %v7106_v4 = vrot.slane %v4952_v26, 9  ;;  %v7138_v25 = vcombine.low %v10092_v20, %v10090_v39 }
 0x2a2   : > { %v5026_v51 = vsel %vm8865_vm11, %v5024_v52, %v5025_v29 }
 0x2a3   : > { %v3548_v11 = vadd.f32 %v7516_v43, %v9996_v28  ;;  %v10231_v5 = vadd.f32 %v10186_v53, %v3545_v15  ;;  %v5019_v28 = vsel %vm8865_vm11, %v5017_v48, %v5018_v12  ;;  %v5023_v53 = vsel %vm8865_vm11, %v7106_v4, %v5022_v32 }
 0x2a4   : > { %v7177_v2 = vcombine.low %v5016_v19, %v5019_v28  ;;  %v7178_v30 = vcombine.low %v5023_v53, %v5026_v51  ;;  %v7139_v15 = vcombine.low %v10117_v31, %v10124_v41 }
 0x2a5   : > { %8046 = vmatmul.mubr.bf16.gmra.mrb[164].mxu0 %v7175_v45  ;;  %v10236_v58 = vadd.f32 %v10192_v27, %v3548_v11 }
 0x2a6   : > { %8049 = vmatprep.mubr.bf16.mxu0 %v7176_v56 }
 0x2a8   : > { %v7581_v44 = vpop.f32.mrb[64].mxu1 }
 0x2a9   : > { %v7582_v55 = vpop.f32.mrb[65].mxu1 }
 0x2aa   : > { %v7583_v13 = vadd.f32 %v7582_v55, %v7581_v44  ;;  %v7584_v36 = vpop.f32.mrb[66].mxu1 }
 0x2ab   : > { %v7517_v27 = vpop.f32.mrb[64].mxu0  ;;  %v7585_v60 = vpop.f32.mrb[67].mxu1 }
 0x2ac   : > { %v7518_v63 = vpop.f32.mrb[65].mxu0  ;;  %v7586_v14 = vadd.f32 %v7585_v60, %v7584_v36 }
 0x2ad   : > { %8050 = vmatmul.mubr.bf16.gmra.mrb[168].mxu0 %v7177_v2  ;;  %v7519_v43 = vadd.f32 %v7518_v63, %v7517_v27  ;;  %v7520_v32 = vpop.f32.mrb[66].mxu0 }
 0x2ae   : > { %8053 = vmatprep.mubr.bf16.mxu0 %v7178_v30  ;;  %v7521_v47 = vpop.f32.mrb[67].mxu0 }
 0x2af   : > { %v3553_v26 = vadd.f32 %v7519_v43, %v10018_v61  ;;  %v7522_v22 = vadd.f32 %v7521_v47, %v7520_v32 }
 0x2b0   : > { %v7587_v45 = vpop.f32.mrb[68].mxu1 }
 0x2b1   : > { %v3556_v62 = vadd.f32 %v7522_v22, %v10030_v7  ;;  %v7588_v12 = vpop.f32.mrb[69].mxu1  ;;  %v10250_v56 = vadd.f32 %v7583_v13, %v3553_v26 }
 0x2b2   : > { %v7589_v11 = vadd.f32 %v7588_v12, %v7587_v45  ;;  %v7590_v48 = vpop.f32.mrb[70].mxu1 }
 0x2b3   : > { %v7591_v4 = vpop.f32.mrb[71].mxu1  ;;  %v10252_v52 = vadd.f32 %v7586_v14, %v3556_v62 }
 0x2b4   : > { %v7592_v19 = vadd.f32 %v7591_v4, %v7590_v48 }
 0x2b5   : > { %v7523_v29 = vpop.f32.mrb[68].mxu0 }
 0x2b6   : > { %v7524_v28 = vpop.f32.mrb[69].mxu0 }
 0x2b7   : > { %v7525_v53 = vadd.f32 %v7524_v28, %v7523_v29  ;;  %v7526_v51 = vpop.f32.mrb[70].mxu0 }
 0x2b8   : > { %v7527_v44 = vpop.f32.mrb[71].mxu0 }
 0x2b9   : > { %v3561_v61 = vadd.f32 %v7525_v53, %v10055_v17  ;;  %v7528_v55 = vadd.f32 %v7527_v44, %v7526_v51  ;;  %v11052_v53 = vld [vmem:[#allocation21_spill] sm:$0xff] }
 0x2ba   : > { %v7593_v2 = vpop.f32.mrb[72].mxu1 }
 0x2bb   : > { %v3564_v7 = vadd.f32 %v7528_v55, %v10062_v42  ;;  %v7594_v36 = vpop.f32.mrb[73].mxu1  ;;  %v10256_v13 = vadd.f32 %v7589_v11, %v3561_v61 }
 0x2bc   : > { %v7595_v30 = vadd.f32 %v7594_v36, %v7593_v2  ;;  %v7596_v27 = vpop.f32.mrb[74].mxu1 }
 0x2bd   : > { %v7597_v60 = vpop.f32.mrb[75].mxu1  ;;  %v10258_v63 = vadd.f32 %v7592_v19, %v3564_v7 }
 0x2be   : > { %v7529_v14 = vpop.f32.mrb[72].mxu0  ;;  %v7598_v43 = vadd.f32 %v7597_v60, %v7596_v27  ;;  %v10273_v27 = vld [vmem:[%s10976_s5] ss:$0 sm:$0xff] }
 0x2bf   : > { %v7530_v32 = vpop.f32.mrb[73].mxu0 }
 0x2c0   : > { %v7531_v47 = vadd.f32 %v7530_v32, %v7529_v14  ;;  %v7532_v26 = vpop.f32.mrb[74].mxu0 }
 0x2c1   : > { %v7533_v22 = vpop.f32.mrb[75].mxu0 }
 0x2c2   : > { %v3569_v17 = vadd.f32 %v7531_v47, %v10084_v59  ;;  %v7534_v45 = vadd.f32 %v7533_v22, %v7532_v26  ;;  %v11053_v59 = vld [vmem:[#allocation22_spill] sm:$0xff]  ;;  %v10281_v47 = vld [vmem:[%s10977_s6] ss:$0 sm:$0xff] }
 0x2c4   : > { %v3572_v62 = vadd.f32 %v7534_v45, %v10088_v16  ;;  %v10262_v42 = vadd.f32 %v7595_v30, %v3569_v17 }
 0x2c6   : > { %v7535_v12 = vpop.f32.mrb[76].mxu0  ;;  %v10264_v11 = vadd.f32 %v7598_v43, %v3572_v62 }
 0x2c7   : > { %v7536_v48 = vpop.f32.mrb[77].mxu0 }
 0x2c8   : > { %v7537_v4 = vadd.f32 %v7536_v48, %v7535_v12  ;;  %v7538_v29 = vpop.f32.mrb[78].mxu0 }
 0x2c9   : > { %v7599_v19 = vpop.f32.mrb[76].mxu1  ;;  %v7539_v28 = vpop.f32.mrb[79].mxu0 }
 0x2ca   : > { %v3577_v51 = vadd.f32 %v7537_v4, %v11052_v53  ;;  %v7540_v44 = vadd.f32 %v7539_v28, %v7538_v29  ;;  %v7600_v61 = vpop.f32.mrb[77].mxu1 }
 0x2cb   : > { %v7601_v55 = vadd.f32 %v7600_v61, %v7599_v19  ;;  %v7602_v2 = vpop.f32.mrb[78].mxu1 }
 0x2cc   : > { %v3580_v7 = vadd.f32 %v7540_v44, %v11053_v59  ;;  %v7603_v36 = vpop.f32.mrb[79].mxu1 }
 0x2cd   : > { %v7604_v16 = vadd.f32 %v7603_v36, %v7602_v2  ;;  %v10268_v30 = vadd.f32 %v7601_v55, %v3577_v51 }
 0x2ce   : > { %v7979_v60 = vpop.f32.mrb[80].mxu0 }
 0x2cf   : > { %v3723_v14 = vadd.f32 %v7979_v60, %v10160_v1  ;;  %v3714_v43 = vpop.f32.mrb[81].mxu0  ;;  %v10276_v32 = vadd.f32 %v7604_v16, %v3580_v7 }
 0x2d0   : > { %v3715_v26 = vadd.f32 %v3714_v43, %v10163_v35  ;;  %v7980_v22 = vpop.f32.mrb[82].mxu0 }
 0x2d1   : > { %v3785_v17 = vmul.f32 %v10273_v27, %v3723_v14  ;;  %v3726_v45 = vadd.f32 %v7980_v22, %v10165_v33  ;;  %v3717_v62 = vpop.f32.mrb[83].mxu0  ;;  %v8308_v22 = vld [vmem:[#allocation6 + $0x80] sm:$0xff]  }
 0x2d2   : > { %v3783_v12 = vmul.f32 %v10273_v27, %v3715_v26  ;;  %v3718_v1 = vadd.f32 %v3717_v62, %v10170_v18 }
 0x2d3   : > { %v3807_v48 = vadd.f32 %v10281_v47, %v3785_v17  ;;  %v3786_v4 = vmul.f32 %v10273_v27, %v3726_v45  ;;  %v8309_v45 = vld [vmem:[#allocation6 + $0xc8] sm:$0xff]  }
 0x2d4   : > { %v3805_v29 = vadd.f32 %v10281_v47, %v3783_v12  ;;  %v3784_v19 = vmul.f32 %v10273_v27, %v3718_v1 }
 0x2d5   : > { %v3808_v35 = vadd.f32 %v10281_v47, %v3786_v4  ;;  %v3823_v51 = vmax.f32 %v3807_v48, 0.0 }
 0x2d6   : > { %v3806_v28 = vadd.f32 %v10281_v47, %v3784_v19  ;;  %v7983_v53 = vpop.f32.mrb[84].mxu0  ;;  %v3821_v55 = vmax.f32 %v3805_v29, 0.0 }
 0x2d7   : > { %v3824_v33 = vmax.f32 %v3808_v35, 0.0  ;;  %v3739_v44 = vadd.f32 %v7983_v53, %v10231_v5  ;;  %v3730_v61 = vpop.f32.mrb[85].mxu0  ;;  %v8311_v35 = vld [vmem:[#allocation6 + $0xd0] sm:$0xff]  }
 0x2d8   : > { %v3822_v18 = vmax.f32 %v3806_v28, 0.0  ;;  %v3731_v2 = vadd.f32 %v3730_v61, %v10188_v46  ;;  %v7984_v59 = vpop.f32.mrb[86].mxu0 }
 0x2d9   : > { %v3838_v7 = vpack.c.bf16 %v3824_v33, %v3823_v51  ;;  %v3789_v36 = vmul.f32 %v10273_v27, %v3739_v44  ;;  %v3742_v16 = vadd.f32 %v7984_v59, %v10236_v58  ;;  %v3733_v60 = vpop.f32.mrb[87].mxu0 }
 0x2da   : > { %v3787_v14 = vmul.f32 %v10273_v27, %v3731_v2  ;;  %v3734_v43 = vadd.f32 %v3733_v60, %v10194_v49  ;;  %v3837_v26 = vpack.c.bf16 %v3822_v18, %v3821_v55  ;;  %v8310_v49 = vld [vmem:[#allocation6 + $0x88] sm:$0xff]  }
 0x2db   : > { %v3811_v5 = vadd.f32 %v10281_v47, %v3789_v36  ;;  %v3790_v17 = vmul.f32 %v10273_v27, %v3742_v16 }
 0x2dc   : > { %v3809_v46 = vadd.f32 %v10281_v47, %v3787_v14  ;;  %v3788_v62 = vmul.f32 %v10273_v27, %v3734_v43  ;;  %8009 = vmatprep.mubr.bf16.mxu1 %v3837_v26  ;;  %v8314_v26 = vld [vmem:[#allocation6 + $0x98] sm:$0xff]  }
 0x2dd   : > { %v3812_v12 = vadd.f32 %v10281_v47, %v3790_v17  ;;  %8010 = vmatmul.mubr.bf16.vlgmr.msra.gmra.mrb[80].mxu1 %v3838_v7  ;;  %v3827_v48 = vmax.f32 %v3811_v5, 0.0  ;;  %v8312_v7 = vld [vmem:[#allocation6 + $0x90] sm:$0xff]  }
 0x2de   : > { %v3810_v58 = vadd.f32 %v10281_v47, %v3788_v62  ;;  %7702 = vmatpush3.bf16.msra.mxu1 %v8308_v22  ;;  %v7987_v1 = vpop.f32.mrb[88].mxu0  ;;  %v3825_v28 = vmax.f32 %v3809_v46, 0.0  ;;  %v8315_v46 = vld [vmem:[#allocation6 + $0xe0] sm:$0xff]  }
 0x2df   : > { %v3828_v4 = vmax.f32 %v3812_v12, 0.0  ;;  %v3755_v29 = vadd.f32 %v7987_v1, %v10256_v13  ;;  %v3746_v19 = vpop.f32.mrb[89].mxu0  ;;  %7703 = vmatprep.subr.bf16.mxu1 %v8309_v45 }
 0x2e0   : > { %v3826_v53 = vmax.f32 %v3810_v58, 0.0  ;;  %v3747_v51 = vadd.f32 %v3746_v19, %v10250_v56  ;;  %v7988_v33 = vpop.f32.mrb[90].mxu0  ;;  %v8313_v56 = vld [vmem:[#allocation6 + $0xd8] sm:$0xff]  }
 0x2e1   : > { %v3793_v44 = vmul.f32 %v10273_v27, %v3755_v29  ;;  %v3758_v61 = vadd.f32 %v7988_v33, %v10258_v63  ;;  %v3749_v55 = vpop.f32.mrb[91].mxu0  ;;  %v3840_v18 = vpack.c.bf16 %v3828_v4, %v3827_v48 }
 0x2e2   : > { %v3791_v2 = vmul.f32 %v10273_v27, %v3747_v51  ;;  %v3750_v59 = vadd.f32 %v3749_v55, %v10252_v52  ;;  %7704 = vmatpush3.bf16.msra.mxu1 %v8310_v49  ;;  %v3839_v13 = vpack.c.bf16 %v3826_v53, %v3825_v28  ;;  %v8316_v28 = vld [vmem:[#allocation6 + $0xa0] sm:$0xff]   ;;  %v8318_v55 = vld [vmem:[#allocation6 + $0xa8] sm:$0xff]  }
 0x2e3   : > { %v3815_v36 = vadd.f32 %v10281_v47, %v3793_v44  ;;  %v3794_v16 = vmul.f32 %v10273_v27, %v3758_v61  ;;  %7705 = vmatprep.subr.bf16.mxu1 %v8311_v35 }
 0x2e4   : > { %v3813_v60 = vadd.f32 %v10281_v47, %v3791_v2  ;;  %v3792_v14 = vmul.f32 %v10273_v27, %v3750_v59  ;;  %8013 = vmatprep.mubr.bf16.mxu1 %v3839_v13  ;;  %v8319_v13 = vld [vmem:[#allocation6 + $0xf0] sm:$0xff]  }
 0x2e5   : > { %v3816_v63 = vadd.f32 %v10281_v47, %v3794_v16  ;;  %8014 = vmatmul.mubr.bf16.gmra.mrb[84].mxu1 %v3840_v18  ;;  %v3831_v22 = vmax.f32 %v3815_v36, 0.0 }
 0x2e6   : > { %v3814_v43 = vadd.f32 %v10281_v47, %v3792_v14  ;;  %7706 = vmatpush3.bf16.msra.mxu1 %v8312_v7  ;;  %v7991_v52 = vpop.f32.mrb[92].mxu0  ;;  %v3829_v62 = vmax.f32 %v3813_v60, 0.0  ;;  %v8368_v60 = vld [vmem:[#allocation2 + $0x64] sm:$0xf] }
 0x2e7   : > { %v3832_v5 = vmax.f32 %v3816_v63, 0.0  ;;  %v3771_v17 = vadd.f32 %v7991_v52, %v10268_v30  ;;  %v3762_v45 = vpop.f32.mrb[93].mxu0  ;;  %7707 = vmatprep.subr.bf16.mxu1 %v8313_v56  ;;  %v4368_v14 = vrot.slane %v8368_v60, 5  ;;  %v8369_v52 = vld [vmem:[#allocation2 + $0x68] sm:$0x1] }
 0x2e8   : > { %v3830_v12 = vmax.f32 %v3814_v43, 0.0  ;;  %v3763_v58 = vadd.f32 %v3762_v45, %v10262_v42  ;;  %v7992_v1 = vpop.f32.mrb[94].mxu0  ;;  %v8317_v42 = vld [vmem:[#allocation6 + $0xe8] sm:$0xff]  }
 0x2e9   : > { %v3797_v49 = vmul.f32 %v10273_v27, %v3771_v17  ;;  %v3774_v48 = vadd.f32 %v7992_v1, %v10276_v32  ;;  %v3765_v4 = vpop.f32.mrb[95].mxu0  ;;  %v3842_v29 = vpack.c.bf16 %v3832_v5, %v3831_v22  ;;  %v8320_v5 = vld [vmem:[#allocation6 + $0xb0] sm:$0xff]   ;;  %v8322_v17 = vld [vmem:[#allocation6 + $0xf8] sm:$0xff]  }
 0x2ea   : > { %v3795_v19 = vmul.f32 %v10273_v27, %v3763_v58  ;;  %v3766_v35 = vadd.f32 %v3765_v4, %v10264_v11  ;;  %7708 = vmatpush3.bf16.msra.mxu1 %v8314_v26  ;;  %v3841_v30 = vpack.c.bf16 %v3830_v12, %v3829_v62  ;;  %v517_v62 = vld [vmem:[#allocation2 + $0xd4] sm:$0x1]  ;;  %v8370_v12 = vld [vmem:[#allocation2 + $0x70] sm:$0xf]  ;;  %v8371_v58 = vld [vmem:[#allocation2 + $0x6c] sm:$0xf] }
 0x2eb   : > { %v3819_v53 = vadd.f32 %v10281_v47, %v3797_v49  ;;  %v3798_v51 = vmul.f32 %v10273_v27, %v3774_v48  ;;  %7709 = vmatprep.subr.bf16.mxu1 %v8315_v46  ;;  %v461_v46 = vld [vmem:[#allocation2 + $0xcc] sm:$0x1]  ;;  %v7132_v1 = vcombine.low %v8371_v58, %v8370_v12  ;;  %v4370_v49 = vrot.slane %v4368_v14, 4 }
 0x2ec   : > { %v3817_v33 = vadd.f32 %v10281_v47, %v3795_v19  ;;  %v3796_v44 = vmul.f32 %v10273_v27, %v3766_v35  ;;  %8017 = vmatprep.mubr.bf16.mxu1 %v3841_v30  ;;  %v4334_v27 = vld [vmem:[#allocation2 + $0x60] sm:$0xe]  ;;  %v462_v4 = vsel %vm8782_vm3, 0, %v461_v46  ;;  %v518_v19 = vsel %vm8818_vm5, 0, %v517_v62  ;;  %v10338_v35 = vld [vmem:[#allocation2 + $0xd0] sm:$0xf] }
 0x2ed   : > { %v3820_v32 = vadd.f32 %v10281_v47, %v3798_v51  ;;  %8018 = vmatmul.mubr.bf16.gmra.mrb[88].mxu1 %v3842_v29  ;;  %v3835_v18 = vmax.f32 %v3819_v53, 0.0  ;;  %v7084_v45 = vrot.slane %v4334_v27, 9  ;;  %463 = vst [vmem:[#allocation2 + $0xcc] sm:$0x1] %v462_v4  ;;  %519 = vst [vmem:[#allocation2 + $0xd4] sm:$0x1] %v518_v19 }
 0x2ee   : > { %v3818_v61 = vadd.f32 %v10281_v47, %v3796_v44  ;;  %7710 = vmatpush3.bf16.msra.mxu1 %v8316_v28  ;;  %v7653_v11 = vpop.f32.mrb[96].mxu0  ;;  %v3833_v7 = vmax.f32 %v3817_v33, 0.0  ;;  %v4371_v47 = vrot.slane %v8369_v52, 5  ;;  %v4953_v30 = vld [vmem:[#allocation2 + $0xcc] sm:$0xe]  ;;  %v4932_v28 = vshll.u32 %v10338_v35, 16 }
 0x2ef   : > { %v3836_v2 = vmax.f32 %v3820_v32, 0.0  ;;  %v7654_v59 = vpop.f32.mrb[97].mxu0  ;;  %7711 = vmatprep.subr.bf16.mxu1 %v8317_v42  ;;  %v8323_v51 = vld [vmem:[#allocation6 + $0xb8] sm:$0xff]   ;;  %v4335_v42 = vld [vmem:[#allocation2 + $0x6c] sm:$0xe]  ;;  %v4936_v33 = vshrl.u32 %v10338_v35, 16 }
 0x2f0   : > { %v3834_v36 = vmax.f32 %v3818_v61, 0.0  ;;  %v10330_v16 = vadd.f32 %v7654_v59, %v7653_v11  ;;  %v7656_v56 = vpop.f32.mrb[98].mxu0  ;;  %v8324_v32 = vld [vmem:[#allocation6 + $0x1c0] sm:$0xff]   ;;  %v4369_v61 = vsel %vm8865_vm11, %v7084_v45, %v4368_v14  ;;  %v8372_v11 = vld [vmem:[#allocation2 + $0x70] sm:$0xf]  ;;  %v7085_v14 = vrot.slane %v4335_v42, 9 }
 0x2f1   : > { %v7657_v63 = vpop.f32.mrb[99].mxu0  ;;  %v3844_v43 = vpack.c.bf16 %v3836_v2, %v3835_v18  ;;  %v5029_v18 = vrot.slane %v10338_v35, 5  ;;  %v10345_v2 = vrot.slane %v4932_v28, 5  ;;  %v8374_v46 = vld [vmem:[#allocation2 + $0x7c] sm:$0xf] }
 0x2f2   : > { %v10332_v26 = vadd.f32 %v7657_v63, %v7656_v56  ;;  %7712 = vmatpush3.bf16.msra.mxu1 %v8318_v55  ;;  %v3843_v22 = vpack.c.bf16 %v3834_v36, %v3833_v7  ;;  %v4375_v55 = vrot.slane %v8372_v11, 5  ;;  %v4372_v7 = vsel %vm8865_vm11, %v4370_v49, %v4371_v47  ;;  %v8325_v63 = vld [vmem:[#allocation6 + $0x180] sm:$0xff]  }
 0x2f3   : > { %7713 = vmatprep.subr.bf16.mxu1 %v8319_v13  ;;  %v7107_v36 = vrot.slane %v4953_v30, 9  ;;  %v4938_v56 = vrot.slane %v4936_v33, 4  ;;  %v7124_v52 = vcombine.low %v4369_v61, %v4372_v7  ;;  %v5031_v45 = vrot.slane %v5029_v18, 4  ;;  %v8375_v62 = vld [vmem:[#allocation2 + $0x78] sm:$0xf]  ;;  %v8330_v33 = vld [vmem:[#allocation6 + $0x1d0] sm:$0xff]  }
 0x2f4   : > { %8021 = vmatprep.mubr.bf16.mxu1 %v3843_v22  ;;  %v8327_v22 = vld [vmem:[#allocation6 + $0x1c8] sm:$0xff]   ;;  %v7133_v12 = vcombine.low %v8375_v62, %v8374_v46  ;;  %v4377_v47 = vrot.slane %v4375_v55, 4  ;;  %v4753_v58 = vld [vmem:[#allocation2 + $0xd4] sm:$0x1]  ;;  %v10356_v49 = vld [vmem:[#allocation2 + $0xcc] sm:$0xf] }
 0x2f5   : > { %8022 = vmatmul.mubr.bf16.gmra.mrb[92].mxu1 %v3844_v43  ;;  %v4939_v43 = vor.u32 %v4938_v56, %v10345_v2  ;;  %v5032_v4 = vrot.slane %v4753_v58, 5  ;;  %v4923_v29 = vshrl.u32 %v10356_v49, 16  ;;  %v4926_v19 = vshll.u32 %v10356_v49, 16 }
 0x2f6   : > { %7714 = vmatpush3.bf16.msra.mxu1 %v8320_v5  ;;  %v7659_v53 = vpop.f32.mrb[100].mxu0  ;;  %6051 = vmatprep.mubr.bf16.mxu1 %v7132_v1  ;;  %v8373_v5 = vld [vmem:[#allocation2 + $0x74] sm:$0x1]  ;;  %v5030_v1 = vsel %vm8865_vm11, %v7107_v36, %v5029_v18  ;;  %v4942_v30 = vshll.u32 %v4753_v58, 16  ;;  %v8376_v36 = vld [vmem:[#allocation2 + $0x7c] sm:$0xf] }
 0x2f7   : > { %v7660_v44 = vpop.f32.mrb[101].mxu0  ;;  %7715 = vmatprep.subr.bf16.mxu1 %v8322_v17  ;;  %v4378_v17 = vrot.slane %v8373_v5, 5  ;;  %v4940_v48 = vrot.slane %v4939_v43, 4  ;;  %v4928_v61 = vrot.slane %v4926_v19, 5  ;;  %v4382_v56 = vrot.slane %v8376_v36, 5  ;;  %v8340_v36 = vld [vmem:[#allocation6 + $0x1a8] sm:$0xff]  }
 0x2f8   : > { %v10347_v59 = vadd.f32 %v7660_v44, %v7659_v53  ;;  %v7662_v13 = vpop.f32.mrb[102].mxu0  ;;  %v4376_v53 = vsel %vm8865_vm11, %v7085_v14, %v4375_v55  ;;  %v5033_v44 = vsel %vm8865_vm11, %v5031_v45, %v5032_v4  ;;  %v4944_v11 = vrot.slane %v4942_v30, 5  ;;  %v8333_v45 = vld [vmem:[#allocation6 + $0x1d8] sm:$0xff]  }
 0x2f9   : > { %v7663_v27 = vpop.f32.mrb[103].mxu0  ;;  %v4379_v7 = vsel %vm8865_vm11, %v4377_v47, %v4378_v17  ;;  %v4384_v17 = vrot.slane %v4382_v56, 4 }
 0x2fa   : > { %v10351_v60 = vadd.f32 %v7663_v27, %v7662_v13  ;;  %7716 = vmatpush3.bf16.msra.mxu1 %v8323_v51  ;;  %v8328_v51 = vld [vmem:[#allocation6 + $0x188] sm:$0xff]   ;;  %v7179_v27 = vcombine.low %v5030_v1, %v5033_v44  ;;  %v4945_v43 = vsel %vm8848_vm8, %v4940_v48, %v4944_v11  ;;  %v7125_v5 = vcombine.low %v4376_v53, %v4379_v7  ;;  %v8334_v1 = vld [vmem:[#allocation6 + $0x198] sm:$0xff]  }
 0x2fb   : > { %7829 = vmatprep.subr.bf16.mxu1 %v8324_v32  ;;  %v4925_v32 = vrot.slane %v4923_v29, 4  ;;  %v8336_v29 = vld [vmem:[#allocation6 + $0x1e0] sm:$0xff]  }
 0x2fc   : > { %8054 = vmatmul.mubr.bf16.gmra.mrb[172].mxu0 %v7179_v27 }
 0x2fd   : > { %6052 = vmatmul.mubr.bf16.vlgmr.msra.gmra.mrb[96].mxu1 %v7124_v52  ;;  %v4929_v14 = vor.u32 %v4928_v61, %v4925_v32  ;;  %v8339_v32 = vld [vmem:[#allocation6 + $0x1e8] sm:$0xff]  }
 0x2fe   : > { %7830 = vmatpush3.bf16.msra.mxu1 %v8325_v63  ;;  %v7665_v28 = vpop.f32.mrb[104].mxu0  ;;  %6059 = vmatprep.mubr.bf16.mxu1 %v7133_v12  ;;  %v4336_v63 = vld [vmem:[#allocation2 + $0x78] sm:$0xe]  ;;  %v8377_v12 = vld [vmem:[#allocation2 + $0x80] sm:$0x1] }
 0x2ff   : > { %v7666_v42 = vpop.f32.mrb[105].mxu0  ;;  %7831 = vmatprep.subr.bf16.mxu1 %v8327_v22  ;;  %v8331_v22 = vld [vmem:[#allocation6 + $0x190] sm:$0xff]   ;;  %v4930_v46 = vrot.slane %v4929_v14, 4  ;;  %v7086_v62 = vrot.slane %v4336_v63, 9  ;;  %v4385_v47 = vrot.slane %v8377_v12, 5 }
 0x300   : > { %v10364_v18 = vadd.f32 %v7666_v42, %v7665_v28  ;;  %v7668_v13 = vpop.f32.mrb[106].mxu0  ;;  %v8378_v28 = vld [vmem:[#allocation2 + $0x88] sm:$0xf]  ;;  %v8380_v63 = vld [vmem:[#allocation2 + $0x94] sm:$0xf] }
 0x301   : > { %v7669_v55 = vpop.f32.mrb[107].mxu0  ;;  %v4935_v58 = vsel %vm8848_vm8, %v4930_v46, %v10345_v2  ;;  %v4383_v19 = vsel %vm8865_vm11, %v7086_v62, %v4382_v56  ;;  %v4386_v30 = vsel %vm8865_vm11, %v4384_v17, %v4385_v47  ;;  %v4389_v53 = vrot.slane %v8378_v28, 5  ;;  %v8342_v56 = vld [vmem:[#allocation6 + $0x1f0] sm:$0xff]   ;;  %v8345_v62 = vld [vmem:[#allocation6 + $0x1f8] sm:$0xff]   ;;  %v8381_v47 = vld [vmem:[#allocation2 + $0x98] sm:$0x1] }
 0x302   : > { %v10370_v52 = vadd.f32 %v7669_v55, %v7668_v13  ;;  %7832 = vmatpush3.bf16.msra.mxu1 %v8328_v51  ;;  %v10378_v48 = vcombine.low %v4935_v58, %v4945_v43  ;;  %v4337_v51 = vld [vmem:[#allocation2 + $0x84] sm:$0xe]  ;;  %v8379_v13 = vld [vmem:[#allocation2 + $0x8c] sm:$0x1]  ;;  %v4396_v14 = vrot.slane %v8380_v63, 5  ;;  %v4399_v58 = vrot.slane %v8381_v47, 5 }
 0x303   : > { %7833 = vmatprep.subr.bf16.mxu1 %v8330_v33  ;;  %v7126_v33 = vcombine.low %v4383_v19, %v4386_v30  ;;  %v7087_v61 = vrot.slane %v4337_v51, 9  ;;  %v4391_v11 = vrot.slane %v4389_v53, 4  ;;  %v4392_v7 = vrot.slane %v8379_v13, 5  ;;  %v4340_v63 = vld [vmem:[#allocation2 + $0xa8] sm:$0xe] }
 0x304   : > { %v4398_v12 = vrot.slane %v4396_v14, 4 }
 0x305   : > { %6060 = vmatmul.mubr.bf16.gmra.mrb[100].mxu1 %v7125_v5  ;;  %v4390_v27 = vsel %vm8865_vm11, %v7087_v61, %v4389_v53  ;;  %v4393_v55 = vsel %vm8865_vm11, %v4391_v11, %v4392_v7  ;;  %v8382_v53 = vld [vmem:[#allocation2 + $0xa0] sm:$0xf]  ;;  %v8383_v11 = vld [vmem:[#allocation2 + $0xa4] sm:$0x1]  ;;  %v8384_v7 = vld [vmem:[#allocation2 + $0xac] sm:$0xf] }
 0x306   : > { %6067 = vmatprep.mubr.bf16.mxu1 %v7134_v34  ;;  %7834 = vmatpush3.bf16.msra.mxu1 %v8331_v22  ;;  %v8337_v34 = vld [vmem:[#allocation6 + $0x1a0] sm:$0xff]   ;;  %v4338_v22 = vld [vmem:[#allocation2 + $0x90] sm:$0xe]  ;;  %v7127_v40 = vcombine.low %v4390_v27, %v4393_v55  ;;  %v4400_v30 = vsel %vm8865_vm11, %v4398_v12, %v4399_v58  ;;  %v4406_v13 = vrot.slane %v8383_v11, 5  ;;  %v4788_v58 = vshll.u32 %v10167_v50, 16 }
 0x307   : > { %7835 = vmatprep.subr.bf16.mxu1 %v8333_v45  ;;  %v7088_v17 = vrot.slane %v4338_v22, 9  ;;  %v8386_v12 = vld [vmem:[#allocation2 + $0xb8] sm:$0xf] }
 0x308   : > { %v7671_v4 = vpop.f32.mrb[108].mxu0  ;;  %v4417_v47 = vrot.slane %v8386_v12, 5 }
 0x309   : > { %v7672_v2 = vpop.f32.mrb[109].mxu0  ;;  %v4397_v19 = vsel %vm8865_vm11, %v7088_v17, %v4396_v14 }
 0x30a   : > { %v10384_v42 = vadd.f32 %v7672_v2, %v7671_v4  ;;  %v7674_v23 = vpop.f32.mrb[110].mxu0  ;;  %7836 = vmatpush3.bf16.msra.mxu1 %v8334_v1  ;;  %v11056_v4 = vcombine.low %v10037_v37, %v10044_v38  ;;  %v4403_v2 = vrot.slane %v8382_v53, 5  ;;  %v7128_v37 = vcombine.low %v4397_v19, %v4400_v30 }
 0x30b   : > { %v7675_v9 = vpop.f32.mrb[111].mxu0  ;;  %7837 = vmatprep.subr.bf16.mxu1 %v8336_v29  ;;  %v8346_v29 = vld [vmem:[#allocation6 + $0x1b8] sm:$0xff]  }
 0x30c   : > { %v10386_v44 = vadd.f32 %v7675_v9, %v7674_v23  ;;  %v4339_v23 = vld [vmem:[#allocation2 + $0x9c] sm:$0xe]  ;;  %v4405_v61 = vrot.slane %v4403_v2, 4 }
 0x30d   : > { %6068 = vmatmul.mubr.bf16.gmra.mrb[104].mxu1 %v7126_v33 }
 0x30e   : > { %6075 = vmatprep.mubr.bf16.mxu1 %v7135_v8  ;;  %7838 = vmatpush3.bf16.msra.mxu1 %v8337_v34  ;;  %v4407_v27 = vsel %vm8865_vm11, %v4405_v61, %v4406_v13 }
 0x30f   : > { %7839 = vmatprep.subr.bf16.mxu1 %v8339_v32  ;;  %v7089_v32 = vrot.slane %v4339_v23, 9  ;;  %v4419_v23 = vrot.slane %v4417_v47, 4 }
 0x310   : > { %v7677_v43 = vpop.f32.mrb[112].mxu0 }
 0x311   : > { %v7678_v5 = vpop.f32.mrb[113].mxu0 }
 0x312   : > { %v10395_v45 = vadd.f32 %v7678_v5, %v7677_v43  ;;  %v7680_v46 = vpop.f32.mrb[114].mxu0  ;;  %7840 = vmatpush3.bf16.msra.mxu1 %v8340_v36  ;;  %v4410_v36 = vrot.slane %v8384_v7, 5 }
 0x313   : > { %v7681_v8 = vpop.f32.mrb[115].mxu0  ;;  %7841 = vmatprep.subr.bf16.mxu1 %v8342_v56  ;;  %v4404_v56 = vsel %vm8865_vm11, %v7089_v32, %v4403_v2 }
 0x314   : > { %v10397_v1 = vadd.f32 %v7681_v8, %v7680_v46  ;;  %v7129_v5 = vcombine.low %v4404_v56, %v4407_v27  ;;  %v10421_v8 = vld [vmem:[#allocation2 + $0x84] sm:$0xf] }
 0x315   : > { %6076 = vmatmul.mubr.bf16.gmra.mrb[108].mxu1 %v7127_v40  ;;  %v4412_v40 = vrot.slane %v4410_v36, 4  ;;  %v4779_v19 = vshrl.u32 %v10421_v8, 16  ;;  %v4782_v30 = vshll.u32 %v10421_v8, 16 }
 0x316   : > { %6083 = vmatprep.mubr.bf16.mxu1 %v11056_v4  ;;  %7842 = vmatpush3.bf16.msra.mxu1 %v8343_v24  ;;  %v7090_v24 = vrot.slane %v4340_v63, 9 }
 0x317   : > { %7843 = vmatprep.subr.bf16.mxu1 %v8345_v62  ;;  %v4414_v17 = vsel %vm8865_vm11, %v4412_v40, %v4413_v3  ;;  %v4781_v61 = vrot.slane %v4779_v19, 4  ;;  %v4784_v11 = vrot.slane %v4782_v30, 5  ;;  %v4827_v30 = vshrl.u32 %v10455_v6, 16 }
 0x318   : > { %v7683_v28 = vpop.f32.mrb[116].mxu0  ;;  %v4411_v62 = vsel %vm8865_vm11, %v7090_v24, %v4410_v36  ;;  %v8388_v36 = vld [vmem:[#allocation2 + $0x8c] sm:$0x1] }
 0x319   : > { %v7684_v51 = vpop.f32.mrb[117].mxu0  ;;  %v7130_v53 = vcombine.low %v4411_v62, %v4414_v17  ;;  %v4798_v56 = vshll.u32 %v8388_v36, 16  ;;  %v4785_v63 = vor.u32 %v4784_v11, %v4781_v61  ;;  %v8390_v61 = vld [vmem:[#allocation2 + $0x98] sm:$0x1] }
 0x31a   : > { %v10406_v9 = vadd.f32 %v7684_v51, %v7683_v28  ;;  %v7686_v34 = vpop.f32.mrb[118].mxu0  ;;  %7844 = vmatpush3.bf16.msra.mxu1 %v8346_v29  ;;  %v4341_v29 = vld [vmem:[#allocation2 + $0xb4] sm:$0xe]  ;;  %v4792_v28 = vshrl.u32 %v10167_v50, 16  ;;  %v10441_v50 = vld [vmem:[#allocation2 + $0x90] sm:$0xf] }
 0x31b   : > { %v7687_v38 = vpop.f32.mrb[119].mxu0  ;;  %v7091_v51 = vrot.slane %v4341_v29, 9  ;;  %v4803_v31 = vshrl.u32 %v10441_v50, 16  ;;  %v4806_v41 = vshll.u32 %v10441_v50, 16  ;;  %v4800_v62 = vrot.slane %v4798_v56, 5 }
 0x31c   : > { %v10408_v33 = vadd.f32 %v7687_v38, %v7686_v34  ;;  %v8387_v34 = vld [vmem:[#allocation2 + $0xbc] sm:$0x1]  ;;  %v4790_v38 = vrot.slane %v4788_v58, 5  ;;  %v4794_v13 = vrot.slane %v4792_v28, 4  ;;  %v4786_v12 = vrot.slane %v4785_v63, 4 }
 0x31d   : > { %6084 = vmatmul.mubr.bf16.gmra.mrb[112].mxu1 %v7128_v37  ;;  %v4420_v37 = vrot.slane %v8387_v34, 5  ;;  %v4418_v7 = vsel %vm8865_vm11, %v7091_v51, %v4417_v47  ;;  %v4808_v29 = vrot.slane %v4806_v41, 5  ;;  %v4830_v28 = vshll.u32 %v10455_v6, 16  ;;  %v8392_v63 = vld [vmem:[#allocation2 + $0x78] sm:$0xf] }
 0x31e   : > { %6091 = vmatprep.mubr.bf16.mxu1 %v7137_v21  ;;  %v4822_v11 = vshll.u32 %v8390_v61, 16 }
 0x31f   : > { %v4832_v36 = vrot.slane %v4830_v28, 5 }
 0x320   : > { %v7689_v55 = vpop.f32.mrb[120].mxu0 }
 0x321   : > { %v7690_v14 = vpop.f32.mrb[121].mxu0 }
 0x322   : > { %v10417_v43 = vadd.f32 %v7690_v14, %v7689_v55  ;;  %v7692_v22 = vpop.f32.mrb[122].mxu0  ;;  %v4421_v55 = vsel %vm8865_vm11, %v4419_v23, %v4420_v37  ;;  %v4795_v14 = vor.u32 %v4794_v13, %v4790_v38 }
 0x323   : > { %v7693_v46 = vpop.f32.mrb[123].mxu0  ;;  %v7131_v3 = vcombine.low %v4418_v7, %v4421_v55  ;;  %v8391_v55 = vld [vmem:[#allocation2 + $0x7c] sm:$0xf] }
 0x324   : > { %v10419_v21 = vadd.f32 %v7693_v46, %v7692_v22  ;;  %v10447_v22 = vld [vmem:[#allocation2 + $0x94] sm:$0xf]  ;;  %v4796_v47 = vrot.slane %v4795_v14, 4 }
 0x325   : > { %6092 = vmatmul.mubr.bf16.gmra.mrb[116].mxu1 %v7129_v5  ;;  %v4812_v5 = vshll.u32 %v10447_v22, 16 }
 0x326   : > { %6099 = vmatprep.mubr.bf16.mxu1 %v7138_v25  ;;  %v4801_v51 = vsel %vm8848_vm8, %v4796_v47, %v4800_v62 }
 0x327   : > { %v10459_v58 = vrot.slane %v4812_v5, 5 }
 0x328   : > { %v7695_v4 = vpop.f32.mrb[124].mxu0 }
 0x329   : > { %v7696_v39 = vpop.f32.mrb[125].mxu0 }
 0x32a   : > { %v10434_v20 = vadd.f32 %v7696_v39, %v7695_v4  ;;  %v7698_v25 = vpop.f32.mrb[126].mxu0  ;;  %v4805_v4 = vrot.slane %v4803_v31, 4  ;;  %v4836_v39 = vshll.u32 %v10198_v57, 16 }
 0x32b   : > { %v7699_v2 = vpop.f32.mrb[127].mxu0 }
 0x32c   : > { %v10436_v32 = vadd.f32 %v7699_v2, %v7698_v25  ;;  %v4840_v25 = vshrl.u32 %v10198_v57, 16  ;;  %v4791_v2 = vsel %vm8848_vm8, %v4786_v12, %v4790_v38  ;;  %v4809_v34 = vor.u32 %v4808_v29, %v4805_v4  ;;  %v10479_v4 = vld [vmem:[#allocation2 + $0xac] sm:$0xf] }
 0x32d   : > { %6100 = vmatmul.mubr.bf16.gmra.mrb[120].mxu1 %v7130_v53  ;;  %v4838_v56 = vrot.slane %v4836_v39, 5  ;;  %v7156_v38 = vcombine.low %v8392_v63, %v8391_v55  ;;  %v7165_v5 = vcombine.low %v4791_v2, %v4801_v51  ;;  %v4860_v29 = vshll.u32 %v10479_v4, 16  ;;  %v8395_v39 = vld [vmem:[#allocation2 + $0x88] sm:$0xf]  ;;  %v10493_v55 = vld [vmem:[#allocation2 + $0xb4] sm:$0xf] }
 0x32e   : > { %6107 = vmatprep.mubr.bf16.mxu1 %v7139_v15  ;;  %v4816_v15 = vshrl.u32 %v10447_v22, 16  ;;  %v4842_v57 = vrot.slane %v4840_v25, 4  ;;  %v4810_v31 = vrot.slane %v4809_v34, 4  ;;  %v7157_v25 = vcombine.low %v10421_v8, %v8395_v39 }
 0x330   : > { %v7781_v27 = vpop.f32.mrb[128].mxu0  ;;  %v4818_v19 = vrot.slane %v4816_v15, 4  ;;  %v4824_v15 = vrot.slane %v4822_v11, 5 }
 0x331   : > { %v7782_v46 = vpop.f32.mrb[129].mxu0 }
 0x332   : > { %v10453_v24 = vadd.f32 %v7782_v46, %v7781_v27  ;;  %v7784_v40 = vpop.f32.mrb[130].mxu0  ;;  %v4819_v37 = vor.u32 %v4818_v19, %v10459_v58  ;;  %v10475_v46 = vld [vmem:[#allocation2 + $0xa8] sm:$0xf]  ;;  %v4864_v19 = vshrl.u32 %v10479_v4, 16 }
 0x333   : > { %v7785_v10 = vpop.f32.mrb[131].mxu0  ;;  %v4851_v12 = vshrl.u32 %v10475_v46, 16  ;;  %v4854_v47 = vshll.u32 %v10475_v46, 16 }
 0x334   : > { %v10457_v17 = vadd.f32 %v7785_v10, %v7784_v40  ;;  %v4820_v41 = vrot.slane %v4819_v37, 4  ;;  %v4843_v10 = vor.u32 %v4842_v57, %v4838_v56  ;;  %v4866_v57 = vrot.slane %v4864_v19, 4 }
 0x335   : > { %6108 = vmatmul.mubr.bf16.gmra.mrb[124].mxu1 %v7131_v3  ;;  %v8393_v3 = vld [vmem:[#allocation2 + $0xa4] sm:$0x1]  ;;  %v7158_v19 = vcombine.low %v10441_v50, %v10447_v22 }
 0x336   : > { %6245 = vmatprep.mubr.bf16.mxu1 %v10227_v0  ;;  %v4829_v0 = vrot.slane %v4827_v30, 4  ;;  %v4846_v62 = vshll.u32 %v8393_v3, 16  ;;  %v4825_v2 = vsel %vm8848_vm8, %v4820_v41, %v4824_v15  ;;  %v4844_v37 = vrot.slane %v4843_v10, 4  ;;  %v10501_v3 = vld [vmem:[#allocation2 + $0xb8] sm:$0xf] }
 0x337   : > { %v4875_v15 = vshrl.u32 %v10493_v55, 16  ;;  %v4878_v10 = vshll.u32 %v10493_v55, 16 }
 0x338   : > { %v7787_v53 = vpop.f32.mrb[132].mxu0  ;;  %v4833_v40 = vor.u32 %v4832_v36, %v4829_v0  ;;  %v4848_v61 = vrot.slane %v4846_v62, 5  ;;  %v4853_v0 = vrot.slane %v4851_v12, 4  ;;  %v4862_v36 = vrot.slane %v4860_v29, 5 }
 0x339   : > { %v7788_v23 = vpop.f32.mrb[133].mxu0  ;;  %v4884_v62 = vshll.u32 %v10501_v3, 16  ;;  %v4888_v12 = vshrl.u32 %v10501_v3, 16 }
 0x33a   : > { %v10471_v13 = vadd.f32 %v7788_v23, %v7787_v53  ;;  %v7790_v7 = vpop.f32.mrb[134].mxu0  ;;  %v4815_v53 = vsel %vm8848_vm8, %v4810_v31, %v10459_v58  ;;  %v4834_v34 = vrot.slane %v4833_v40, 4  ;;  %v4849_v63 = vsel %vm8848_vm8, %v4844_v37, %v4848_v61  ;;  %v8396_v31 = vld [vmem:[#allocation2 + $0xb0] sm:$0x1] }
 0x33b   : > { %v7791_v27 = vpop.f32.mrb[135].mxu0  ;;  %v7166_v8 = vcombine.low %v4815_v53, %v4825_v2  ;;  %v4870_v41 = vshll.u32 %v8396_v31, 16  ;;  %v4877_v2 = vrot.slane %v4875_v15, 4  ;;  %v4886_v37 = vrot.slane %v4884_v62, 5  ;;  %v8399_v31 = vld [vmem:[#allocation2 + $0xc4] sm:$0xf] }
 0x33c   : > { %v10473_v14 = vadd.f32 %v7791_v27, %v7790_v7  ;;  %v4856_v7 = vrot.slane %v4854_v47, 5  ;;  %v4839_v58 = vsel %vm8848_vm8, %v4834_v34, %v4838_v56  ;;  %v4880_v34 = vrot.slane %v4878_v10, 5  ;;  %v8400_v62 = vld [vmem:[#allocation2 + $0xa0] sm:$0xf] }
 0x33d   : > { %6246 = vmatmul.mubr.bf16.vlgmr.msra.gmra.mrb[128].mxu1 %v7156_v38  ;;  %v4872_v53 = vrot.slane %v4870_v41, 5  ;;  %v4890_v61 = vrot.slane %v4888_v12, 4  ;;  %v4908_v41 = vshll.u32 %v8399_v31, 16  ;;  %v4912_v15 = vshrl.u32 %v8399_v31, 16 }
 0x33e   : > { %6253 = vmatprep.mubr.bf16.mxu1 %v7165_v5  ;;  %v4857_v38 = vor.u32 %v4856_v7, %v4853_v0  ;;  %v4867_v5 = vor.u32 %v4866_v57, %v4862_v36  ;;  %v4881_v22 = vor.u32 %v4880_v34, %v4877_v2  ;;  %v7159_v12 = vcombine.low %v10455_v6, %v8400_v62 }
 0x33f   : > { %v4891_v57 = vor.u32 %v4890_v61, %v4886_v37  ;;  %v4914_v2 = vrot.slane %v4912_v15, 4 }
 0x340   : > { %v7793_v30 = vpop.f32.mrb[136].mxu0  ;;  %v4858_v39 = vrot.slane %v4857_v38, 4 }
 0x341   : > { %v7794_v28 = vpop.f32.mrb[137].mxu0 }
 0x342   : > { %v10489_v51 = vadd.f32 %v7794_v28, %v7793_v30  ;;  %v7796_v23 = vpop.f32.mrb[138].mxu0  ;;  %v7167_v30 = vcombine.low %v4839_v58, %v4849_v63  ;;  %v4863_v0 = vsel %vm8848_vm8, %v4858_v39, %v4862_v36 }
 0x343   : > { %v7797_v11 = vpop.f32.mrb[139].mxu0 }
 0x344   : > { %v10491_v27 = vadd.f32 %v7797_v11, %v7796_v23  ;;  %v10511_v11 = vld [vmem:[#allocation2 + $0xc0] sm:$0xf] }
 0x345   : > { %6254 = vmatmul.mubr.bf16.gmra.mrb[132].mxu1 %v7157_v25  ;;  %v4868_v25 = vrot.slane %v4867_v5, 4  ;;  %v4899_v38 = vshrl.u32 %v10511_v11, 16  ;;  %v4902_v5 = vshll.u32 %v10511_v11, 16  ;;  %v7162_v54 = vcombine.low %v10511_v11, %v8399_v31 }
 0x346   : > { %6261 = vmatprep.mubr.bf16.mxu1 %v7166_v8  ;;  %v8398_v8 = vld [vmem:[#allocation2 + $0xbc] sm:$0x1] }
 0x347   : > { %v4873_v50 = vsel %vm8848_vm8, %v4868_v25, %v4872_v53  ;;  %v4894_v58 = vshll.u32 %v8398_v8, 16  ;;  %v4901_v39 = vrot.slane %v4899_v38, 4  ;;  %v4904_v25 = vrot.slane %v4902_v5, 5  ;;  %v8401_v8 = vld [vmem:[#allocation2 + $0xc8] sm:$0x1] }
 0x348   : > { %v7799_v40 = vpop.f32.mrb[140].mxu0  ;;  %v4910_v53 = vrot.slane %v4908_v41, 5  ;;  %v7160_v38 = vcombine.low %v10475_v46, %v10479_v4  ;;  %v7161_v4 = vcombine.low %v10493_v55, %v10501_v3  ;;  %v7163_v3 = vcombine.low %v10356_v49, %v10338_v35  ;;  %v8355_v49 = vld [vmem:[%s10978_s7] sm:$0xff]  }
 0x349   : > { %v7800_v47 = vpop.f32.mrb[141].mxu0  ;;  %8057 = vmatprep.subr.bf16.mxu1 %v8355_v49 }
 0x34a   : > { %v10505_v56 = vadd.f32 %v7800_v47, %v7799_v40  ;;  %v7802_v29 = vpop.f32.mrb[142].mxu0  ;;  %v7168_v47 = vcombine.low %v4863_v0, %v4873_v50  ;;  %v4905_v0 = vor.u32 %v4904_v25, %v4901_v39  ;;  %v4915_v50 = vor.u32 %v4914_v2, %v4910_v53  ;;  %8058 = vmatpush3.bf16.msra.mxu1 %v8355_v49 }
 0x34b   : > { %v7803_v28 = vpop.f32.mrb[143].mxu0 }
 0x34c   : > { %v10509_v23 = vadd.f32 %v7803_v28, %v7802_v29  ;;  %v4896_v28 = vrot.slane %v4894_v58, 5  ;;  %v4916_v15 = vrot.slane %v4915_v50, 4 }
 0x34d   : > { %6262 = vmatmul.mubr.bf16.gmra.mrb[136].mxu1 %v7158_v19  ;;  %v4882_v19 = vrot.slane %v4881_v22, 4  ;;  %v4918_v22 = vshll.u32 %v8401_v8, 16 }
 0x34e   : > { %6269 = vmatprep.mubr.bf16.mxu1 %v7167_v30  ;;  %v4892_v30 = vrot.slane %v4891_v57, 4 }
 0x34f   : > { %v4887_v61 = vsel %vm8848_vm8, %v4882_v19, %v4886_v37  ;;  %v4906_v37 = vrot.slane %v4905_v0, 4 }
 0x350   : > { %v7805_v7 = vpop.f32.mrb[144].mxu0  ;;  %v4897_v6 = vsel %vm8848_vm8, %v4892_v30, %v4896_v28 }
 0x351   : > { %v7806_v63 = vpop.f32.mrb[145].mxu0  ;;  %v7169_v41 = vcombine.low %v4887_v61, %v4897_v6 }
 0x352   : > { %v10519_v40 = vadd.f32 %v7806_v63, %v7805_v7  ;;  %v7808_v10 = vpop.f32.mrb[146].mxu0 }
 0x353   : > { %v7809_v36 = vpop.f32.mrb[147].mxu0 }
 0x354   : > { %v10522_v29 = vadd.f32 %v7809_v36, %v7808_v10  ;;  %v4920_v10 = vrot.slane %v4918_v22, 5 }
 0x355   : > { %6270 = vmatmul.mubr.bf16.gmra.mrb[140].mxu1 %v7159_v12  ;;  %v4911_v12 = vsel %vm8848_vm8, %v4906_v37, %v4910_v53  ;;  %v8358_v37 = vld [vmem:[%s10978_s7 + $0x18] sm:$0xff]  }
 0x356   : > { %6277 = vmatprep.mubr.bf16.mxu1 %v7168_v47  ;;  %v4921_v47 = vsel %vm8848_vm8, %v4916_v15, %v4920_v10  ;;  %v8359_v15 = vld [vmem:[%s10978_s7 + $0x20] sm:$0xff]   ;;  %v8360_v10 = vld [vmem:[%s10978_s7 + $0x28] sm:$0xff]  }
 0x357   : > { %v7170_v39 = vcombine.low %v4911_v12, %v4921_v47  ;;  %v10603_v12 = vld [vmem:[%s10979_s8] ss:$0 sm:$0xff] }
 0x358   : > { %v7811_v34 = vpop.f32.mrb[148].mxu0  ;;  %v10608_v47 = vld [vmem:[%s10980_s9] ss:$0 sm:$0xff] }
 0x359   : > { %v7812_v7 = vpop.f32.mrb[149].mxu0 }
 0x35a   : > { %v10528_v57 = vadd.f32 %v7812_v7, %v7811_v34  ;;  %v7814_v58 = vpop.f32.mrb[150].mxu0 }
 0x35b   : > { %v7815_v63 = vpop.f32.mrb[151].mxu0 }
 0x35c   : > { %v10532_v5 = vadd.f32 %v7815_v63, %v7814_v58 }
 0x35d   : > { %6278 = vmatmul.mubr.bf16.gmra.mrb[144].mxu1 %v7160_v38  ;;  %v8356_v38 = vld [vmem:[%s10978_s7 + $0x8] sm:$0xff]  }
 0x35e   : > { %6285 = vmatprep.mubr.bf16.mxu1 %v7169_v41  ;;  %8059 = vmatprep.subr.bf16.mxu1 %v8356_v38  ;;  %v8357_v41 = vld [vmem:[%s10978_s7 + $0x10] sm:$0xff]  }
 0x35f   : > { %8060 = vmatpush3.bf16.msra.mxu1 %v8356_v38  ;;  %v4053_v38 = vld [vmem:[%s8744_s23 + $0x18] sm:$0xff] }
 0x360   : > { %v7817_v36 = vpop.f32.mrb[152].mxu0  ;;  %8061 = vmatprep.subr.bf16.mxu1 %v8357_v41 }
 0x361   : > { %v7818_v62 = vpop.f32.mrb[153].mxu0 }
 0x362   : > { %v10538_v19 = vadd.f32 %v7818_v62, %v7817_v36  ;;  %v7820_v30 = vpop.f32.mrb[154].mxu0  ;;  %v8361_v36 = vld [vmem:[%s10978_s7 + $0x30] sm:$0xff]   ;;  %v8362_v62 = vld [vmem:[%s10978_s7 + $0x38] sm:$0xff]  }
 0x363   : > { %v7821_v46 = vpop.f32.mrb[155].mxu0  ;;  %8062 = vmatpush3.bf16.msra.mxu1 %v8357_v41 }
 0x364   : > { %v10542_v28 = vadd.f32 %v7821_v46, %v7820_v30  ;;  %8063 = vmatprep.subr.bf16.mxu1 %v8358_v37 }
 0x365   : > { %6286 = vmatmul.mubr.bf16.gmra.mrb[148].mxu1 %v7161_v4 }
 0x366   : > { %6293 = vmatprep.mubr.bf16.mxu1 %v7170_v39  ;;  %v4052_v39 = vld [vmem:[%s8744_s23 + $0x10] sm:$0xff] }
 0x367   : > { %8064 = vmatpush3.bf16.msra.mxu1 %v8358_v37 }
 0x368   : > { %v7823_v25 = vpop.f32.mrb[156].mxu0  ;;  %8065 = vmatprep.subr.bf16.mxu1 %v8359_v15 }
 0x369   : > { %v7824_v2 = vpop.f32.mrb[157].mxu0 }
 0x36a   : > { %v10544_v34 = vadd.f32 %v7824_v2, %v7823_v25  ;;  %v7826_v53 = vpop.f32.mrb[158].mxu0 }
 0x36b   : > { %v7827_v61 = vpop.f32.mrb[159].mxu0  ;;  %8066 = vmatpush3.bf16.msra.mxu1 %v8359_v15 }
 0x36c   : > { %v10547_v7 = vadd.f32 %v7827_v61, %v7826_v53  ;;  %8067 = vmatprep.subr.bf16.mxu1 %v8360_v10  ;;  %v4050_v61 = vld [vmem:[%s8744_s23] sm:$0xff] }
 0x36d   : > { %6294 = vmatmul.mubr.bf16.gmra.mrb[152].mxu1 %v7162_v54 }
 0x36e   : > { %6301 = vmatprep.mubr.bf16.mxu1 %v10378_v48 }
 0x36f   : > { %8068 = vmatpush3.bf16.msra.mxu1 %v8360_v10  ;;  %v4051_v10 = vld [vmem:[%s8744_s23 + $0x8] sm:$0xff] }
 0x370   : > { %v10550_v6 = vpop.f32.mrb[160].mxu0  ;;  %8069 = vmatprep.subr.bf16.mxu1 %v8361_v36 }
 0x371   : > { %v10552_v55 = vpop.f32.mrb[161].mxu0 }
 0x372   : > { %v10556_v0 = vpop.f32.mrb[162].mxu0 }
 0x373   : > { %v10558_v50 = vpop.f32.mrb[163].mxu0  ;;  %8070 = vmatpush3.bf16.msra.mxu1 %v8361_v36 }
 0x374   : > { %8071 = vmatprep.subr.bf16.mxu1 %v8362_v62 }
 0x375   : > { %6302 = vmatmul.mubr.bf16.gmra.mrb[156].mxu1 %v7163_v3 }
 0x377   : > { %8072 = vmatpush3.bf16.msra.mxu1 %v8362_v62 }
 0x378   : > { %v10560_v8 = vpop.f32.mrb[164].mxu0 }
 0x379   : > { %v10562_v11 = vpop.f32.mrb[165].mxu0 }
 0x37a   : > { %v10564_v31 = vpop.f32.mrb[166].mxu0 }
 0x37b   : > { %v10566_v22 = vpop.f32.mrb[167].mxu0 }
 0x380   : > { %v10568_v48 = vpop.f32.mrb[168].mxu0 }
 0x381   : > { %11057 = vst [vmem:[#allocation17_spill] sm:$0xff] %v10568_v48  ;;  %v10570_v58 = vpop.f32.mrb[169].mxu0 }
 0x382   : > { %v10572_v63 = vpop.f32.mrb[170].mxu0 }
 0x383   : > { %11058 = vst [vmem:[#allocation18_spill] sm:$0xff] %v10572_v63  ;;  %v10574_v35 = vpop.f32.mrb[171].mxu0 }
 0x3b0   : > { %v8011_v30 = vpop.f32.mrb[80].mxu1 }
 0x3b1   : > { %v4014_v46 = vmul.f32 %v8011_v30, %v10603_v12  ;;  %v3943_v4 = vpop.f32.mrb[81].mxu1 }
 0x3b2   : > { %v4012_v25 = vmul.f32 %v10603_v12, %v3943_v4  ;;  %v8012_v2 = vpop.f32.mrb[82].mxu1 }
 0x3b3   : > { %v4036_v53 = vadd.f32 %v10608_v47, %v4014_v46  ;;  %v4015_v54 = vmul.f32 %v8012_v2, %v10603_v12  ;;  %v3946_v3 = vpop.f32.mrb[83].mxu1 }
 0x3b4   : > { %v4034_v49 = vadd.f32 %v10608_v47, %v4012_v25  ;;  %v4013_v41 = vmul.f32 %v10603_v12, %v3946_v3 }
 0x3b5   : > { %v4068_v37 = vadd.f32 %v4052_v39, %v4036_v53  ;;  %v4037_v15 = vadd.f32 %v10608_v47, %v4015_v54 }
 0x3b6   : > { %v4066_v36 = vadd.f32 %v4050_v61, %v4034_v49  ;;  %v4035_v30 = vadd.f32 %v10608_v47, %v4013_v41  ;;  %v4056_v61 = vld [vmem:[%s8744_s23 + $0x30] sm:$0xff] }
 0x3b7   : > { %v4084_v46 = vmax.f32 %v4068_v37, 0.0  ;;  %v4069_v4 = vadd.f32 %v4053_v38, %v4037_v15  ;;  %v4054_v38 = vld [vmem:[%s8744_s23 + $0x20] sm:$0xff]  ;;  %v4057_v15 = vld [vmem:[%s8744_s23 + $0x38] sm:$0xff] }
 0x3b8   : > { %v4082_v2 = vmax.f32 %v4066_v36, 0.0  ;;  %v4067_v63 = vadd.f32 %v4051_v10, %v4035_v30  ;;  %v8015_v48 = vpop.f32.mrb[84].mxu1  ;;  %v4055_v30 = vld [vmem:[%s8744_s23 + $0x28] sm:$0xff] }
 0x3b9   : > { %4101 = vst.msk [vmem:[%s10624_s30 + $0x10] sm:$0xff] %vm554_vm0, %v4084_v46  ;;  %v4085_v62 = vmax.f32 %v4069_v4, 0.0  ;;  %v4018_v39 = vmul.f32 %v8015_v48, %v10603_v12  ;;  %v3959_v25 = vpop.f32.mrb[85].mxu1 }
 0x3ba   : > { %4099 = vst.msk [vmem:[%s10624_s30] sm:$0xff] %vm554_vm0, %v4082_v2  ;;  %v4083_v53 = vmax.f32 %v4067_v63, 0.0  ;;  %v4016_v54 = vmul.f32 %v10603_v12, %v3959_v25  ;;  %v8016_v3 = vpop.f32.mrb[86].mxu1 }
 0x3bb   : > { %4102 = vst.msk [vmem:[%s10624_s30 + $0x18] sm:$0xff] %vm554_vm0, %v4085_v62  ;;  %v4040_v49 = vadd.f32 %v10608_v47, %v4018_v39  ;;  %v4019_v41 = vmul.f32 %v8016_v3, %v10603_v12  ;;  %v3962_v37 = vpop.f32.mrb[87].mxu1 }
 0x3bc   : > { %4100 = vst.msk [vmem:[%s10624_s30 + $0x8] sm:$0xff] %vm554_vm0, %v4083_v53  ;;  %v4038_v48 = vadd.f32 %v10608_v47, %v4016_v54  ;;  %v4017_v63 = vmul.f32 %v10603_v12, %v3962_v37 }
 0x3bd   : > { %v4072_v10 = vadd.f32 %v4056_v61, %v4040_v49  ;;  %v4041_v36 = vadd.f32 %v10608_v47, %v4019_v41 }
 0x3be   : > { %v4070_v46 = vadd.f32 %v4054_v38, %v4038_v48  ;;  %v4039_v4 = vadd.f32 %v10608_v47, %v4017_v63  ;;  %v4060_v38 = vld [vmem:[%s8744_s23 + $0x50] sm:$0xff] }
 0x3bf   : > { %v4088_v2 = vmax.f32 %v4072_v10, 0.0  ;;  %v4073_v62 = vadd.f32 %v4057_v15, %v4041_v36  ;;  %v4058_v15 = vld [vmem:[%s8744_s23 + $0x40] sm:$0xff] }
 0x3c0   : > { %v4086_v39 = vmax.f32 %v4070_v46, 0.0  ;;  %v4071_v25 = vadd.f32 %v4055_v30, %v4039_v4  ;;  %v8019_v53 = vpop.f32.mrb[88].mxu1  ;;  %v4061_v30 = vld [vmem:[%s8744_s23 + $0x58] sm:$0xff] }
 0x3c1   : > { %4105 = vst.msk [vmem:[%s10624_s30 + $0x30] sm:$0xff] %vm554_vm0, %v4088_v2  ;;  %v4089_v54 = vmax.f32 %v4073_v62, 0.0  ;;  %v4022_v61 = vmul.f32 %v8019_v53, %v10603_v12  ;;  %v3975_v3 = vpop.f32.mrb[89].mxu1  ;;  %v4059_v62 = vld [vmem:[%s8744_s23 + $0x48] sm:$0xff] }
 0x3c2   : > { %4103 = vst.msk [vmem:[%s10624_s30 + $0x20] sm:$0xff] %vm554_vm0, %v4086_v39  ;;  %v4087_v49 = vmax.f32 %v4071_v25, 0.0  ;;  %v4020_v41 = vmul.f32 %v10603_v12, %v3975_v3  ;;  %v8020_v37 = vpop.f32.mrb[90].mxu1 }
 0x3c3   : > { %4106 = vst.msk [vmem:[%s10624_s30 + $0x38] sm:$0xff] %vm554_vm0, %v4089_v54  ;;  %v4044_v48 = vadd.f32 %v10608_v47, %v4022_v61  ;;  %v4023_v63 = vmul.f32 %v8020_v37, %v10603_v12  ;;  %v3978_v10 = vpop.f32.mrb[91].mxu1 }
 0x3c4   : > { %4104 = vst.msk [vmem:[%s10624_s30 + $0x28] sm:$0xff] %vm554_vm0, %v4087_v49  ;;  %v4042_v36 = vadd.f32 %v10608_v47, %v4020_v41  ;;  %v4021_v46 = vmul.f32 %v10603_v12, %v3978_v10 }
 0x3c5   : > { %v4076_v4 = vadd.f32 %v4060_v38, %v4044_v48  ;;  %v4045_v2 = vadd.f32 %v10608_v47, %v4023_v63 }
 0x3c6   : > { %v4074_v39 = vadd.f32 %v4058_v15, %v4042_v36  ;;  %v4043_v25 = vadd.f32 %v10608_v47, %v4021_v46  ;;  %v4064_v15 = vld [vmem:[%s8744_s23 + $0x70] sm:$0xff] }
 0x3c7   : > { %v4092_v53 = vmax.f32 %v4076_v4, 0.0  ;;  %v4077_v54 = vadd.f32 %v4061_v30, %v4045_v2  ;;  %v4062_v30 = vld [vmem:[%s8744_s23 + $0x60] sm:$0xff] }
 0x3c8   : > { %v4090_v61 = vmax.f32 %v4074_v39, 0.0  ;;  %v4075_v3 = vadd.f32 %v4059_v62, %v4043_v25  ;;  %v8023_v49 = vpop.f32.mrb[92].mxu1  ;;  %v4065_v62 = vld [vmem:[%s8744_s23 + $0x78] sm:$0xff] }
 0x3c9   : > { %4109 = vst.msk [vmem:[%s10624_s30 + $0x50] sm:$0xff] %vm554_vm0, %v4092_v53  ;;  %v4093_v41 = vmax.f32 %v4077_v54, 0.0  ;;  %v4026_v38 = vmul.f32 %v8023_v49, %v10603_v12  ;;  %v3991_v37 = vpop.f32.mrb[93].mxu1  ;;  %v4063_v54 = vld [vmem:[%s8744_s23 + $0x68] sm:$0xff] }
 0x3ca   : > { %4107 = vst.msk [vmem:[%s10624_s30 + $0x40] sm:$0xff] %vm554_vm0, %v4090_v61  ;;  %v4091_v48 = vmax.f32 %v4075_v3, 0.0  ;;  %v4024_v63 = vmul.f32 %v10603_v12, %v3991_v37  ;;  %v8024_v10 = vpop.f32.mrb[94].mxu1 }
 0x3cb   : > { %4110 = vst.msk [vmem:[%s10624_s30 + $0x58] sm:$0xff] %vm554_vm0, %v4093_v41  ;;  %v4048_v36 = vadd.f32 %v10608_v47, %v4026_v38  ;;  %v4027_v46 = vmul.f32 %v8024_v10, %v10603_v12  ;;  %v3994_v4 = vpop.f32.mrb[95].mxu1 }
 0x3cc   : > { %4108 = vst.msk [vmem:[%s10624_s30 + $0x48] sm:$0xff] %vm554_vm0, %v4091_v48  ;;  %v4046_v2 = vadd.f32 %v10608_v47, %v4024_v63  ;;  %v4025_v39 = vmul.f32 %v10603_v12, %v3994_v4 }
 0x3cd   : > { %v4080_v25 = vadd.f32 %v4064_v15, %v4048_v36  ;;  %v4049_v53 = vadd.f32 %v10608_v47, %v4027_v46 }
 0x3ce   : > { %v4078_v61 = vadd.f32 %v4062_v30, %v4046_v2  ;;  %v4047_v3 = vadd.f32 %v10608_v47, %v4025_v39 }
 0x3cf   : > { %v4096_v49 = vmax.f32 %v4080_v25, 0.0  ;;  %v4081_v41 = vadd.f32 %v4065_v62, %v4049_v53  ;;  %v10695_v62 = vpop.f32.mrb[172].mxu0 }
 0x3d0   : > { %v4094_v38 = vmax.f32 %v4078_v61, 0.0  ;;  %v4079_v37 = vadd.f32 %v4063_v54, %v4047_v3  ;;  %v7717_v48 = vpop.f32.mrb[96].mxu1  ;;  %v10701_v53 = vpop.f32.mrb[173].mxu0 }
 0x3d1   : > { %4113 = vst.msk [vmem:[%s10624_s30 + $0x70] sm:$0xff] %vm554_vm0, %v4096_v49  ;;  %v4097_v63 = vmax.f32 %v4081_v41, 0.0  ;;  %v7718_v10 = vpop.f32.mrb[97].mxu1  ;;  %v10703_v54 = vpop.f32.mrb[174].mxu0 }
 0x3d2   : > { %4111 = vst.msk [vmem:[%s10624_s30 + $0x60] sm:$0xff] %vm554_vm0, %v4094_v38  ;;  %v4095_v15 = vmax.f32 %v4079_v37, 0.0  ;;  %v7719_v36 = vadd.f32 %v7718_v10, %v7717_v48  ;;  %v7720_v46 = vpop.f32.mrb[98].mxu1  ;;  %v10708_v49 = vpop.f32.mrb[175].mxu0 }
 0x3d3   : > { %4114 = vst.msk [vmem:[%s10624_s30 + $0x78] sm:$0xff] %vm554_vm0, %v4097_v63  ;;  %v7721_v30 = vpop.f32.mrb[99].mxu1 }
 0x3d4   : > { %4112 = vst.msk [vmem:[%s10624_s30 + $0x68] sm:$0xff] %vm554_vm0, %v4095_v15  ;;  %v6054_v4 = vadd.f32 %v7719_v36, %v10330_v16  ;;  %v7722_v2 = vadd.f32 %v7721_v30, %v7720_v46 }
 0x3d6   : > { %v6057_v39 = vadd.f32 %v7722_v2, %v10332_v26  ;;  %v10699_v25 = vadd.f32 %v10453_v24, %v6054_v4 }
 0x3d8   : > { %v7723_v61 = vpop.f32.mrb[100].mxu1  ;;  %v10706_v3 = vadd.f32 %v10457_v17, %v6057_v39 }
 0x3d9   : > { %v7724_v41 = vpop.f32.mrb[101].mxu1 }
 0x3da   : > { %v7725_v16 = vadd.f32 %v7724_v41, %v7723_v61  ;;  %v7726_v38 = vpop.f32.mrb[102].mxu1 }
 0x3db   : > { %v7727_v37 = vpop.f32.mrb[103].mxu1 }
 0x3dc   : > { %v6062_v48 = vadd.f32 %v7725_v16, %v10347_v59  ;;  %v7728_v26 = vadd.f32 %v7727_v37, %v7726_v38 }
 0x3de   : > { %v6065_v24 = vadd.f32 %v7728_v26, %v10351_v60  ;;  %v10713_v63 = vadd.f32 %v10471_v13, %v6062_v48 }
 0x3e0   : > { %v7729_v10 = vpop.f32.mrb[104].mxu1  ;;  %v10716_v15 = vadd.f32 %v10473_v14, %v6065_v24 }
 0x3e1   : > { %v7730_v17 = vpop.f32.mrb[105].mxu1 }
 0x3e2   : > { %v7731_v36 = vadd.f32 %v7730_v17, %v7729_v10  ;;  %v7732_v46 = vpop.f32.mrb[106].mxu1 }
 0x3e3   : > { %v7733_v30 = vpop.f32.mrb[107].mxu1 }
 0x3e4   : > { %v6070_v4 = vadd.f32 %v7731_v36, %v10364_v18  ;;  %v7734_v2 = vadd.f32 %v7733_v30, %v7732_v46 }
 0x3e6   : > { %v6073_v39 = vadd.f32 %v7734_v2, %v10370_v52  ;;  %v10721_v59 = vadd.f32 %v10489_v51, %v6070_v4 }
 0x3e8   : > { %v7735_v60 = vpop.f32.mrb[108].mxu1  ;;  %v10724_v13 = vadd.f32 %v10491_v27, %v6073_v39 }
 0x3e9   : > { %v7736_v61 = vpop.f32.mrb[109].mxu1 }
 0x3ea   : > { %v7737_v41 = vadd.f32 %v7736_v61, %v7735_v60  ;;  %v7738_v14 = vpop.f32.mrb[110].mxu1 }
 0x3eb   : > { %v7739_v16 = vpop.f32.mrb[111].mxu1 }
 0x3ec   : > { %v6078_v38 = vadd.f32 %v7737_v41, %v10384_v42  ;;  %v7740_v37 = vadd.f32 %v7739_v16, %v7738_v14 }
 0x3ee   : > { %v6081_v48 = vadd.f32 %v7740_v37, %v10386_v44  ;;  %v10729_v18 = vadd.f32 %v10505_v56, %v6078_v38 }
 0x3f0   : > { %v7741_v52 = vpop.f32.mrb[112].mxu1  ;;  %v10732_v51 = vadd.f32 %v10509_v23, %v6081_v48 }
 0x3f1   : > { %v7742_v26 = vpop.f32.mrb[113].mxu1 }
 0x3f2   : > { %v7743_v24 = vadd.f32 %v7742_v26, %v7741_v52  ;;  %v7744_v27 = vpop.f32.mrb[114].mxu1 }
 0x3f3   : > { %v7745_v10 = vpop.f32.mrb[115].mxu1 }
 0x3f4   : > { %v6086_v17 = vadd.f32 %v7743_v24, %v10395_v45  ;;  %v7746_v36 = vadd.f32 %v7745_v10, %v7744_v27 }
 0x3f6   : > { %v6089_v46 = vadd.f32 %v7746_v36, %v10397_v1  ;;  %v10737_v42 = vadd.f32 %v10519_v40, %v6086_v17 }
 0x3f8   : > { %v7747_v44 = vpop.f32.mrb[116].mxu1  ;;  %v10740_v56 = vadd.f32 %v10522_v29, %v6089_v46 }
 0x3f9   : > { %v7748_v30 = vpop.f32.mrb[117].mxu1 }
 0x3fa   : > { %v7749_v4 = vadd.f32 %v7748_v30, %v7747_v44  ;;  %v7750_v23 = vpop.f32.mrb[118].mxu1 }
 0x3fb   : > { %v7751_v2 = vpop.f32.mrb[119].mxu1 }
 0x3fc   : > { %v6094_v39 = vadd.f32 %v7749_v4, %v10406_v9  ;;  %v7752_v60 = vadd.f32 %v7751_v2, %v7750_v23 }
 0x3fe   : > { %v6097_v61 = vadd.f32 %v7752_v60, %v10408_v33  ;;  %v10745_v45 = vadd.f32 %v10528_v57, %v6094_v39 }
 0x400   : > { %v7753_v1 = vpop.f32.mrb[120].mxu1  ;;  %v10748_v40 = vadd.f32 %v10532_v5, %v6097_v61 }
 0x401   : > { %v7754_v41 = vpop.f32.mrb[121].mxu1 }
 0x402   : > { %v7755_v14 = vadd.f32 %v7754_v41, %v7753_v1  ;;  %v7756_v29 = vpop.f32.mrb[122].mxu1 }
 0x403   : > { %v7757_v16 = vpop.f32.mrb[123].mxu1 }
 0x404   : > { %v6102_v38 = vadd.f32 %v7755_v14, %v10417_v43  ;;  %v7758_v37 = vadd.f32 %v7757_v16, %v7756_v29 }
 0x406   : > { %v6105_v48 = vadd.f32 %v7758_v37, %v10419_v21  ;;  %v10753_v9 = vadd.f32 %v10538_v19, %v6102_v38 }
 0x408   : > { %v7759_v33 = vpop.f32.mrb[124].mxu1  ;;  %v10756_v57 = vadd.f32 %v10542_v28, %v6105_v48 }
 0x409   : > { %v7760_v52 = vpop.f32.mrb[125].mxu1 }
 0x40a   : > { %v7761_v26 = vadd.f32 %v7760_v52, %v7759_v33  ;;  %v7762_v5 = vpop.f32.mrb[126].mxu1 }
 0x40b   : > { %v7763_v24 = vpop.f32.mrb[127].mxu1 }
 0x40c   : > { %v6110_v27 = vadd.f32 %v7761_v26, %v10434_v20  ;;  %v7764_v10 = vadd.f32 %v7763_v24, %v7762_v5 }
 0x40e   : > { %v6113_v17 = vadd.f32 %v7764_v10, %v10436_v32  ;;  %v10761_v43 = vadd.f32 %v10544_v34, %v6110_v27  ;;  %v10772_v32 = vld [vmem:[%s10976_s5] ss:$0 sm:$0xff] }
 0x410   : > { %v7845_v21 = vpop.f32.mrb[128].mxu1  ;;  %v10764_v19 = vadd.f32 %v10547_v7, %v6113_v17 }
 0x411   : > { %v7846_v36 = vpop.f32.mrb[129].mxu1 }
 0x412   : > { %v7847_v46 = vadd.f32 %v7846_v36, %v7845_v21  ;;  %v7848_v28 = vpop.f32.mrb[130].mxu1 }
 0x413   : > { %v7849_v44 = vpop.f32.mrb[131].mxu1 }
 0x414   : > { %v6248_v30 = vadd.f32 %v7847_v46, %v10699_v25  ;;  %v7850_v4 = vadd.f32 %v7849_v44, %v7848_v28 }
 0x416   : > { %v6345_v23 = vadd.f32 %v10552_v55, %v6248_v30  ;;  %v6251_v20 = vadd.f32 %v7850_v4, %v10706_v3  ;;  %v10780_v55 = vld [vmem:[%s10977_s6] ss:$0 sm:$0xff] }
 0x418   : > { %v6407_v34 = vmul.f32 %v10772_v32, %v6345_v23  ;;  %v6348_v7 = vadd.f32 %v10558_v50, %v6251_v20  ;;  %v7851_v2 = vpop.f32.mrb[132].mxu1 }
 0x419   : > { %v7852_v39 = vpop.f32.mrb[133].mxu1 }
 0x41a   : > { %v6408_v60 = vmul.f32 %v10772_v32, %v6348_v7  ;;  %v7853_v61 = vadd.f32 %v7852_v39, %v7851_v2  ;;  %v7854_v25 = vpop.f32.mrb[134].mxu1  ;;  %v6423_v3 = vadd.f32 %v10780_v55, %v6407_v34 }
 0x41b   : > { %v7855_v1 = vpop.f32.mrb[135].mxu1 }
 0x41c   : > { %v6256_v41 = vadd.f32 %v7853_v61, %v10713_v63  ;;  %v7856_v14 = vadd.f32 %v7855_v1, %v7854_v25  ;;  %v6424_v29 = vadd.f32 %v10780_v55, %v6408_v60  ;;  %v6439_v38 = vmax.f32 %v6423_v3, 0.0 }
 0x41e   : > { %v6353_v50 = vadd.f32 %v10550_v6, %v6256_v41  ;;  %v6259_v16 = vadd.f32 %v7856_v14, %v10716_v15  ;;  %v6440_v37 = vmax.f32 %v6424_v29, 0.0 }
 0x420   : > { %v6409_v48 = vmul.f32 %v10772_v32, %v6353_v50  ;;  %v6356_v33 = vadd.f32 %v10556_v0, %v6259_v16  ;;  %v7857_v52 = vpop.f32.mrb[136].mxu1  ;;  %v6455_v26 = vpack.c.bf16 %v6440_v37, %v6439_v38 }
 0x421   : > { %v7858_v5 = vpop.f32.mrb[137].mxu1 }
 0x422   : > { %v6425_v24 = vadd.f32 %v10780_v55, %v6409_v48  ;;  %v6410_v63 = vmul.f32 %v10772_v32, %v6356_v33  ;;  %v7859_v27 = vadd.f32 %v7858_v5, %v7857_v52  ;;  %v7860_v10 = vpop.f32.mrb[138].mxu1  ;;  %8073 = vmatprep.mubr.bf16.mxu1 %v6455_v26 }
 0x423   : > { %v7861_v17 = vpop.f32.mrb[139].mxu1 }
 0x424   : > { %v6426_v6 = vadd.f32 %v10780_v55, %v6410_v63  ;;  %v6264_v15 = vadd.f32 %v7859_v27, %v10721_v59  ;;  %v7862_v21 = vadd.f32 %v7861_v17, %v7860_v10  ;;  %v6441_v36 = vmax.f32 %v6425_v24, 0.0 }
 0x426   : > { %v6442_v46 = vmax.f32 %v6426_v6, 0.0  ;;  %v6361_v0 = vadd.f32 %v10562_v11, %v6264_v15  ;;  %v6267_v28 = vadd.f32 %v7862_v21, %v10724_v13 }
 0x428   : > { %v6456_v44 = vpack.c.bf16 %v6442_v46, %v6441_v36  ;;  %v6411_v30 = vmul.f32 %v10772_v32, %v6361_v0  ;;  %v6364_v4 = vadd.f32 %v10566_v22, %v6267_v28  ;;  %v7863_v23 = vpop.f32.mrb[140].mxu1  ;;  %v11059_v0 = vld [vmem:[#allocation17_spill] sm:$0xff] }
 0x429   : > { %v7864_v20 = vpop.f32.mrb[141].mxu1 }
 0x42a   : > { %v6412_v34 = vmul.f32 %v10772_v32, %v6364_v4  ;;  %v7865_v7 = vadd.f32 %v7864_v20, %v7863_v23  ;;  %v7866_v2 = vpop.f32.mrb[142].mxu1  ;;  %8074 = vmatmul.mubr.bf16.vlgmr.msra.gmra.mrb[160].mxu1 %v6456_v44  ;;  %v6427_v59 = vadd.f32 %v10780_v55, %v6411_v30  ;;  %v11060_v23 = vld [vmem:[#allocation18_spill] sm:$0xff] }
 0x42b   : > { %v7867_v39 = vpop.f32.mrb[143].mxu1 }
 0x42c   : > { %v6272_v60 = vadd.f32 %v7865_v7, %v10729_v18  ;;  %v7868_v11 = vadd.f32 %v7867_v39, %v7866_v2  ;;  %v6428_v13 = vadd.f32 %v10780_v55, %v6412_v34  ;;  %v6443_v22 = vmax.f32 %v6427_v59, 0.0 }
 0x42e   : > { %v6369_v61 = vadd.f32 %v10560_v8, %v6272_v60  ;;  %v6275_v25 = vadd.f32 %v7868_v11, %v10732_v51  ;;  %v6444_v3 = vmax.f32 %v6428_v13, 0.0 }
 0x430   : > { %v6413_v1 = vmul.f32 %v10772_v32, %v6369_v61  ;;  %v6372_v41 = vadd.f32 %v10564_v31, %v6275_v25  ;;  %v7869_v14 = vpop.f32.mrb[144].mxu1  ;;  %v6457_v29 = vpack.c.bf16 %v6444_v3, %v6443_v22 }
 0x431   : > { %v7870_v50 = vpop.f32.mrb[145].mxu1 }
 0x432   : > { %v6414_v16 = vmul.f32 %v10772_v32, %v6372_v41  ;;  %v7871_v38 = vadd.f32 %v7870_v50, %v7869_v14  ;;  %v7872_v18 = vpop.f32.mrb[146].mxu1  ;;  %8077 = vmatprep.mubr.bf16.mxu1 %v6457_v29  ;;  %v6429_v37 = vadd.f32 %v10780_v55, %v6413_v1 }
 0x433   : > { %v7873_v48 = vpop.f32.mrb[147].mxu1 }
 0x434   : > { %v6280_v8 = vadd.f32 %v7871_v38, %v10737_v42  ;;  %v7874_v51 = vadd.f32 %v7873_v48, %v7872_v18  ;;  %v6430_v33 = vadd.f32 %v10780_v55, %v6414_v16  ;;  %v6445_v26 = vmax.f32 %v6429_v37, 0.0 }
 0x436   : > { %v6377_v52 = vadd.f32 %v10570_v58, %v6280_v8  ;;  %v6283_v31 = vadd.f32 %v7874_v51, %v10740_v56  ;;  %v6446_v5 = vmax.f32 %v6430_v33, 0.0 }
 0x438   : > { %v6415_v24 = vmul.f32 %v10772_v32, %v6377_v52  ;;  %v6380_v63 = vadd.f32 %v10574_v35, %v6283_v31  ;;  %v7875_v27 = vpop.f32.mrb[148].mxu1  ;;  %v6458_v10 = vpack.c.bf16 %v6446_v5, %v6445_v26 }
 0x439   : > { %v7876_v17 = vpop.f32.mrb[149].mxu1 }
 0x43a   : > { %v6416_v6 = vmul.f32 %v10772_v32, %v6380_v63  ;;  %v7877_v15 = vadd.f32 %v7876_v17, %v7875_v27  ;;  %v7878_v42 = vpop.f32.mrb[150].mxu1  ;;  %8078 = vmatmul.mubr.bf16.gmra.mrb[164].mxu1 %v6458_v10  ;;  %v6431_v21 = vadd.f32 %v10780_v55, %v6415_v24 }
 0x43b   : > { %v7879_v36 = vpop.f32.mrb[151].mxu1 }
 0x43c   : > { %v6288_v58 = vadd.f32 %v7877_v15, %v10745_v45  ;;  %v7880_v56 = vadd.f32 %v7879_v36, %v7878_v42  ;;  %v6432_v46 = vadd.f32 %v10780_v55, %v6416_v6  ;;  %v6447_v44 = vmax.f32 %v6431_v21, 0.0  ;;  %v7260_v21 = vld [vmem:[%s8744_s23 + $0x80] sm:$0xff] }
 0x43e   : > { %v6385_v28 = vadd.f32 %v11059_v0, %v6288_v58  ;;  %v6291_v35 = vadd.f32 %v7880_v56, %v10748_v40  ;;  %v6448_v30 = vmax.f32 %v6432_v46, 0.0  ;;  %v7263_v56 = vld [vmem:[%s8744_s23 + $0x98] sm:$0xff] }
 0x440   : > { %v6417_v4 = vmul.f32 %v10772_v32, %v6385_v28  ;;  %v6388_v20 = vadd.f32 %v11060_v23, %v6291_v35  ;;  %v7881_v34 = vpop.f32.mrb[152].mxu1  ;;  %v6459_v7 = vpack.c.bf16 %v6448_v30, %v6447_v44  ;;  %v7261_v35 = vld [vmem:[%s8744_s23 + $0x88] sm:$0xff] }
 0x441   : > { %v7882_v2 = vpop.f32.mrb[153].mxu1 }
 0x442   : > { %v6418_v59 = vmul.f32 %v10772_v32, %v6388_v20  ;;  %v7883_v39 = vadd.f32 %v7882_v2, %v7881_v34  ;;  %v7884_v45 = vpop.f32.mrb[154].mxu1  ;;  %8081 = vmatprep.mubr.bf16.mxu1 %v6459_v7  ;;  %v6433_v60 = vadd.f32 %v10780_v55, %v6417_v4 }
 0x443   : > { %v7885_v11 = vpop.f32.mrb[155].mxu1 }
 0x444   : > { %v7886_v13 = vadd.f32 %v7885_v11, %v7884_v45  ;;  %v6296_v40 = vadd.f32 %v7883_v39, %v10753_v9  ;;  %v6434_v61 = vadd.f32 %v10780_v55, %v6418_v59  ;;  %v6449_v3 = vmax.f32 %v6433_v60, 0.0  ;;  %v7266_v60 = vld [vmem:[%s8744_s23 + $0xb0] sm:$0xff] }
 0x446   : > { %v6393_v25 = vadd.f32 %v10701_v53, %v6296_v40  ;;  %v6299_v22 = vadd.f32 %v7886_v13, %v10756_v57  ;;  %v6450_v1 = vmax.f32 %v6434_v61, 0.0  ;;  %v7264_v61 = vld [vmem:[%s8744_s23 + $0xa0] sm:$0xff] }
 0x448   : > { %v6419_v41 = vmul.f32 %v10772_v32, %v6393_v25  ;;  %v6396_v14 = vadd.f32 %v10708_v49, %v6299_v22  ;;  %v7887_v29 = vpop.f32.mrb[156].mxu1  ;;  %v6460_v50 = vpack.c.bf16 %v6450_v1, %v6449_v3  ;;  %v7267_v1 = vld [vmem:[%s8744_s23 + $0xb8] sm:$0xff] }
 0x449   : > { %v7888_v16 = vpop.f32.mrb[157].mxu1 }
 0x44a   : > { %v6435_v38 = vadd.f32 %v10780_v55, %v6419_v41  ;;  %v6420_v18 = vmul.f32 %v10772_v32, %v6396_v14  ;;  %v7889_v9 = vadd.f32 %v7888_v16, %v7887_v29  ;;  %v7890_v37 = vpop.f32.mrb[158].mxu1  ;;  %8082 = vmatmul.mubr.bf16.gmra.mrb[168].mxu1 %v6460_v50  ;;  %v7265_v50 = vld [vmem:[%s8744_s23 + $0xa8] sm:$0xff] }
 0x44b   : > { %v7891_v48 = vpop.f32.mrb[159].mxu1 }
 0x44c   : > { %v6436_v53 = vadd.f32 %v10780_v55, %v6420_v18  ;;  %v6304_v57 = vadd.f32 %v7889_v9, %v10761_v43  ;;  %v7892_v8 = vadd.f32 %v7891_v48, %v7890_v37  ;;  %v6451_v51 = vmax.f32 %v6435_v38, 0.0 }
 0x44e   : > { %v6452_v33 = vmax.f32 %v6436_v53, 0.0  ;;  %v6401_v49 = vadd.f32 %v10695_v62, %v6304_v57  ;;  %v6307_v52 = vadd.f32 %v7892_v8, %v10764_v19 }
 0x450   : > { %v6421_v31 = vmul.f32 %v10772_v32, %v6401_v49  ;;  %v6404_v26 = vadd.f32 %v10703_v54, %v6307_v52  ;;  %v6461_v5 = vpack.c.bf16 %v6452_v33, %v6451_v51  ;;  %v7262_v54 = vld [vmem:[%s8744_s23 + $0x90] sm:$0xff] }
 0x451   : > { %v7270_v49 = vld [vmem:[%s8744_s23 + $0xd0] sm:$0xff] }
 0x452   : > { %v6422_v24 = vmul.f32 %v10772_v32, %v6404_v26  ;;  %8085 = vmatprep.mubr.bf16.mxu1 %v6461_v5  ;;  %v6437_v63 = vadd.f32 %v10780_v55, %v6421_v31  ;;  %v7268_v5 = vld [vmem:[%s8744_s23 + $0xc0] sm:$0xff] }
 0x454   : > { %v6438_v43 = vadd.f32 %v10780_v55, %v6422_v24  ;;  %v6453_v27 = vmax.f32 %v6437_v63, 0.0 }
 0x456   : > { %v6454_v10 = vmax.f32 %v6438_v43, 0.0 }
 0x458   : > { %v6462_v62 = vpack.c.bf16 %v6454_v10, %v6453_v27  ;;  %v7271_v27 = vld [vmem:[%s8744_s23 + $0xd8] sm:$0xff] }
 0x45a   : > { %8086 = vmatmul.mubr.bf16.gmra.mrb[172].mxu1 %v6462_v62 }
 0x4fd   : > { %v8075_v19 = vpop.f32.mrb[160].mxu1 }
 0x4fe   : > { %v6626_v17 = vmul.f32 %v8075_v19, %v10603_v12  ;;  %v6561_v6 = vpop.f32.mrb[161].mxu1 }
 0x4ff   : > { %v6624_v15 = vmul.f32 %v10603_v12, %v6561_v6  ;;  %v8076_v42 = vpop.f32.mrb[162].mxu1 }
 0x500   : > { %v6642_v32 = vadd.f32 %v10608_v47, %v6626_v17  ;;  %v6627_v55 = vmul.f32 %v8076_v42, %v10603_v12  ;;  %v6564_v36 = vpop.f32.mrb[163].mxu1  ;;  %v7269_v17 = vld [vmem:[%s8744_s23 + $0xc8] sm:$0xff] }
 0x501   : > { %v6640_v58 = vadd.f32 %v10608_v47, %v6624_v15  ;;  %v6625_v46 = vmul.f32 %v10603_v12, %v6564_v36 }
 0x502   : > { %v6674_v0 = vadd.f32 %v7262_v54, %v6642_v32  ;;  %v6643_v28 = vadd.f32 %v10608_v47, %v6627_v55 }
 0x503   : > { %v6672_v44 = vadd.f32 %v7260_v21, %v6640_v58  ;;  %v6641_v30 = vadd.f32 %v10608_v47, %v6625_v46 }
 0x504   : > { %v6690_v4 = vmax.f32 %v6674_v0, 0.0  ;;  %v6675_v23 = vadd.f32 %v7263_v56, %v6643_v28  ;;  %v7274_v0 = vld [vmem:[%s8744_s23 + $0xf0] sm:$0xff] }
 0x505   : > { %v6688_v20 = vmax.f32 %v6672_v44, 0.0  ;;  %v6673_v34 = vadd.f32 %v7261_v35, %v6641_v30  ;;  %v7272_v30 = vld [vmem:[%s8744_s23 + $0xe0] sm:$0xff] }
 0x506   : > { %7278 = vst.msk [vmem:[%s10624_s30 + $0x90] sm:$0xff] %vm554_vm0, %v6690_v4  ;;  %v6691_v7 = vmax.f32 %v6675_v23, 0.0 }
 0x507   : > { %7276 = vst.msk [vmem:[%s10624_s30 + $0x80] sm:$0xff] %vm554_vm0, %v6688_v20  ;;  %v6689_v2 = vmax.f32 %v6673_v34, 0.0  ;;  %v7275_v34 = vld [vmem:[%s8744_s23 + $0xf8] sm:$0xff] }
 0x508   : > { %7279 = vst.msk [vmem:[%s10624_s30 + $0x98] sm:$0xff] %vm554_vm0, %v6691_v7 }
 0x509   : > { %7277 = vst.msk [vmem:[%s10624_s30 + $0x88] sm:$0xff] %vm554_vm0, %v6689_v2 }
 0x50d   : > { %v8079_v59 = vpop.f32.mrb[164].mxu1 }
 0x50e   : > { %v6630_v39 = vmul.f32 %v8079_v59, %v10603_v12  ;;  %v6577_v45 = vpop.f32.mrb[165].mxu1 }
 0x50f   : > { %v6628_v11 = vmul.f32 %v10603_v12, %v6577_v45  ;;  %v8080_v13 = vpop.f32.mrb[166].mxu1 }
 0x510   : > { %v6646_v40 = vadd.f32 %v10608_v47, %v6630_v39  ;;  %v6631_v25 = vmul.f32 %v8080_v13, %v10603_v12  ;;  %v6580_v22 = vpop.f32.mrb[167].mxu1  ;;  %v7273_v39 = vld [vmem:[%s8744_s23 + $0xe8] sm:$0xff]  ;;  %s8462_s23 = scalar_lea.vmem %s10921_s13, 4096 }
 0x511   : > { %v6644_v3 = vadd.f32 %v10608_v47, %v6628_v11  ;;  %v6629_v41 = vmul.f32 %v10603_v12, %v6580_v22  ;;  %p8463_p4 = scmp.ne.s32.totalorder %s10921_s13, %s8462_s23  ;;  %p8470_p13 = scmp.lt.s32.totalorder %s8468_s24, %s8462_s23 }
 0x512   : > { %v6678_v14 = vadd.f32 %v7266_v60, %v6646_v40  ;;  %v6647_v29 = vadd.f32 %v10608_v47, %v6631_v25 }
 0x513   : > { %v6676_v16 = vadd.f32 %v7264_v61, %v6644_v3  ;;  %v6645_v38 = vadd.f32 %v10608_v47, %v6629_v41  ;;  %p8464_p6 = pnand %p8463_p4, %p8690_p12  ;;  %p8471_p3 = por %p8470_p13, %p8469_p10 }
 0x514   : > { %v6694_v18 = vmax.f32 %v6678_v14, 0.0  ;;  %v6679_v9 = vadd.f32 %v7267_v1, %v6647_v29 }
 0x515   : > { %v6692_v37 = vmax.f32 %v6676_v16, 0.0  ;;  %v6677_v48 = vadd.f32 %v7265_v50, %v6645_v38  ;;  %p8465_p8 = pneg %p8464_p6 }
 0x516   : > { %7282 = vst.msk [vmem:[%s10624_s30 + $0xb0] sm:$0xff] %vm554_vm0, %v6694_v18  ;;  %v6695_v53 = vmax.f32 %v6679_v9, 0.0 }
 0x517   : > { %7280 = vst.msk [vmem:[%s10624_s30 + $0xa0] sm:$0xff] %vm554_vm0, %v6692_v37  ;;  %v6693_v57 = vmax.f32 %v6677_v48, 0.0  ;;  %p8472_p7 = pnand %p8471_p3, %p8465_p8 }
 0x518   : > { %7283 = vst.msk [vmem:[%s10624_s30 + $0xb8] sm:$0xff] %vm554_vm0, %v6695_v53 }
 0x519   : > { %7281 = vst.msk [vmem:[%s10624_s30 + $0xa8] sm:$0xff] %vm554_vm0, %v6693_v57 }
 0x51d   : > { %v8083_v8 = vpop.f32.mrb[168].mxu1 }
 0x51e   : > { %v6634_v51 = vmul.f32 %v8083_v8, %v10603_v12  ;;  %v6593_v33 = vpop.f32.mrb[169].mxu1 }
 0x51f   : > { %v6632_v52 = vmul.f32 %v10603_v12, %v6593_v33  ;;  %v8084_v31 = vpop.f32.mrb[170].mxu1 }
 0x520   : > { %v6650_v26 = vadd.f32 %v10608_v47, %v6634_v51  ;;  %v6635_v24 = vmul.f32 %v8084_v31, %v10603_v12  ;;  %v6596_v63 = vpop.f32.mrb[171].mxu1 }
 0x521   : > { %v6648_v43 = vadd.f32 %v10608_v47, %v6632_v52  ;;  %v6633_v10 = vmul.f32 %v10603_v12, %v6596_v63 }
 0x522   : > { %v6682_v62 = vadd.f32 %v7270_v49, %v6650_v26  ;;  %v6651_v19 = vadd.f32 %v10608_v47, %v6635_v24 }
 0x523   : > { %v6680_v6 = vadd.f32 %v7268_v5, %v6648_v43  ;;  %v6649_v54 = vadd.f32 %v10608_v47, %v6633_v10 }
 0x524   : > { %v6698_v15 = vmax.f32 %v6682_v62, 0.0  ;;  %v6683_v42 = vadd.f32 %v7271_v27, %v6651_v19 }
 0x525   : > { %v6696_v32 = vmax.f32 %v6680_v6, 0.0  ;;  %v6681_v21 = vadd.f32 %v7269_v17, %v6649_v54 }
 0x526   : > { %7286 = vst.msk [vmem:[%s10624_s30 + $0xd0] sm:$0xff] %vm554_vm0, %v6698_v15  ;;  %v6699_v55 = vmax.f32 %v6683_v42, 0.0 }
 0x527   : > { %7284 = vst.msk [vmem:[%s10624_s30 + $0xc0] sm:$0xff] %vm554_vm0, %v6696_v32  ;;  %v6697_v36 = vmax.f32 %v6681_v21, 0.0 }
 0x528   : > { %7287 = vst.msk [vmem:[%s10624_s30 + $0xd8] sm:$0xff] %vm554_vm0, %v6699_v55 }
 0x529   : > { %7285 = vst.msk [vmem:[%s10624_s30 + $0xc8] sm:$0xff] %vm554_vm0, %v6697_v36 }
 0x52d   : > { %v8087_v58 = vpop.f32.mrb[172].mxu1 }
 0x52e   : > { %v6638_v56 = vmul.f32 %v8087_v58, %v10603_v12  ;;  %v6609_v46 = vpop.f32.mrb[173].mxu1 }
 0x52f   : > { %v6636_v28 = vmul.f32 %v10603_v12, %v6609_v46  ;;  %v8088_v35 = vpop.f32.mrb[174].mxu1 }
 0x530   : > { %v6654_v44 = vadd.f32 %v10608_v47, %v6638_v56  ;;  %v6639_v4 = vmul.f32 %v8088_v35, %v10603_v12  ;;  %v6612_v23 = vpop.f32.mrb[175].mxu1 }
 0x531   : > { %v6652_v20 = vadd.f32 %v10608_v47, %v6636_v28  ;;  %v6637_v7 = vmul.f32 %v10603_v12, %v6612_v23 }
 0x532   : > { %v6686_v2 = vadd.f32 %v7274_v0, %v6654_v44  ;;  %v6655_v59 = vadd.f32 %v10608_v47, %v6639_v4 }
 0x533   : > { %v6684_v45 = vadd.f32 %v7272_v30, %v6652_v20  ;;  %v6653_v60 = vadd.f32 %v10608_v47, %v6637_v7 }
 0x534   : > { %v6702_v11 = vmax.f32 %v6686_v2, 0.0  ;;  %v6687_v13 = vadd.f32 %v7275_v34, %v6655_v59 }
 0x535   : > { %v6700_v40 = vmax.f32 %v6684_v45, 0.0  ;;  %v6685_v61 = vadd.f32 %v7273_v39, %v6653_v60 }
 0x536   : > { %7290 = vst.msk [vmem:[%s10624_s30 + $0xf0] sm:$0xff] %vm554_vm0, %v6702_v11  ;;  %v6703_v12 = vmax.f32 %v6687_v13, 0.0 }
 0x537   : > { %7288 = vst.msk [vmem:[%s10624_s30 + $0xe0] sm:$0xff] %vm554_vm0, %v6700_v40  ;;  %v6701_v47 = vmax.f32 %v6685_v61, 0.0 }
 0x538   : > { %7291 = vst.msk [vmem:[%s10624_s30 + $0xf8] sm:$0xff] %vm554_vm0, %v6703_v12 }
 0x539   : > { %7289 = vst.msk [vmem:[%s10624_s30 + $0xe8] sm:$0xff] %vm554_vm0, %v6701_v47 }
 0x53a   : > { %8475 = shalt.err (!%p8472_p7)
}
 0x53b   : > { %s8476_s30 = scalar_lea.hbm %s10919_s11, 4096  ;;  %s8480_s27 = scalar_lea.hbm %s10981_s10, 8192 }
 0x53c   : > { %p8477_p9 = scmp.ne.s32.totalorder %s10919_s11, %s8476_s30  ;;  %p8481_p5 = scmp.lt.u32.totalorder %s10919_s11, %s10981_s10 }
 0x53d   : > { %p8482_p11 = scmp.lt.u32.totalorder %s8480_s27, %s8476_s30  ;;  %p8484_p4 = scmp.lt.u32.totalorder %s8476_s30, %s10919_s11 }
 0x53e   : > { %p8478_p2 = pnand %p8477_p9, %p8690_p12 }
 0x53f   : > { %p8483_p1 = por %p8482_p11, %p8481_p5 }
 0x540   : > { %p8479_p0 = pneg %p8478_p2 }
 0x541   : > { %p8485_p6 = por %p8484_p4, %p8483_p1 }
 0x543   : > { %p8486_p8 = pnand %p8485_p6, %p8479_p0 }
 0x545   : > { %8489 = shalt.err (!%p8486_p8)
}
 0x546   : > { %s8542_s29 = smov 128   ;;  %s8543_s23 = smov 8  }
 0x547   : > { %8095 = dma.vmem_to_hbm [thread:$0]  (%p8690_p12), %s10921_s13, 4096, %s10919_s11, %s6722_s17, %s8542_s29, %s8542_s29, %s8543_s23  }
 0x548 PF: > { %s11061_s18 = sld [smem:[#allocation12_spill]]  ;;  %s11062_s21 = sld [smem:[#allocation13_spill]] }
 0x549   : > { %p11064_p13 = scmp.ge.s32.totalorder %s8532_s16, 2 }
 0x54e   : > { %s6750_s24 = sand.u32 1, %s11061_s18   ;;  %p11063_p10 = scmp.ne.s32.totalorder %s11062_s21, 0 }
 0x54f   : > { %s6751_s30 = scalar_lea.sflag [#allocation5], %s6750_s24 }
 0x550   : > { %p8106_p3 = pnand %p11064_p13, %p11063_p10 }
 0x552   : > { %8515 = dma.done.wait (!%p8106_p3), %s6751_s30, 4096  }
 0x553   : > { %8517 = vsyncadd (!%p8106_p3), %s6751_s30, 4294963200  ;;  %s11065_s16 = sld [smem:[#allocation14_spill]]  ;;  %s11066_s13 = smov %s8524_s14 }
 0x554   : > { %s11067_s14 = smov %s8528_s15  ;;  %s11068_s15 = smov %s8686_s25 }
 0x559   : > { %p24_p7 = scmp.ge.s32.totalorder %s11065_s16, 4  }
 0x55b   :  { %26 = sbr.rel (!%p24_p7) target bundleno = 6 (0x6), region = 120 }
 0x562   :  { %6756 = vsyncpa [#allocation4], 1 }
 0x563   :  { %6758 = vsyncpa [#allocation4 + $0x1], 1 }
 0x564   :  { %6759 = vsyncpa [#allocation7], 1 }
 0x565   :  { %6760 = vsyncpa [#allocation5], 1 }
 0x566   :  { %6762 = vsyncpa [#allocation5 + $0x1], 1 }

</bundles_post_ra>
